<compile_context>
chip_gen: v7x
topology: tpu7x:2x2x1
jax: 0.10.0
libtpu: 0.0.40
codegen_flags: <defaults>
</compile_context>

<pallas_src>
import jax
import jax.numpy as jnp
from jax.experimental import pallas as pl
from jax.experimental.pallas import tpu as pltpu


# ----------------------------------------------------------------------------- helpers

def _round_up(x, m):
    return ((x + m - 1) // m) * m


def _vmem_capacity_bytes():
    try:
        return int(pltpu.get_tpu_info().vmem_capacity_bytes)
    except Exception:
        return 64 * 1024 * 1024  # conservative fallback (v7x per-TensorCore VMEM)


def _pick_row_tile(N, H, W, C):
    """Largest row tile TH (divisor of H) whose tail-conv working set fits a VMEM budget,
    while keeping >= 2 parallel grid steps so both v7x TensorCores get work."""
    budget = _vmem_capacity_bytes() // 3
    wp = _round_up(W + 2, 16)
    choice = 1
    for th in range(H, 0, -1):
        if H % th:
            continue
        if N * (H // th) < 2 and th > 1:
            continue                              # ensure >=2 parallel steps (megacore)
        est = (2 * th * wp * C * 2                # double-buffered main input tile (bf16)
               + 4 * wp * C * 2                   # double-buffered 1-row halos (bf16)
               + (th + 2) * wp * C * 2            # halo'd xs scratch (bf16)
               + 2 * th * wp * 128 * 4            # f32 partials / relayout headroom (lane-padded)
               + 2 * th * W * 128 * 4)            # double-buffered output block (lane-padded)
        if est <= budget:
            choice = th
            break
    return choice


# ----------------------------------------------------------------------------- head conv (Cin=2)

def _head_kernel_factory(th, W, Wi, Wp, Cout):
    def kernel(x_ref, w_ref, b_ref, o_ref):
        # Single MXU matmul over the 18-channel im2col tile; bias in f32, cast at store.
        y = jnp.dot(x_ref[0], w_ref[...], preferred_element_type=jnp.float32)
        y = (y + b_ref[...]).astype(o_ref.dtype).reshape(th, Wi, Cout)
        # Write a column-padded, lane-aligned layout that the tail consumes directly.
        o_ref[0, :, pl.ds(1, W), :] = y[:, 0:W, :]
        o_ref[0, :, pl.ds(0, 1), :] = jnp.zeros((th, 1, Cout), o_ref.dtype)
        o_ref[0, :, pl.ds(W + 1, Wp - W - 1), :] = jnp.zeros((th, Wp - W - 1, Cout), o_ref.dtype)
    return kernel


def head_conv3x3(x_nhwc, w_oihw, b, th, vmem_limit):
    """3x3 'same' conv for the small-Cin head.

    Returns the feature map in column-padded layout (N, H, Wp, Cout) bf16 with
    Wp = roundup(W+2, 16); column 0 and columns >= W+1 are zero, so the tail needs no
    host-side padding pass over the 180-channel intermediate."""
    N, H, W, Cin = x_nhwc.shape
    Cout = w_oihw.shape[0]
    R = H // th
    Wi = _round_up(W, 16)          # lane/sublane-aligned im2col width
    Wp = _round_up(W + 2, 16)      # aligned padded output width
    K = 9 * Cin

    # Host im2col of the tiny Cin=2 input -> (N, H*Wi, 18) bf16 (~10% of the head-output bytes);
    # keeps the head kernel a single dense MXU matmul with no narrow 2-lane VMEM copies.
    xpad = jnp.pad(x_nhwc, ((0, 0), (1, 1), (1, 1 + (Wi - W)), (0, 0)))
    cols = [xpad[:, ky:ky + H, kx:kx + Wi, :] for ky in range(3) for kx in range(3)]
    x_i2c = jnp.concatenate(cols, axis=-1).reshape(N, H * Wi, K).astype(jnp.bfloat16)

    w_k = jnp.transpose(w_oihw, (2, 3, 1, 0)).reshape(K, Cout).astype(jnp.bfloat16)
    bias = b.reshape(1, Cout).astype(jnp.float32)

    return pl.pallas_call(
        _head_kernel_factory(th, W, Wi, Wp, Cout),
        out_shape=jax.ShapeDtypeStruct((N, H, Wp, Cout), jnp.bfloat16),
        grid_spec=pltpu.PrefetchScalarGridSpec(
            num_scalar_prefetch=0,
            grid=(N, R),
            in_specs=[
                pl.BlockSpec((1, th * Wi, K), lambda n, r: (n, r, 0)),
                pl.BlockSpec((K, Cout), lambda n, r: (0, 0)),     # weights, resident
                pl.BlockSpec((1, Cout), lambda n, r: (0, 0)),     # bias, resident
            ],
            out_specs=pl.BlockSpec((1, th, Wp, Cout), lambda n, r: (n, r, 0, 0)),
        ),
        compiler_params=pltpu.CompilerParams(
            dimension_semantics=("parallel", "parallel"),
            vmem_limit_bytes=vmem_limit,
        ),
    )(x_i2c, w_k, bias)


# ----------------------------------------------------------------------------- tail conv (Cin=180)

def _tail_kernel_factory(th, W, Wp, Cin, Cout):
    def kernel(x_ref, top_ref, bot_ref, w_ref, b_ref, o_ref, xs_ref):
        r = pl.program_id(1)
        last = pl.num_programs(1) - 1

        # Assemble the row-halo'd tile: xs[j] == feature row (r*th + j - 1); columns are already
        # zero-padded by the head.  Halos come from clamped index_maps; zero them at image edges.
        xs_ref[0] = top_ref[0, 0]
        xs_ref[pl.ds(1, th)] = x_ref[0]
        xs_ref[th + 1] = bot_ref[0, 0]

        @pl.when(r == 0)
        def _():
            xs_ref[0] = jnp.zeros((Wp, Cin), xs_ref.dtype)

        @pl.when(r == last)
        def _():
            xs_ref[th + 1] = jnp.zeros((Wp, Cin), xs_ref.dtype)

        # 3 long-K matmuls (one per ky); the 3 kx taps are folded into the 3*Cout output columns.
        # Accumulator initialized with the first dot (no zero + += round trip).
        acc = jnp.dot(xs_ref[pl.ds(0, th)].reshape(th * Wp, Cin), w_ref[0],
                      preferred_element_type=jnp.float32)
        for ky in (1, 2):
            acc = acc + jnp.dot(xs_ref[pl.ds(ky, th)].reshape(th * Wp, Cin), w_ref[ky],
                                preferred_element_type=jnp.float32)

        # Shift-combine over kx:  out[y, x] = sum_kx acc[y, x + kx, kx-th Cout block]  (+ bias)
        acc = acc.reshape(th, Wp, 3 * Cout)
        y = (acc[:, 0:W, 0:Cout]
             + acc[:, 1:W + 1, Cout:2 * Cout]
             + acc[:, 2:W + 2, 2 * Cout:3 * Cout]) + b_ref[...]
        o_ref[0] = y.astype(o_ref.dtype)

    return kernel


def tail_conv3x3(feat_pad, w_oihw, b, W, th, vmem_limit, res_scale=1.0):
    """3x3 'same' conv of the column-padded feature map; returns (N, H, W, Cout) f32.

    `res_scale` folds `res = body(x) + x` (body == identity) into the weights: tail(2*x)."""
    N, H, Wp, Cin = feat_pad.shape
    Cout = w_oihw.shape[0]
    R = H // th

    # (Cout, Cin, 3, 3) -> (ky, Cin, kx*Cout), residual scale folded in (exact power-of-two scale).
    wt = jnp.transpose(w_oihw, (2, 3, 1, 0))                 # (ky, kx, Cin, Cout)
    wt = jnp.transpose(wt, (0, 2, 1, 3)).reshape(3, Cin, 3 * Cout)
    wt = (wt * res_scale).astype(jnp.bfloat16)
    bias = b.reshape(1, Cout).astype(jnp.float32)

    return pl.pallas_call(
        _tail_kernel_factory(th, W, Wp, Cin, Cout),
        out_shape=jax.ShapeDtypeStruct((N, H, W, Cout), jnp.float32),
        grid_spec=pltpu.PrefetchScalarGridSpec(
            num_scalar_prefetch=0,
            grid=(N, R),
            in_specs=[
                pl.BlockSpec((1, th, Wp, Cin), lambda n, r: (n, r, 0, 0)),
                # 1-row top/bottom halos of the SAME array, clamped at the image edges
                pl.BlockSpec((1, 1, Wp, Cin),
                             lambda n, r: (n, jnp.maximum(r * th - 1, 0), 0, 0)),
                pl.BlockSpec((1, 1, Wp, Cin),
                             lambda n, r: (n, jnp.minimum((r + 1) * th, H - 1), 0, 0)),
                pl.BlockSpec((3, Cin, 3 * Cout), lambda n, r: (0, 0, 0)),   # weights, resident
                pl.BlockSpec((1, Cout), lambda n, r: (0, 0)),               # bias, resident
            ],
            out_specs=pl.BlockSpec((1, th, W, Cout), lambda n, r: (n, r, 0, 0)),
            scratch_shapes=[pltpu.VMEM((th + 2, Wp, Cin), jnp.bfloat16)],   # halo'd input tile
        ),
        compiler_params=pltpu.CompilerParams(
            dimension_semantics=("parallel", "parallel"),
            vmem_limit_bytes=vmem_limit,
        ),
    )(feat_pad, feat_pad, feat_pad, wt, bias)


# ----------------------------------------------------------------------------- ELAN forward

def init_params(key, colors=2, c_elan=180):
    """Deterministic PyTorch-style uniform(-1/sqrt(fan_in), 1/sqrt(fan_in)) conv init."""
    k1, k2, k3, k4 = jax.random.split(key, 4)

    def conv_init(kw, kb, cout, cin, k=3):
        bound = (1.0 / (cin * k * k)) ** 0.5
        w = jax.random.uniform(kw, (cout, cin, k, k), jnp.float32, -bound, bound)
        bb = jax.random.uniform(kb, (cout,), jnp.float32, -bound, bound)
        return w, bb

    head_w, head_b = conv_init(k1, k2, c_elan, colors)
    tail_w, tail_b = conv_init(k3, k4, colors, c_elan)
    return {"head_w": head_w, "head_b": head_b, "tail_w": tail_w, "tail_b": tail_b}


def elan_forward(x_nchw, params, *, row_tile=None):
    N, _, H, W = x_nchw.shape
    c_elan = params["head_w"].shape[0]

    th = _pick_row_tile(N, H, W, c_elan) if row_tile is None else row_tile
    assert H % th == 0
    vmem_limit = int(_vmem_capacity_bytes() * 0.9)

    x = jnp.transpose(x_nchw, (0, 2, 3, 1))                    # NCHW -> NHWC (tiny, 2 channels)

    # x = self.head(x)  -> column-padded bf16 feature map, consumed directly by the tail.
    feat = head_conv3x3(x, params["head_w"], params["head_b"], th, vmem_limit)

    # TODO(synk): ELAB body blocks are not defined in the provided source; body == identity.
    # res = body(x) + x == 2 * feat; the factor 2 is folded into the tail weights (res_scale=2)
    # so the 180-channel intermediate is read from HBM exactly once.
    out = tail_conv3x3(feat, params["tail_w"], params["tail_b"], W, th, vmem_limit,
                       res_scale=2.0)                          # (N, H, W, colors) f32

    out = jnp.transpose(out, (0, 3, 1, 2))                     # NHWC -> NCHW
    return out[:, :, :H, :W]                                   # crop (no-op for 'same' padding)


def elan_reference(x_nchw, params):
    """Pure-XLA reference matching the kernel's bf16 rounding points (tolerance check)."""
    bf = lambda a: a.astype(jnp.bfloat16).astype(jnp.float32)

    def conv(v, w, b):
        out = jax.lax.conv_general_dilated(
            v, jnp.transpose(w, (2, 3, 1, 0)), (1, 1), "SAME",
            dimension_numbers=("NHWC", "HWIO", "NHWC"))
        return out + b

    x = jnp.transpose(x_nchw, (0, 2, 3, 1))
    feat = bf(conv(bf(x), bf(params["head_w"]), params["head_b"]))
    res = feat + feat                                          # body == identity
    out = conv(res, bf(params["tail_w"]), params["tail_b"])
    return jnp.transpose(out, (0, 3, 1, 2))


if __name__ == "__main__":
    key = jax.random.PRNGKey(0)
    kx_, kp = jax.random.split(key)
    x = jax.random.normal(kx_, (2, 2, 16, 16), jnp.float32)    # (N, colors=2, H, W)
    params = init_params(kp)

    fwd = jax.jit(elan_forward, static_argnames=("row_tile",))

    y = fwd(x, params)
    jax.block_until_ready(y)
    assert y.shape == (2, 2, 16, 16) and y.dtype == jnp.float32

    y_ref = elan_reference(x, params)
    assert jnp.allclose(y, y_ref, atol=1e-2, rtol=1e-2), float(jnp.max(jnp.abs(y - y_ref)))

    # Also exercise the multi-row-tile path (inter-tile halo rows via clamped index_maps).
    y4 = fwd(x, params, row_tile=4)
    jax.block_until_ready(y4)
    assert jnp.allclose(y4, y_ref, atol=1e-2, rtol=1e-2), float(jnp.max(jnp.abs(y4 - y_ref)))

    print("KERNEL_OK")
</pallas_src>

<mosaic_0001>
module attributes {stable_mosaic.version = 11 : i64} {
  func.func @kernel(%arg0: i32, %arg1: i32, %arg2: memref<1x16x32x180xbf16, #tpu.memory_space<vmem>>, %arg3: memref<1x1x32x180xbf16, #tpu.memory_space<vmem>>, %arg4: memref<1x1x32x180xbf16, #tpu.memory_space<vmem>>, %arg5: memref<3x180x6xbf16, #tpu.memory_space<vmem>>, %arg6: memref<1x2xf32, #tpu.memory_space<vmem>>, %arg7: memref<1x16x16x2xf32, #tpu.memory_space<vmem>>, %arg8: memref<18x32x180xbf16, #tpu.memory_space<vmem>>) attributes {dimension_semantics = [#tpu.dimension_semantics<parallel>, #tpu.dimension_semantics<parallel>], iteration_bounds = array<i64: 2, 1>, scalar_prefetch = 0 : i64, scratch_operands = 1 : i64, tpu.core_type = #tpu.core_type<tc>, window_params = [{transform_indices = @transform_0, window_bounds = array<i64: 1, 16, 32, 180>}, {transform_indices = @transform_1, window_bounds = array<i64: 1, 1, 32, 180>}, {transform_indices = @transform_2, window_bounds = array<i64: 1, 1, 32, 180>}, {pipeline_mode = #tpu.pipeline_mode<synchronous>, transform_indices = @transform_3, window_bounds = array<i64: 3, 180, 6>}, {pipeline_mode = #tpu.pipeline_mode<synchronous>, transform_indices = @transform_4, window_bounds = array<i64: 1, 2>}, {transform_indices = @transform_5, window_bounds = array<i64: 1, 16, 16, 2>}]} {
    %c0 = arith.constant 0 : index
    %c0_0 = arith.constant 0 : index
    %c0_1 = arith.constant 0 : index
    %c0_2 = arith.constant 0 : index
    %0 = vector.load %arg3[%c0, %c0_0, %c0_1, %c0_2] : memref<1x1x32x180xbf16, #tpu.memory_space<vmem>>, vector<1x1x32x180xbf16>
    %1 = vector.shape_cast %0 : vector<1x1x32x180xbf16> to vector<32x180xbf16>
    %c0_3 = arith.constant 0 : index
    %c0_4 = arith.constant 0 : index
    %c0_5 = arith.constant 0 : index
    %2 = vector.load %arg8[%c0_3, %c0_4, %c0_5] : memref<18x32x180xbf16, #tpu.memory_space<vmem>>, vector<1x32x180xbf16>
    %3 = vector.shape_cast %2 : vector<1x32x180xbf16> to vector<32x180xbf16>
    %4 = vector.shape_cast %1 : vector<32x180xbf16> to vector<1x32x180xbf16>
    tpu.vector_store %arg8[%c0_3, %c0_4, %c0_5], %4 {strides = array<i32>} : memref<18x32x180xbf16, #tpu.memory_space<vmem>>, vector<1x32x180xbf16>,
    %c0_6 = arith.constant 0 : index
    %c0_7 = arith.constant 0 : index
    %c0_8 = arith.constant 0 : index
    %c0_9 = arith.constant 0 : index
    %5 = vector.load %arg2[%c0_6, %c0_7, %c0_8, %c0_9] : memref<1x16x32x180xbf16, #tpu.memory_space<vmem>>, vector<1x16x32x180xbf16>
    %6 = vector.shape_cast %5 : vector<1x16x32x180xbf16> to vector<16x32x180xbf16>
    %c1 = arith.constant 1 : index
    %c0_10 = arith.constant 0 : index
    %c0_11 = arith.constant 0 : index
    %7 = vector.load %arg8[%c1, %c0_10, %c0_11] : memref<18x32x180xbf16, #tpu.memory_space<vmem>>, vector<16x32x180xbf16>
    tpu.vector_store %arg8[%c1, %c0_10, %c0_11], %6 {strides = array<i32>} : memref<18x32x180xbf16, #tpu.memory_space<vmem>>, vector<16x32x180xbf16>,
    %c0_12 = arith.constant 0 : index
    %c0_13 = arith.constant 0 : index
    %c0_14 = arith.constant 0 : index
    %c0_15 = arith.constant 0 : index
    %8 = vector.load %arg4[%c0_12, %c0_13, %c0_14, %c0_15] : memref<1x1x32x180xbf16, #tpu.memory_space<vmem>>, vector<1x1x32x180xbf16>
    %9 = vector.shape_cast %8 : vector<1x1x32x180xbf16> to vector<32x180xbf16>
    %c17 = arith.constant 17 : index
    %c0_16 = arith.constant 0 : index
    %c0_17 = arith.constant 0 : index
    %10 = vector.load %arg8[%c17, %c0_16, %c0_17] : memref<18x32x180xbf16, #tpu.memory_space<vmem>>, vector<1x32x180xbf16>
    %11 = vector.shape_cast %10 : vector<1x32x180xbf16> to vector<32x180xbf16>
    %12 = vector.shape_cast %9 : vector<32x180xbf16> to vector<1x32x180xbf16>
    tpu.vector_store %arg8[%c17, %c0_16, %c0_17], %12 {strides = array<i32>} : memref<18x32x180xbf16, #tpu.memory_space<vmem>>, vector<1x32x180xbf16>,
    %c0_i32 = arith.constant 0 : i32
    %13 = arith.cmpi eq, %arg1, %c0_i32 : i32
    %14 = arith.extui %13 : i1 to i32
    %c0_i32_18 = arith.constant 0 : i32
    %15 = arith.cmpi ne, %14, %c0_i32_18 : i32
    scf.if %15 {
      %cst_46 = arith.constant 0.000000e+00 : bf16
      %49 = vector.broadcast %cst_46 : bf16 to vector<32x180xbf16>
      %c0_47 = arith.constant 0 : index
      %c0_48 = arith.constant 0 : index
      %c0_49 = arith.constant 0 : index
      %50 = vector.load %arg8[%c0_47, %c0_48, %c0_49] : memref<18x32x180xbf16, #tpu.memory_space<vmem>>, vector<1x32x180xbf16>
      %51 = vector.shape_cast %50 : vector<1x32x180xbf16> to vector<32x180xbf16>
      %52 = vector.shape_cast %49 : vector<32x180xbf16> to vector<1x32x180xbf16>
      tpu.vector_store %arg8[%c0_47, %c0_48, %c0_49], %52 {strides = array<i32>} : memref<18x32x180xbf16, #tpu.memory_space<vmem>>, vector<1x32x180xbf16>,
    } else {
    }
    %c0_i32_19 = arith.constant 0 : i32
    %16 = arith.cmpi eq, %arg1, %c0_i32_19 : i32
    %17 = arith.extui %16 : i1 to i32
    %c0_i32_20 = arith.constant 0 : i32
    %18 = arith.cmpi ne, %17, %c0_i32_20 : i32
    scf.if %18 {
      %cst_46 = arith.constant 0.000000e+00 : bf16
      %49 = vector.broadcast %cst_46 : bf16 to vector<32x180xbf16>
      %c17_47 = arith.constant 17 : index
      %c0_48 = arith.constant 0 : index
      %c0_49 = arith.constant 0 : index
      %50 = vector.load %arg8[%c17_47, %c0_48, %c0_49] : memref<18x32x180xbf16, #tpu.memory_space<vmem>>, vector<1x32x180xbf16>
      %51 = vector.shape_cast %50 : vector<1x32x180xbf16> to vector<32x180xbf16>
      %52 = vector.shape_cast %49 : vector<32x180xbf16> to vector<1x32x180xbf16>
      tpu.vector_store %arg8[%c17_47, %c0_48, %c0_49], %52 {strides = array<i32>} : memref<18x32x180xbf16, #tpu.memory_space<vmem>>, vector<1x32x180xbf16>,
    } else {
    }
    %c0_21 = arith.constant 0 : index
    %c0_22 = arith.constant 0 : index
    %c0_23 = arith.constant 0 : index
    %19 = vector.load %arg8[%c0_21, %c0_22, %c0_23] : memref<18x32x180xbf16, #tpu.memory_space<vmem>>, vector<16x32x180xbf16>
    %20 = vector.shape_cast %19 : vector<16x32x180xbf16> to vector<512x180xbf16>
    %c0_24 = arith.constant 0 : index
    %c0_25 = arith.constant 0 : index
    %c0_26 = arith.constant 0 : index
    %21 = vector.load %arg5[%c0_24, %c0_25, %c0_26] : memref<3x180x6xbf16, #tpu.memory_space<vmem>>, vector<1x180x6xbf16>
    %22 = vector.shape_cast %21 : vector<1x180x6xbf16> to vector<180x6xbf16>
    %cst = arith.constant dense<0.000000e+00> : vector<512x6xf32>
    %23 = tpu.matmul %20, %22, %cst {dimension_numbers = #tpu.dot_dimension_numbers<[1], [0], [0], [1], [0, 0, 1, 1], [], []>} : vector<512x180xbf16>, vector<180x6xbf16>, vector<512x6xf32> -> vector<512x6xf32>
    %c1_27 = arith.constant 1 : index
    %c0_28 = arith.constant 0 : index
    %c0_29 = arith.constant 0 : index
    %24 = vector.load %arg8[%c1_27, %c0_28, %c0_29] : memref<18x32x180xbf16, #tpu.memory_space<vmem>>, vector<16x32x180xbf16>
    %25 = vector.shape_cast %24 : vector<16x32x180xbf16> to vector<512x180xbf16>
    %c1_30 = arith.constant 1 : index
    %c0_31 = arith.constant 0 : index
    %c0_32 = arith.constant 0 : index
    %26 = vector.load %arg5[%c1_30, %c0_31, %c0_32] : memref<3x180x6xbf16, #tpu.memory_space<vmem>>, vector<1x180x6xbf16>
    %27 = vector.shape_cast %26 : vector<1x180x6xbf16> to vector<180x6xbf16>
    %cst_33 = arith.constant dense<0.000000e+00> : vector<512x6xf32>
    %28 = tpu.matmul %25, %27, %cst_33 {dimension_numbers = #tpu.dot_dimension_numbers<[1], [0], [0], [1], [0, 0, 1, 1], [], []>} : vector<512x180xbf16>, vector<180x6xbf16>, vector<512x6xf32> -> vector<512x6xf32>
    %29 = arith.addf %23, %28 : vector<512x6xf32>
    %c2 = arith.constant 2 : index
    %c0_34 = arith.constant 0 : index
    %c0_35 = arith.constant 0 : index
    %30 = vector.load %arg8[%c2, %c0_34, %c0_35] : memref<18x32x180xbf16, #tpu.memory_space<vmem>>, vector<16x32x180xbf16>
    %31 = vector.shape_cast %30 : vector<16x32x180xbf16> to vector<512x180xbf16>
    %c2_36 = arith.constant 2 : index
    %c0_37 = arith.constant 0 : index
    %c0_38 = arith.constant 0 : index
    %32 = vector.load %arg5[%c2_36, %c0_37, %c0_38] : memref<3x180x6xbf16, #tpu.memory_space<vmem>>, vector<1x180x6xbf16>
    %33 = vector.shape_cast %32 : vector<1x180x6xbf16> to vector<180x6xbf16>
    %cst_39 = arith.constant dense<0.000000e+00> : vector<512x6xf32>
    %34 = tpu.matmul %31, %33, %cst_39 {dimension_numbers = #tpu.dot_dimension_numbers<[1], [0], [0], [1], [0, 0, 1, 1], [], []>} : vector<512x180xbf16>, vector<180x6xbf16>, vector<512x6xf32> -> vector<512x6xf32>
    %35 = arith.addf %29, %34 : vector<512x6xf32>
    %36 = vector.shape_cast %35 : vector<512x6xf32> to vector<16x32x6xf32>
    %37 = vector.extract_strided_slice %36 {offsets = [0, 0, 0], sizes = [16, 16, 2], strides = [1, 1, 1]} : vector<16x32x6xf32> to vector<16x16x2xf32>
    %38 = vector.extract_strided_slice %36 {offsets = [0, 1, 2], sizes = [16, 16, 2], strides = [1, 1, 1]} : vector<16x32x6xf32> to vector<16x16x2xf32>
    %39 = arith.addf %37, %38 : vector<16x16x2xf32>
    %40 = vector.extract_strided_slice %36 {offsets = [0, 2, 4], sizes = [16, 16, 2], strides = [1, 1, 1]} : vector<16x32x6xf32> to vector<16x16x2xf32>
    %41 = arith.addf %39, %40 : vector<16x16x2xf32>
    %c0_40 = arith.constant 0 : index
    %c0_41 = arith.constant 0 : index
    %42 = vector.load %arg6[%c0_40, %c0_41] : memref<1x2xf32, #tpu.memory_space<vmem>>, vector<1x2xf32>
    %43 = vector.shape_cast %42 : vector<1x2xf32> to vector<1x1x2xf32>
    %44 = vector.broadcast %43 : vector<1x1x2xf32> to vector<16x16x2xf32>
    %45 = arith.addf %41, %44 : vector<16x16x2xf32>
    %c0_42 = arith.constant 0 : index
    %c0_43 = arith.constant 0 : index
    %c0_44 = arith.constant 0 : index
    %c0_45 = arith.constant 0 : index
    %46 = vector.load %arg7[%c0_42, %c0_43, %c0_44, %c0_45] : memref<1x16x16x2xf32, #tpu.memory_space<vmem>>, vector<1x16x16x2xf32>
    %47 = vector.shape_cast %46 : vector<1x16x16x2xf32> to vector<16x16x2xf32>
    %48 = vector.shape_cast %45 : vector<16x16x2xf32> to vector<1x16x16x2xf32>
    tpu.vector_store %arg7[%c0_42, %c0_43, %c0_44, %c0_45], %48 {strides = array<i32>} : memref<1x16x16x2xf32, #tpu.memory_space<vmem>>, vector<1x16x16x2xf32>,
    return
  }
  func.func @transform_0(%arg0: i32, %arg1: i32) -> (i32, i32, i32, i32) {
    %c0_i32 = arith.constant 0 : i32
    %c0_i32_0 = arith.constant 0 : i32
    %c0_i32_1 = arith.constant 0 : i32
    return %arg0, %arg1, %c0_i32, %c0_i32_0 : i32, i32, i32, i32
  }
  func.func @transform_1(%arg0: i32, %arg1: i32) -> (i32, i32, i32, i32) {
    %c16_i32 = arith.constant 16 : i32
    %0 = arith.muli %arg1, %c16_i32 : i32
    %c1_i32 = arith.constant 1 : i32
    %1 = arith.subi %0, %c1_i32 : i32
    %c0_i32 = arith.constant 0 : i32
    %2 = arith.maxsi %1, %c0_i32 : i32
    %c0_i32_0 = arith.constant 0 : i32
    %c0_i32_1 = arith.constant 0 : i32
    %c0_i32_2 = arith.constant 0 : i32
    return %arg0, %2, %c0_i32_0, %c0_i32_1 : i32, i32, i32, i32
  }
  func.func @transform_2(%arg0: i32, %arg1: i32) -> (i32, i32, i32, i32) {
    %c1_i32 = arith.constant 1 : i32
    %0 = arith.addi %arg1, %c1_i32 : i32
    %c16_i32 = arith.constant 16 : i32
    %1 = arith.muli %0, %c16_i32 : i32
    %c15_i32 = arith.constant 15 : i32
    %2 = arith.minsi %1, %c15_i32 : i32
    %c0_i32 = arith.constant 0 : i32
    %c0_i32_0 = arith.constant 0 : i32
    %c0_i32_1 = arith.constant 0 : i32
    return %arg0, %2, %c0_i32, %c0_i32_0 : i32, i32, i32, i32
  }
  func.func @transform_3(%arg0: i32, %arg1: i32) -> (i32, i32, i32) {
    %c0_i32 = arith.constant 0 : i32
    %c0_i32_0 = arith.constant 0 : i32
    %c0_i32_1 = arith.constant 0 : i32
    %c0_i32_2 = arith.constant 0 : i32
    return %c0_i32, %c0_i32_0, %c0_i32_1 : i32, i32, i32
  }
  func.func @transform_4(%arg0: i32, %arg1: i32) -> (i32, i32) {
    %c0_i32 = arith.constant 0 : i32
    %c0_i32_0 = arith.constant 0 : i32
    %c0_i32_1 = arith.constant 0 : i32
    return %c0_i32, %c0_i32_0 : i32, i32
  }
  func.func @transform_5(%arg0: i32, %arg1: i32) -> (i32, i32, i32, i32) {
    %c0_i32 = arith.constant 0 : i32
    %c0_i32_0 = arith.constant 0 : i32
    %c0_i32_1 = arith.constant 0 : i32
    return %arg0, %arg1, %c0_i32, %c0_i32_0 : i32, i32, i32, i32
  }
}

module attributes {stable_mosaic.version = 11 : i64} {
  func.func @kernel(%arg0: i32, %arg1: i32, %arg2: memref<1x256x18xbf16, #tpu.memory_space<vmem>>, %arg3: memref<18x180xbf16, #tpu.memory_space<vmem>>, %arg4: memref<1x180xf32, #tpu.memory_space<vmem>>, %arg5: memref<1x16x32x180xbf16, #tpu.memory_space<vmem>>) attributes {dimension_semantics = [#tpu.dimension_semantics<parallel>, #tpu.dimension_semantics<parallel>], iteration_bounds = array<i64: 2, 1>, scalar_prefetch = 0 : i64, scratch_operands = 0 : i64, tpu.core_type = #tpu.core_type<tc>, window_params = [{transform_indices = @transform_0, window_bounds = array<i64: 1, 256, 18>}, {pipeline_mode = #tpu.pipeline_mode<synchronous>, transform_indices = @transform_1, window_bounds = array<i64: 18, 180>}, {pipeline_mode = #tpu.pipeline_mode<synchronous>, transform_indices = @transform_2, window_bounds = array<i64: 1, 180>}, {transform_indices = @transform_3, window_bounds = array<i64: 1, 16, 32, 180>}]} {
    %c0 = arith.constant 0 : index
    %c0_0 = arith.constant 0 : index
    %c0_1 = arith.constant 0 : index
    %0 = vector.load %arg2[%c0, %c0_0, %c0_1] : memref<1x256x18xbf16, #tpu.memory_space<vmem>>, vector<1x256x18xbf16>
    %1 = vector.shape_cast %0 : vector<1x256x18xbf16> to vector<256x18xbf16>
    %c0_2 = arith.constant 0 : index
    %c0_3 = arith.constant 0 : index
    %2 = vector.load %arg3[%c0_2, %c0_3] : memref<18x180xbf16, #tpu.memory_space<vmem>>, vector<18x180xbf16>
    %cst = arith.constant dense<0.000000e+00> : vector<256x180xf32>
    %3 = tpu.matmul %1, %2, %cst {dimension_numbers = #tpu.dot_dimension_numbers<[1], [0], [0], [1], [0, 0, 1, 1], [], []>} : vector<256x18xbf16>, vector<18x180xbf16>, vector<256x180xf32> -> vector<256x180xf32>
    %c0_4 = arith.constant 0 : index
    %c0_5 = arith.constant 0 : index
    %4 = vector.load %arg4[%c0_4, %c0_5] : memref<1x180xf32, #tpu.memory_space<vmem>>, vector<1x180xf32>
    %5 = vector.broadcast %4 : vector<1x180xf32> to vector<256x180xf32>
    %6 = arith.addf %3, %5 : vector<256x180xf32>
    %7 = arith.truncf %6 : vector<256x180xf32> to vector<256x180xbf16>
    %8 = vector.shape_cast %7 : vector<256x180xbf16> to vector<16x16x180xbf16>
    %c0_6 = arith.constant 0 : index
    %c0_7 = arith.constant 0 : index
    %c1 = arith.constant 1 : index
    %c0_8 = arith.constant 0 : index
    %9 = vector.load %arg5[%c0_6, %c0_7, %c1, %c0_8] : memref<1x16x32x180xbf16, #tpu.memory_space<vmem>>, vector<1x16x16x180xbf16>
    %10 = vector.shape_cast %9 : vector<1x16x16x180xbf16> to vector<16x16x180xbf16>
    %11 = vector.shape_cast %8 : vector<16x16x180xbf16> to vector<1x16x16x180xbf16>
    tpu.vector_store %arg5[%c0_6, %c0_7, %c1, %c0_8], %11 {strides = array<i32>} : memref<1x16x32x180xbf16, #tpu.memory_space<vmem>>, vector<1x16x16x180xbf16>,
    %cst_9 = arith.constant 0.000000e+00 : bf16
    %12 = vector.broadcast %cst_9 : bf16 to vector<16x1x180xbf16>
    %c0_10 = arith.constant 0 : index
    %c0_11 = arith.constant 0 : index
    %c0_12 = arith.constant 0 : index
    %c0_13 = arith.constant 0 : index
    %13 = vector.load %arg5[%c0_10, %c0_11, %c0_12, %c0_13] : memref<1x16x32x180xbf16, #tpu.memory_space<vmem>>, vector<1x16x1x180xbf16>
    %14 = vector.shape_cast %13 : vector<1x16x1x180xbf16> to vector<16x1x180xbf16>
    %15 = vector.shape_cast %12 : vector<16x1x180xbf16> to vector<1x16x1x180xbf16>
    tpu.vector_store %arg5[%c0_10, %c0_11, %c0_12, %c0_13], %15 {strides = array<i32>} : memref<1x16x32x180xbf16, #tpu.memory_space<vmem>>, vector<1x16x1x180xbf16>,
    %cst_14 = arith.constant 0.000000e+00 : bf16
    %16 = vector.broadcast %cst_14 : bf16 to vector<16x15x180xbf16>
    %c0_15 = arith.constant 0 : index
    %c0_16 = arith.constant 0 : index
    %c17 = arith.constant 17 : index
    %c0_17 = arith.constant 0 : index
    %17 = vector.load %arg5[%c0_15, %c0_16, %c17, %c0_17] : memref<1x16x32x180xbf16, #tpu.memory_space<vmem>>, vector<1x16x15x180xbf16>
    %18 = vector.shape_cast %17 : vector<1x16x15x180xbf16> to vector<16x15x180xbf16>
    %19 = vector.shape_cast %16 : vector<16x15x180xbf16> to vector<1x16x15x180xbf16>
    tpu.vector_store %arg5[%c0_15, %c0_16, %c17, %c0_17], %19 {strides = array<i32>} : memref<1x16x32x180xbf16, #tpu.memory_space<vmem>>, vector<1x16x15x180xbf16>,
    return
  }
  func.func @transform_0(%arg0: i32, %arg1: i32) -> (i32, i32, i32) {
    %c0_i32 = arith.constant 0 : i32
    %c0_i32_0 = arith.constant 0 : i32
    return %arg0, %arg1, %c0_i32 : i32, i32, i32
  }
  func.func @transform_1(%arg0: i32, %arg1: i32) -> (i32, i32) {
    %c0_i32 = arith.constant 0 : i32
    %c0_i32_0 = arith.constant 0 : i32
    %c0_i32_1 = arith.constant 0 : i32
    return %c0_i32, %c0_i32_0 : i32, i32
  }
  func.func @transform_2(%arg0: i32, %arg1: i32) -> (i32, i32) {
    %c0_i32 = arith.constant 0 : i32
    %c0_i32_0 = arith.constant 0 : i32
    %c0_i32_1 = arith.constant 0 : i32
    return %c0_i32, %c0_i32_0 : i32, i32
  }
  func.func @transform_3(%arg0: i32, %arg1: i32) -> (i32, i32, i32, i32) {
    %c0_i32 = arith.constant 0 : i32
    %c0_i32_0 = arith.constant 0 : i32
    %c0_i32_1 = arith.constant 0 : i32
    return %arg0, %arg1, %c0_i32, %c0_i32_0 : i32, i32, i32, i32
  }
}

</mosaic_0001>

<bundles_post_ra>
// kernel: elan_forward.2
= control target key start
LH: loop header
LB: loop body
LE: loop exit
PB: predicated region body
PF: predicated region fallthrough
CT: control target
= control target key end

     0   :  { %s1629_s12 = smov 0   ;;  %s1631_s13 = smov 0   ;;  %s2323_s0 = inlined_call_operand.vmem [shape: bf16[2,256,18], index: 0, kind: input, shape index: {}]   ;;  %s2324_s1 = inlined_call_operand.vmem [shape: bf16[18,180], index: 1, kind: input, shape index: {}]   ;;  %s2325_s2 = inlined_call_operand.vmem [shape: f32[1,180], index: 2, kind: input, shape index: {}]   ;;  %s2326_s3 = inlined_call_operand.vmem [shape: bf16[2,16,32,180], index: 3, kind: output, shape index: {}]  }
   0x1   :  { %s1633_s14 = smov 0  }
   0x2 LB: > { %s25_s15 = sadd.s32 1, %s1602_s13  ;;  %p1424_p0 = scmp.ge.s32.totalorder %s1606_s14, 1  ;;  %s1606_s14 = sphi %s1633_s14, %s13_s14   ;;  %s1602_s13 = sphi %s1631_s13, %s2340_s13   ;;  %s1598_s12 = sphi %s1629_s12, %s2339_s12  }
   0x3   : > { %p27_p1 = scmp.ge.s32.totalorder %s25_s15, 2  ;;  %p158_p2 = scmp.lt.s32.totalorder %s1606_s14, 3 }
   0x5   : > { %s2342_s15 = smov (%p27_p1, %s25_s15), 0  ;;  %p159_p3 = pnand %p1424_p0, %p158_p2 }
   0x6   : > { %v1563_v0 = vld [vmem:[%s2324_s1 + $0x4] ss:$8 sps:$4 sm:$0xff] (!%p159_p3)   ;;  %v1565_v1 = vld [vmem:[%s2324_s1] ss:$8 sps:$4 sm:$0xff] (!%p159_p3)   ;;  %v247_v2 = vld [vmem:[%s2324_s1 + $0x10] sm:$0x11] (!%p159_p3)  ;;  %v250_v25 = vlaneseq (!%p159_p3) }
   0x7   : > { %162 = sbr.rel (%p159_p3) target bundleno = 332 (0x14c), region = 32  ;;  %vm404_vm0 = vcmask (!%p159_p3), 1040384   ;;  %411 = vmatprep.subr.bf16.mxu0 (!%p159_p3), %v1563_v0  ;;  %1534 = vmatprep.subr.bf16.mxu1 (!%p159_p3), %v1563_v0  ;;  %v1448_v3 = vcombine.high (!%p159_p3), %v247_v2, %v247_v2  ;;  %v1447_v4 = vcombine.low (!%p159_p3), %v247_v2, %v247_v2  ;;  %p192_p4 = scmp.lt.s32.totalorder (!%p159_p3), %s1598_s12, 1  ;;  %v1608_v6 = vmov (!%p159_p3), 0   ;;  %v248_v28 = vld [vmem:[%s2325_s2] sm:$0x3] (!%p159_p3) }
   0x8   : > { %412 = vmatpush1.bf16.msra.mxu0 (!%p159_p3), %v1565_v1  ;;  %1536 = vmatpush1.bf16.msra.mxu1 (!%p159_p3), %v1565_v1  ;;  %vm355_vm1 = vcmask (!%p159_p3), 146432   ;;  %vm1087_vm2 = vcmask (!%p159_p3), 1043456   ;;  %vm1088_vm3 = vsmask.f32 (!%p159_p3), 7938  ;;  %vm1090_vm4 = vcmask (!%p159_p3), 424964  }
   0x9   : > { %1449 = vmatprep.subr.msk.bf16.mxu0 (!%p159_p3), %vm404_vm0, %v1448_v3  ;;  %1535 = vmatprep.subr.msk.bf16.mxu1 (!%p159_p3), %vm404_vm0, %v1448_v3  ;;  %v406_v5 = vsel (!%p159_p3), %vm404_vm0, %v1447_v4, 0  ;;  %vm1091_vm5 = vsmask.f32 (!%p159_p3), 7954  ;;  %vm1089_vm6 = vmand (!%p159_p3), %vm1087_vm2, %vm1088_vm3  ;;  %v251_v26 = vshrl.u32 (!%p159_p3), %v250_v25, 7  ;;  %vm764_vm10 = vsmask.f32 (!%p159_p3), 256 }
   0xa   : > { %443 = vmatprep.mubr.bf16.mxu0 (!%p159_p3), %v1608_v6  ;;  %523 = vmatprep.mubr.bf16.mxu1 (!%p159_p3), %v1608_v6  ;;  %vm1092_vm7 = vmand (!%p159_p3), %vm1090_vm4, %vm1091_vm5  ;;  %vm1103_vm11 = vcmask (!%p159_p3), 421892   ;;  %vm1104_vm12 = vsmask.f32 (!%p159_p3), 4352  ;;  %vm765_vm13 = vsmask.f32 (!%p159_p3), 4368 }
   0xb   : > { %vm1716_vm8 = vmor (!%p159_p3), %vm1092_vm7, %vm1089_vm6  ;;  %v252_v27 = vsub.s32 (!%p159_p3), 0, %v251_v26  ;;  %v256_v29 = vsub.s32 (!%p159_p3), 1, %v251_v26 }
   0xc   : > { %414 = vmatpush1.bf16.msra.mxu0 (!%p159_p3), %v406_v5  ;;  %1537 = vmatpush1.bf16.msra.mxu1 (!%p159_p3), %v406_v5  ;;  %vm1725_vm9 = vmor (!%p159_p3), %vm1090_vm4, %vm1087_vm2 }
   0xd   : > { %v1796_v30 = vrot.slane (!%p159_p3), %v248_v28, %v252_v27  ;;  %v1798_v31 = vrot.slane (!%p159_p3), %v248_v28, %v256_v29  ;;  %vm1810_vm14 = vmand (!%p159_p3), %vm404_vm0, %vm764_vm10 }
   0xe   : > { %s2344_s12 = smov (!%p192_p4, %s1598_s12), 1  ;;  %vm1814_vm15 = vmand %vm1103_vm11, %vm1104_vm12 }
   0xf   : > { %s1500_s22 = sshll.u32 %s2344_s12, 7  ;;  %s1501_s26 = sshll.u32 %s2344_s12, 9  ;;  %vm1822_vm0 = vmor %vm764_vm10, %vm765_vm13 }
  0x10   : > { %s1667_s25 = scalar_lea.vmem %s2323_s0, %s1500_s22  ;;  %s1723_s29 = scalar_lea.vmem %s2326_s3, %s1501_s26 }
  0x11   : > { %v1568_v7 = vld [vmem:[%s1667_s25] sm:$0xff]   ;;  %v1570_v9 = vld [vmem:[%s1667_s25 + $0x8] sm:$0xff]   ;;  %v1572_v11 = vld [vmem:[%s1667_s25 + $0x10] sm:$0xff]   ;;  %1266 = vst.msk [vmem:[%s1723_s29 + $0x18] sm:$0xff] %vm1725_vm9, %v1608_v6 }
  0x12   : > { %v1569_v8 = vld [vmem:[%s1667_s25 + $0x40] sm:$0xff]   ;;  %1450 = vmatmul.mubr.msk.bf16.vlgmr.msra.gmra.mrb[0].mxu0 %vm355_vm1, %v1568_v7  ;;  %v1571_v10 = vld [vmem:[%s1667_s25 + $0x48] sm:$0xff]   ;;  %v1573_v12 = vld [vmem:[%s1667_s25 + $0x50] sm:$0xff]   ;;  %1270 = vst.msk [vmem:[%s1723_s29 + $0x38] sm:$0xff] %vm1725_vm9, %v1608_v6 }
  0x13   : > { %1458 = vmatmul.mubr.msk.bf16.vlgmr.msra.gmra.mrb[0].mxu1 %vm355_vm1, %v1569_v8  ;;  %453 = vmatprep.mubr.bf16.mxu0 %v1608_v6  ;;  %v1574_v13 = vld [vmem:[%s1667_s25 + $0x18] sm:$0xff]   ;;  %v1576_v15 = vld [vmem:[%s1667_s25 + $0x20] sm:$0xff]   ;;  %v1578_v17 = vld [vmem:[%s1667_s25 + $0x28] sm:$0xff]   ;;  %1274 = vst.msk [vmem:[%s1723_s29 + $0x58] sm:$0xff] %vm1725_vm9, %v1608_v6 }
  0x14   : > { %533 = vmatprep.mubr.bf16.mxu1 %v1608_v6  ;;  %v1575_v14 = vld [vmem:[%s1667_s25 + $0x58] sm:$0xff]   ;;  %v1577_v16 = vld [vmem:[%s1667_s25 + $0x60] sm:$0xff]   ;;  %v1579_v18 = vld [vmem:[%s1667_s25 + $0x68] sm:$0xff]   ;;  %1278 = vst.msk [vmem:[%s1723_s29 + $0x78] sm:$0xff] %vm1725_vm9, %v1608_v6 }
  0x15   : > { %v1580_v19 = vld [vmem:[%s1667_s25 + $0x30] sm:$0xff]   ;;  %v1582_v21 = vld [vmem:[%s1667_s25 + $0x38] sm:$0xff]   ;;  %1282 = vst.msk [vmem:[%s1723_s29 + $0x98] sm:$0xff] %vm1725_vm9, %v1608_v6  ;;  %1286 = vst.msk [vmem:[%s1723_s29 + $0xb8] sm:$0xff] %vm1725_vm9, %v1608_v6 }
  0x16   : > { %v1581_v20 = vld [vmem:[%s1667_s25 + $0x70] sm:$0xff]   ;;  %v1583_v22 = vld [vmem:[%s1667_s25 + $0x78] sm:$0xff]   ;;  %1290 = vst.msk [vmem:[%s1723_s29 + $0xd8] sm:$0xff] %vm1725_vm9, %v1608_v6  ;;  %1294 = vst.msk [vmem:[%s1723_s29 + $0xf8] sm:$0xff] %vm1725_vm9, %v1608_v6 }
  0x17   : > { %1298 = vst.msk [vmem:[%s1723_s29 + $0x118] sm:$0xff] %vm1725_vm9, %v1608_v6  ;;  %1302 = vst.msk [vmem:[%s1723_s29 + $0x138] sm:$0xff] %vm1725_vm9, %v1608_v6  ;;  %v1094_v62 = vld [vmem:[%s1723_s29] sm:$0xff]  ;;  %v1163_v26 = vld [vmem:[%s1723_s29 + $0x110] sm:$0x11] }
  0x18   : > { %1306 = vst.msk [vmem:[%s1723_s29 + $0x158] sm:$0xff] %vm1725_vm9, %v1608_v6  ;;  %1310 = vst.msk [vmem:[%s1723_s29 + $0x178] sm:$0xff] %vm1725_vm9, %v1608_v6  ;;  %v1159_v8 = vld [vmem:[%s1723_s29 + $0x100] sm:$0xff] }
  0x19   : > { %1314 = vst.msk [vmem:[%s1723_s29 + $0x198] sm:$0xff] %vm1725_vm9, %v1608_v6  ;;  %1318 = vst.msk [vmem:[%s1723_s29 + $0x1b8] sm:$0xff] %vm1725_vm9, %v1608_v6 }
  0x1a   : > { %1451 = vmatmul.mubr.msk.bf16.gmra.mrb[4].mxu0 %vm355_vm1, %v1570_v9  ;;  %1322 = vst.msk [vmem:[%s1723_s29 + $0x1d8] sm:$0xff] %vm1725_vm9, %v1608_v6  ;;  %1326 = vst.msk [vmem:[%s1723_s29 + $0x1f8] sm:$0xff] %vm1725_vm9, %v1608_v6 }
  0x1b   : > { %1459 = vmatmul.mubr.msk.bf16.gmra.mrb[4].mxu1 %vm355_vm1, %v1571_v10  ;;  %463 = vmatprep.mubr.bf16.mxu0 %v1608_v6 }
  0x1c   : > { %543 = vmatprep.mubr.bf16.mxu1 %v1608_v6 }
  0x22   : > { %1452 = vmatmul.mubr.msk.bf16.gmra.mrb[8].mxu0 %vm355_vm1, %v1572_v11 }
  0x23   : > { %1460 = vmatmul.mubr.msk.bf16.gmra.mrb[8].mxu1 %vm355_vm1, %v1573_v12  ;;  %473 = vmatprep.mubr.bf16.mxu0 %v1608_v6 }
  0x24   : > { %553 = vmatprep.mubr.bf16.mxu1 %v1608_v6 }
  0x2a   : > { %1453 = vmatmul.mubr.msk.bf16.gmra.mrb[12].mxu0 %vm355_vm1, %v1574_v13 }
  0x2b   : > { %1461 = vmatmul.mubr.msk.bf16.gmra.mrb[12].mxu1 %vm355_vm1, %v1575_v14  ;;  %483 = vmatprep.mubr.bf16.mxu0 %v1608_v6 }
  0x2c   : > { %563 = vmatprep.mubr.bf16.mxu1 %v1608_v6 }
  0x32   : > { %1454 = vmatmul.mubr.msk.bf16.gmra.mrb[16].mxu0 %vm355_vm1, %v1576_v15 }
  0x33   : > { %1462 = vmatmul.mubr.msk.bf16.gmra.mrb[16].mxu1 %vm355_vm1, %v1577_v16  ;;  %493 = vmatprep.mubr.bf16.mxu0 %v1608_v6  ;;  %v1107_v16 = vld [vmem:[%s1723_s29 + $0x10] sm:$0x11] }
  0x34   : > { %573 = vmatprep.mubr.bf16.mxu1 %v1608_v6 }
  0x3a   : > { %1455 = vmatmul.mubr.msk.bf16.gmra.mrb[20].mxu0 %vm355_vm1, %v1578_v17 }
  0x3b   : > { %1463 = vmatmul.mubr.msk.bf16.gmra.mrb[20].mxu1 %vm355_vm1, %v1579_v18  ;;  %503 = vmatprep.mubr.bf16.mxu0 %v1608_v6 }
  0x3c   : > { %583 = vmatprep.mubr.bf16.mxu1 %v1608_v6 }
  0x42   : > { %1456 = vmatmul.mubr.msk.bf16.gmra.mrb[24].mxu0 %vm355_vm1, %v1580_v19 }
  0x43   : > { %1464 = vmatmul.mubr.msk.bf16.gmra.mrb[24].mxu1 %vm355_vm1, %v1581_v20  ;;  %513 = vmatprep.mubr.bf16.mxu0 %v1608_v6 }
  0x44   : > { %593 = vmatprep.mubr.bf16.mxu1 %v1608_v6 }
  0x4a   : > { %1457 = vmatmul.mubr.msk.bf16.gmra.mrb[28].mxu0 %vm355_vm1, %v1582_v21 }
  0x4b   : > { %1465 = vmatmul.mubr.msk.bf16.gmra.mrb[28].mxu1 %vm355_vm1, %v1583_v22  ;;  %vm1832_vm1 = vmor %vm1814_vm15, %vm1810_vm14 }
  0xe5   : > { %v445_v32 = vpop.f32.mrb[0].mxu0 }
  0xe6   : > { %v446_v33 = vadd.f32 %v445_v32, %v1796_v30  ;;  %v525_v34 = vpop.f32.mrb[0].mxu1  ;;  %v447_v35 = vpop.f32.mrb[1].mxu0 }
  0xe7   : > { %v526_v36 = vadd.f32 %v525_v34, %v1796_v30  ;;  %v448_v37 = vadd.f32 %v447_v35, %v1798_v31  ;;  %v527_v38 = vpop.f32.mrb[1].mxu1  ;;  %v449_v39 = vpop.f32.mrb[2].mxu0 }
  0xe8   : > { %v528_v40 = vadd.f32 %v527_v38, %v1798_v31  ;;  %v450_v41 = vadd.f32 %v449_v39, %v1796_v30  ;;  %v529_v42 = vpop.f32.mrb[2].mxu1  ;;  %v451_v43 = vpop.f32.mrb[3].mxu0 }
  0xe9   : > { %v1502_v44 = vpack.c.bf16 %v448_v37, %v446_v33  ;;  %v530_v45 = vadd.f32 %v529_v42, %v1796_v30  ;;  %v452_v46 = vadd.f32 %v451_v43, %v1798_v31  ;;  %v531_v47 = vpop.f32.mrb[3].mxu1 }
  0xea   : > { %v1518_v48 = vpack.c.bf16 %v528_v40, %v526_v36  ;;  %v532_v49 = vadd.f32 %v531_v47, %v1798_v31 }
  0xeb   : > { %v768_v50 = vshrl.u32 %v1502_v44, 16  ;;  %v1503_v51 = vpack.c.bf16 %v452_v46, %v450_v41  ;;  %v771_v53 = vshll.u32 %v1502_v44, 16 }
  0xec   : > { %v904_v54 = vshrl.u32 %v1518_v48, 16  ;;  %v1519_v55 = vpack.c.bf16 %v532_v49, %v530_v45  ;;  %v907_v58 = vshll.u32 %v1518_v48, 16 }
  0xed   : > { %v770_v57 = vrot.slane %v768_v50, 7  ;;  %v776_v59 = vshrl.u32 %v1503_v51, 16  ;;  %v779_v60 = vshll.u32 %v1503_v51, 16  ;;  %v455_v61 = vpop.f32.mrb[4].mxu0 }
  0xee   : > { %v906_v63 = vrot.slane %v904_v54, 7  ;;  %v912_v0 = vshrl.u32 %v1519_v55, 16  ;;  %v915_v1 = vshll.u32 %v1519_v55, 16  ;;  %v456_v2 = vadd.f32 %v455_v61, %v1796_v30  ;;  %v535_v3 = vpop.f32.mrb[4].mxu1  ;;  %v457_v4 = vpop.f32.mrb[5].mxu0 }
  0xef   : > { %v773_v6 = vor.u32 %v771_v53, %v770_v57  ;;  %v774_v7 = vrot.slane %v770_v57, 4  ;;  %v778_v9 = vrot.slane %v776_v59, 7  ;;  %v536_v10 = vadd.f32 %v535_v3, %v1796_v30  ;;  %v537_v11 = vpop.f32.mrb[5].mxu1  ;;  %v459_v12 = vpop.f32.mrb[6].mxu0  ;;  %v1110_v53 = vld [vmem:[%s1723_s29 + $0x20] sm:$0xff] }
  0xf0   : > { %v909_v14 = vor.u32 %v907_v58, %v906_v63  ;;  %v910_v15 = vrot.slane %v906_v63, 4  ;;  %v914_v17 = vrot.slane %v912_v0, 7  ;;  %v458_v18 = vadd.f32 %v457_v4, %v1798_v31  ;;  %v539_v19 = vpop.f32.mrb[6].mxu1  ;;  %v461_v20 = vpop.f32.mrb[7].mxu0 }
  0xf1   : > { %v1095_v21 = vsel %vm1716_vm8, %v773_v6, %v1094_v62  ;;  %v781_v22 = vor.u32 %v779_v60, %v778_v9  ;;  %v783_v25 = vrot.slane %v778_v9, 4  ;;  %v538_v27 = vadd.f32 %v537_v11, %v1798_v31  ;;  %v541_v28 = vpop.f32.mrb[7].mxu1  ;;  %v1166_v62 = vld [vmem:[%s1723_s29 + $0x120] sm:$0xff] }
  0xf2   : > { %1096 = vst [vmem:[%s1723_s29] sm:$0xff] %v1095_v21  ;;  %v1160_v29 = vsel %vm1716_vm8, %v909_v14, %v1159_v8  ;;  %v917_v32 = vor.u32 %v915_v1, %v914_v17  ;;  %v919_v33 = vrot.slane %v914_v17, 4  ;;  %v1504_v34 = vpack.c.bf16 %v458_v18, %v456_v2 }
  0xf3   : > { %1161 = vst [vmem:[%s1723_s29 + $0x100] sm:$0xff] %v1160_v29  ;;  %v782_v35 = vsel %vm1822_vm0, %v774_v7, %v781_v22  ;;  %v1108_v36 = vsel %vm1832_vm1, %v783_v25, %v1107_v16  ;;  %v1520_v37 = vpack.c.bf16 %v538_v27, %v536_v10  ;;  %v460_v38 = vadd.f32 %v459_v12, %v1796_v30  ;;  %v1114_v25 = vld [vmem:[%s1723_s29 + $0x30] sm:$0x11] }
  0xf4   : > { %1100 = vst.msk [vmem:[%s1723_s29 + $0x8] sm:$0xff] %vm1725_vm9, %v782_v35  ;;  %1109 = vst [vmem:[%s1723_s29 + $0x10] sm:$0x11] %v1108_v36  ;;  %v918_v39 = vsel %vm1822_vm0, %v910_v15, %v917_v32  ;;  %v1164_v40 = vsel %vm1832_vm1, %v919_v33, %v1163_v26  ;;  %v785_v41 = vshrl.u32 %v1504_v34, 16  ;;  %v788_v42 = vshll.u32 %v1504_v34, 16 }
  0xf5   : > { %1162 = vst.msk [vmem:[%s1723_s29 + $0x108] sm:$0xff] %vm1725_vm9, %v918_v39  ;;  %1165 = vst [vmem:[%s1723_s29 + $0x110] sm:$0x11] %v1164_v40  ;;  %v921_v43 = vshrl.u32 %v1520_v37, 16  ;;  %v540_v44 = vadd.f32 %v539_v19, %v1796_v30  ;;  %v462_v45 = vadd.f32 %v461_v20, %v1798_v31  ;;  %v465_v46 = vpop.f32.mrb[8].mxu0  ;;  %v924_v48 = vshll.u32 %v1520_v37, 16 }
  0xf6   : > { %v787_v47 = vrot.slane %v785_v41, 7  ;;  %v542_v49 = vadd.f32 %v541_v28, %v1798_v31  ;;  %v466_v50 = vadd.f32 %v465_v46, %v1796_v30  ;;  %v545_v51 = vpop.f32.mrb[8].mxu1  ;;  %v467_v52 = vpop.f32.mrb[9].mxu0  ;;  %v1170_v34 = vld [vmem:[%s1723_s29 + $0x130] sm:$0x11] }
  0xf7   : > { %v1868_v54 = vrot.slane %v921_v43, 7  ;;  %v1505_v55 = vpack.c.bf16 %v462_v45, %v460_v38  ;;  %v546_v56 = vadd.f32 %v545_v51, %v1796_v30  ;;  %v468_v57 = vadd.f32 %v467_v52, %v1798_v31  ;;  %v547_v58 = vpop.f32.mrb[9].mxu1  ;;  %v469_v59 = vpop.f32.mrb[10].mxu0  ;;  %v1117_v51 = vld [vmem:[%s1723_s29 + $0x40] sm:$0xff] }
  0xf8   : > { %v790_v60 = vor.u32 %v788_v42, %v787_v47  ;;  %v791_v61 = vrot.slane %v787_v47, 4  ;;  %v1521_v63 = vpack.c.bf16 %v542_v49, %v540_v44  ;;  %v548_v0 = vadd.f32 %v547_v58, %v1798_v31  ;;  %v549_v1 = vpop.f32.mrb[10].mxu1  ;;  %v471_v2 = vpop.f32.mrb[11].mxu0  ;;  %v1173_v58 = vld [vmem:[%s1723_s29 + $0x140] sm:$0xff] }
  0xf9   : > { %v1215_v3 = vld [vmem:[%s1723_s29] sm:$0x11]  ;;  %v926_v4 = vor.u32 %v924_v48, %v1868_v54  ;;  %v927_v6 = vrot.slane %v1868_v54, 4  ;;  %v793_v7 = vshrl.u32 %v1505_v55, 16  ;;  %v796_v8 = vshll.u32 %v1505_v55, 16  ;;  %v551_v9 = vpop.f32.mrb[11].mxu1 }
  0xfa   : > { %v1216_v10 = vsel %vm1832_vm1, 0, %v1215_v3  ;;  %v1239_v11 = vld [vmem:[%s1723_s29 + $0x100] sm:$0x11]  ;;  %v1111_v12 = vsel %vm1716_vm8, %v790_v60, %v1110_v53  ;;  %v929_v14 = vshrl.u32 %v1521_v63, 16  ;;  %v932_v15 = vshll.u32 %v1521_v63, 16 }
  0xfb   : > { %1217 = vst [vmem:[%s1723_s29] sm:$0x11] %v1216_v10  ;;  %v1240_v16 = vsel %vm1832_vm1, 0, %v1239_v11  ;;  %v1263_v17 = vld [vmem:[%s1723_s29 + $0x10] sm:$0xff]  ;;  %1112 = vst [vmem:[%s1723_s29 + $0x20] sm:$0xff] %v1111_v12  ;;  %v1167_v18 = vsel %vm1716_vm8, %v926_v4, %v1166_v62  ;;  %v795_v19 = vrot.slane %v793_v7, 7  ;;  %v1506_v20 = vpack.c.bf16 %v468_v57, %v466_v50 }
  0xfc   : > { %1241 = vst [vmem:[%s1723_s29 + $0x100] sm:$0x11] %v1240_v16  ;;  %v1264_v21 = vsel %vm1716_vm8, 0, %v1263_v17  ;;  %v1295_v22 = vld [vmem:[%s1723_s29 + $0x110] sm:$0xff]  ;;  %1168 = vst [vmem:[%s1723_s29 + $0x120] sm:$0xff] %v1167_v18  ;;  %v931_v26 = vrot.slane %v929_v14, 7  ;;  %v1522_v27 = vpack.c.bf16 %v548_v0, %v546_v56  ;;  %v470_v28 = vadd.f32 %v469_v59, %v1796_v30 }
  0xfd   : > { %1265 = vst [vmem:[%s1723_s29 + $0x10] sm:$0xff] %v1264_v21  ;;  %v1296_v29 = vsel %vm1716_vm8, 0, %v1295_v22  ;;  %v798_v32 = vor.u32 %v796_v8, %v795_v19  ;;  %v800_v33 = vrot.slane %v795_v19, 4  ;;  %v802_v35 = vshrl.u32 %v1506_v20, 16  ;;  %v475_v36 = vpop.f32.mrb[12].mxu0 }
  0xfe   : > { %1297 = vst [vmem:[%s1723_s29 + $0x110] sm:$0xff] %v1296_v29  ;;  %v934_v37 = vor.u32 %v932_v15, %v931_v26  ;;  %v936_v38 = vrot.slane %v931_v26, 4  ;;  %v805_v39 = vshll.u32 %v1506_v20, 16  ;;  %v938_v40 = vshrl.u32 %v1522_v27, 16  ;;  %v555_v41 = vpop.f32.mrb[12].mxu1  ;;  %v477_v42 = vpop.f32.mrb[13].mxu0 }
  0xff   : > { %v799_v43 = vsel %vm1822_vm0, %v791_v61, %v798_v32  ;;  %v1115_v44 = vsel %vm1832_vm1, %v800_v33, %v1114_v25  ;;  %v1905_v45 = vrot.slane %v802_v35, 7  ;;  %v941_v46 = vshll.u32 %v1522_v27, 16  ;;  %v557_v47 = vpop.f32.mrb[13].mxu1  ;;  %v479_v48 = vpop.f32.mrb[14].mxu0  ;;  %v1121_v19 = vld [vmem:[%s1723_s29 + $0x50] sm:$0x11] }
 0x100   : > { %1113 = vst.msk [vmem:[%s1723_s29 + $0x28] sm:$0xff] %vm1725_vm9, %v799_v43  ;;  %1116 = vst [vmem:[%s1723_s29 + $0x30] sm:$0x11] %v1115_v44  ;;  %v935_v49 = vsel %vm1822_vm0, %v927_v6, %v934_v37  ;;  %v1171_v50 = vsel %vm1832_vm1, %v936_v38, %v1170_v34  ;;  %v1916_v52 = vrot.slane %v938_v40, 7  ;;  %v550_v53 = vadd.f32 %v549_v1, %v1796_v30  ;;  %v559_v54 = vpop.f32.mrb[14].mxu1  ;;  %v481_v55 = vpop.f32.mrb[15].mxu0 }
 0x101   : > { %1169 = vst.msk [vmem:[%s1723_s29 + $0x128] sm:$0xff] %vm1725_vm9, %v935_v49  ;;  %1172 = vst [vmem:[%s1723_s29 + $0x130] sm:$0x11] %v1171_v50  ;;  %v807_v56 = vor.u32 %v805_v39, %v1905_v45  ;;  %v808_v57 = vrot.slane %v1905_v45, 4  ;;  %v472_v59 = vadd.f32 %v471_v2, %v1798_v31  ;;  %v552_v60 = vadd.f32 %v551_v9, %v1798_v31  ;;  %v561_v61 = vpop.f32.mrb[15].mxu1 }
 0x102   : > { %v1218_v62 = vld [vmem:[%s1723_s29 + $0x20] sm:$0x11]  ;;  %v943_v63 = vor.u32 %v941_v46, %v1916_v52  ;;  %v944_v0 = vrot.slane %v1916_v52, 4  ;;  %v476_v1 = vadd.f32 %v475_v36, %v1796_v30  ;;  %v556_v3 = vadd.f32 %v555_v41, %v1796_v30 }
 0x103   : > { %v1219_v4 = vsel %vm1832_vm1, 0, %v1218_v62  ;;  %v1242_v6 = vld [vmem:[%s1723_s29 + $0x120] sm:$0x11]  ;;  %v1118_v2 = vsel %vm1716_vm8, %v807_v56, %v1117_v51  ;;  %v1507_v7 = vpack.c.bf16 %v472_v59, %v470_v28  ;;  %v1523_v8 = vpack.c.bf16 %v552_v60, %v550_v53 }
 0x104   : > { %1220 = vst [vmem:[%s1723_s29 + $0x20] sm:$0x11] %v1219_v4  ;;  %v1243_v9 = vsel %vm1832_vm1, 0, %v1242_v6  ;;  %1119 = vst [vmem:[%s1723_s29 + $0x40] sm:$0xff] %v1118_v2  ;;  %v1174_v10 = vsel %vm1716_vm8, %v943_v63, %v1173_v58  ;;  %v478_v11 = vadd.f32 %v477_v42, %v1798_v31  ;;  %v558_v12 = vadd.f32 %v557_v47, %v1798_v31  ;;  %v1124_v60 = vld [vmem:[%s1723_s29 + $0x60] sm:$0xff] }
 0x105   : > { %1244 = vst [vmem:[%s1723_s29 + $0x120] sm:$0x11] %v1243_v9  ;;  %1175 = vst [vmem:[%s1723_s29 + $0x140] sm:$0xff] %v1174_v10  ;;  %v810_v14 = vshrl.u32 %v1507_v7, 16  ;;  %v813_v15 = vshll.u32 %v1507_v7, 16  ;;  %v946_v16 = vshrl.u32 %v1523_v8, 16  ;;  %v480_v22 = vadd.f32 %v479_v48, %v1796_v30 }
 0x106   : > { %v949_v17 = vshll.u32 %v1523_v8, 16  ;;  %v485_v18 = vpop.f32.mrb[16].mxu0  ;;  %v1508_v20 = vpack.c.bf16 %v478_v11, %v476_v1  ;;  %v1524_v21 = vpack.c.bf16 %v558_v12, %v556_v3  ;;  %v560_v25 = vadd.f32 %v559_v54, %v1796_v30  ;;  %v565_v26 = vpop.f32.mrb[16].mxu1  ;;  %v1177_v48 = vld [vmem:[%s1723_s29 + $0x150] sm:$0x11] }
 0x107   : > { %v487_v27 = vpop.f32.mrb[17].mxu0  ;;  %v1267_v28 = vld [vmem:[%s1723_s29 + $0x30] sm:$0xff]  ;;  %v812_v29 = vrot.slane %v810_v14, 7  ;;  %v948_v32 = vrot.slane %v946_v16, 7  ;;  %v482_v33 = vadd.f32 %v481_v55, %v1798_v31  ;;  %v562_v34 = vadd.f32 %v561_v61, %v1798_v31  ;;  %v567_v35 = vpop.f32.mrb[17].mxu1 }
 0x108   : > { %v489_v36 = vpop.f32.mrb[18].mxu0  ;;  %v1268_v37 = vsel %vm1716_vm8, 0, %v1267_v28  ;;  %v1299_v38 = vld [vmem:[%s1723_s29 + $0x130] sm:$0xff]  ;;  %v819_v39 = vshrl.u32 %v1508_v20, 16  ;;  %v822_v40 = vshll.u32 %v1508_v20, 16  ;;  %v955_v41 = vshrl.u32 %v1524_v21, 16 }
 0x109   : > { %v569_v42 = vpop.f32.mrb[18].mxu1  ;;  %1269 = vst [vmem:[%s1723_s29 + $0x30] sm:$0xff] %v1268_v37  ;;  %v1300_v43 = vsel %vm1716_vm8, 0, %v1299_v38  ;;  %v815_v44 = vor.u32 %v813_v15, %v812_v29  ;;  %v817_v46 = vrot.slane %v812_v29, 4  ;;  %v951_v47 = vor.u32 %v949_v17, %v948_v32  ;;  %v491_v49 = vpop.f32.mrb[19].mxu0 }
 0x10a   : > { %v571_v50 = vpop.f32.mrb[19].mxu1  ;;  %1301 = vst [vmem:[%s1723_s29 + $0x130] sm:$0xff] %v1300_v43  ;;  %v953_v51 = vrot.slane %v948_v32, 4  ;;  %v821_v52 = vrot.slane %v819_v39, 7  ;;  %v1962_v53 = vrot.slane %v955_v41, 7  ;;  %v958_v54 = vshll.u32 %v1524_v21, 16 }
 0x10b   : > { %v1221_v55 = vld [vmem:[%s1723_s29 + $0x40] sm:$0x11]  ;;  %v816_v56 = vsel %vm1822_vm0, %v808_v57, %v815_v44  ;;  %v1122_v58 = vsel %vm1832_vm1, %v817_v46, %v1121_v19  ;;  %v952_v59 = vsel %vm1822_vm0, %v944_v0, %v951_v47  ;;  %v1509_v61 = vpack.c.bf16 %v482_v33, %v480_v22  ;;  %v1128_v22 = vld [vmem:[%s1723_s29 + $0x70] sm:$0x11] }
 0x10c   : > { %v1222_v62 = vsel %vm1832_vm1, 0, %v1221_v55  ;;  %v1245_v63 = vld [vmem:[%s1723_s29 + $0x140] sm:$0x11]  ;;  %1120 = vst.msk [vmem:[%s1723_s29 + $0x48] sm:$0xff] %vm1725_vm9, %v816_v56  ;;  %1123 = vst [vmem:[%s1723_s29 + $0x50] sm:$0x11] %v1122_v58  ;;  %v1178_v45 = vsel %vm1832_vm1, %v953_v51, %v1177_v48  ;;  %v824_v57 = vor.u32 %v822_v40, %v821_v52  ;;  %v960_v4 = vor.u32 %v958_v54, %v1962_v53 }
 0x10d   : > { %1176 = vst.msk [vmem:[%s1723_s29 + $0x148] sm:$0xff] %vm1725_vm9, %v952_v59  ;;  %v825_v1 = vrot.slane %v821_v52, 4  ;;  %v1180_v0 = vld [vmem:[%s1723_s29 + $0x160] sm:$0xff]  ;;  %1223 = vst [vmem:[%s1723_s29 + $0x40] sm:$0x11] %v1222_v62  ;;  %v1246_v3 = vsel %vm1832_vm1, 0, %v1245_v63  ;;  %v1525_v10 = vpack.c.bf16 %v562_v34, %v560_v25  ;;  %v486_v11 = vadd.f32 %v485_v18, %v1796_v30 }
 0x10e   : > { %1179 = vst [vmem:[%s1723_s29 + $0x150] sm:$0x11] %v1178_v45  ;;  %v961_v6 = vrot.slane %v1962_v53, 4  ;;  %v827_v2 = vshrl.u32 %v1509_v61, 16  ;;  %v1993_v7 = vpop.f32.mrb[20].mxu0  ;;  %v1125_v8 = vsel %vm1716_vm8, %v824_v57, %v1124_v60  ;;  %v830_v9 = vshll.u32 %v1509_v61, 16 }
 0x10f   : > { %1247 = vst [vmem:[%s1723_s29 + $0x140] sm:$0x11] %v1246_v3  ;;  %v1999_v12 = vpop.f32.mrb[20].mxu1  ;;  %v2001_v14 = vpop.f32.mrb[21].mxu0  ;;  %1126 = vst [vmem:[%s1723_s29 + $0x60] sm:$0xff] %v1125_v8  ;;  %v1181_v15 = vsel %vm1716_vm8, %v960_v4, %v1180_v0  ;;  %v566_v17 = vadd.f32 %v565_v26, %v1796_v30  ;;  %v488_v19 = vadd.f32 %v487_v27, %v1798_v31  ;;  %v963_v18 = vshrl.u32 %v1525_v10, 16 }
 0x110   : > { %v829_v16 = vrot.slane %v827_v2, 7  ;;  %v2008_v20 = vpop.f32.mrb[21].mxu1  ;;  %v2010_v21 = vpop.f32.mrb[22].mxu0  ;;  %1182 = vst [vmem:[%s1723_s29 + $0x160] sm:$0xff] %v1181_v15  ;;  %v966_v25 = vshll.u32 %v1525_v10, 16  ;;  %v568_v28 = vadd.f32 %v567_v35, %v1798_v31  ;;  %v490_v29 = vadd.f32 %v489_v36, %v1796_v30  ;;  %v1131_v55 = vld [vmem:[%s1723_s29 + $0x80] sm:$0xff] }
 0x111   : > { %v2016_v32 = vpop.f32.mrb[22].mxu1  ;;  %v2018_v33 = vpop.f32.mrb[23].mxu0  ;;  %v1510_v34 = vpack.c.bf16 %v488_v19, %v486_v11  ;;  %v570_v37 = vadd.f32 %v569_v42, %v1796_v30  ;;  %v965_v39 = vrot.slane %v963_v18, 7  ;;  %v492_v35 = vadd.f32 %v491_v49, %v1798_v31  ;;  %v1184_v46 = vld [vmem:[%s1723_s29 + $0x170] sm:$0x11]  ;;  %v1187_v45 = vld [vmem:[%s1723_s29 + $0x180] sm:$0xff] }
 0x112   : > { %v832_v26 = vor.u32 %v830_v9, %v829_v16  ;;  %v834_v27 = vrot.slane %v829_v16, 4  ;;  %v2021_v38 = vpop.f32.mrb[23].mxu1  ;;  %v1526_v40 = vpack.c.bf16 %v568_v28, %v566_v17  ;;  %v572_v36 = vadd.f32 %v571_v50, %v1798_v31 }
 0x113   : > { %v1271_v41 = vld [vmem:[%s1723_s29 + $0x50] sm:$0xff]  ;;  %v836_v47 = vshrl.u32 %v1510_v34, 16  ;;  %v839_v42 = vshll.u32 %v1510_v34, 16  ;;  %v968_v49 = vor.u32 %v966_v25, %v965_v39  ;;  %v970_v50 = vrot.slane %v965_v39, 4 }
 0x114   : > { %v833_v43 = vsel %vm1822_vm0, %v825_v1, %v832_v26  ;;  %v1129_v44 = vsel %vm1832_vm1, %v834_v27, %v1128_v22  ;;  %v1272_v48 = vsel %vm1716_vm8, 0, %v1271_v41  ;;  %v972_v52 = vshrl.u32 %v1526_v40, 16  ;;  %v1135_v34 = vld [vmem:[%s1723_s29 + $0x90] sm:$0x11] }
 0x115   : > { %v1303_v51 = vld [vmem:[%s1723_s29 + $0x150] sm:$0xff]  ;;  %1127 = vst.msk [vmem:[%s1723_s29 + $0x68] sm:$0xff] %vm1725_vm9, %v833_v43  ;;  %1130 = vst [vmem:[%s1723_s29 + $0x70] sm:$0x11] %v1129_v44  ;;  %v838_v54 = vrot.slane %v836_v47, 7  ;;  %v975_v56 = vshll.u32 %v1526_v40, 16  ;;  %v1511_v58 = vpack.c.bf16 %v492_v35, %v490_v29  ;;  %v969_v61 = vsel %vm1822_vm0, %v961_v6, %v968_v49 }
 0x116   : > { %1273 = vst [vmem:[%s1723_s29 + $0x50] sm:$0xff] %v1272_v48  ;;  %v1304_v53 = vsel %vm1716_vm8, 0, %v1303_v51  ;;  %v2042_v59 = vpop.f32.mrb[24].mxu0  ;;  %v1224_v60 = vld [vmem:[%s1723_s29 + $0x60] sm:$0x11]  ;;  %v1185_v62 = vsel %vm1832_vm1, %v970_v50, %v1184_v46  ;;  %v974_v63 = vrot.slane %v972_v52, 7  ;;  %v1527_v57 = vpack.c.bf16 %v572_v36, %v570_v37 }
 0x117   : > { %1305 = vst [vmem:[%s1723_s29 + $0x150] sm:$0xff] %v1304_v53  ;;  %v2051_v1 = vpop.f32.mrb[24].mxu1  ;;  %v2053_v0 = vpop.f32.mrb[25].mxu0  ;;  %v1225_v3 = vsel %vm1832_vm1, 0, %v1224_v60  ;;  %v1248_v4 = vld [vmem:[%s1723_s29 + $0x160] sm:$0x11]  ;;  %v841_v6 = vor.u32 %v839_v42, %v838_v54  ;;  %v496_v37 = vadd.f32 %v1993_v7, %v1796_v30  ;;  %v576_v39 = vadd.f32 %v1999_v12, %v1796_v30 }
 0x118   : > { %1183 = vst.msk [vmem:[%s1723_s29 + $0x168] sm:$0xff] %vm1725_vm9, %v969_v61  ;;  %1186 = vst [vmem:[%s1723_s29 + $0x170] sm:$0x11] %v1185_v62  ;;  %v842_v2 = vrot.slane %v838_v54, 4  ;;  %v844_v8 = vshrl.u32 %v1511_v58, 16  ;;  %v2062_v9 = vpop.f32.mrb[25].mxu1  ;;  %v977_v11 = vor.u32 %v975_v56, %v974_v63  ;;  %v498_v40 = vadd.f32 %v2001_v14, %v1798_v31 }
 0x119   : > { %1226 = vst [vmem:[%s1723_s29 + $0x60] sm:$0x11] %v1225_v3  ;;  %v1249_v10 = vsel %vm1832_vm1, 0, %v1248_v4  ;;  %v978_v15 = vrot.slane %v974_v63, 4  ;;  %v847_v16 = vshll.u32 %v1511_v58, 16  ;;  %v2067_v17 = vpop.f32.mrb[26].mxu0  ;;  %v1132_v22 = vsel %vm1716_vm8, %v841_v6, %v1131_v55 }
 0x11a   : > { %v2069_v19 = vpop.f32.mrb[26].mxu1  ;;  %1250 = vst [vmem:[%s1723_s29 + $0x160] sm:$0x11] %v1249_v10  ;;  %v846_v18 = vrot.slane %v844_v8, 7  ;;  %v980_v25 = vshrl.u32 %v1527_v57, 16  ;;  %v983_v28 = vshll.u32 %v1527_v57, 16  ;;  %v1188_v27 = vsel %vm1716_vm8, %v977_v11, %v1187_v45 }
 0x11b   : > { %v2074_v29 = vpop.f32.mrb[27].mxu0  ;;  %v2076_v26 = vpop.f32.mrb[27].mxu1  ;;  %1133 = vst [vmem:[%s1723_s29 + $0x80] sm:$0xff] %v1132_v22  ;;  %1189 = vst [vmem:[%s1723_s29 + $0x180] sm:$0xff] %v1188_v27  ;;  %v578_v44 = vadd.f32 %v2008_v20, %v1798_v31  ;;  %v1191_v46 = vld [vmem:[%s1723_s29 + $0x190] sm:$0x11]  ;;  %v1512_v47 = vpack.c.bf16 %v498_v40, %v496_v37  ;;  %v500_v12 = vadd.f32 %v2010_v21, %v1796_v30 }
 0x11c   : > { %v1275_v35 = vld [vmem:[%s1723_s29 + $0x70] sm:$0xff]  ;;  %v849_v36 = vor.u32 %v847_v16, %v846_v18  ;;  %v851_v41 = vrot.slane %v846_v18, 4  ;;  %v982_v43 = vrot.slane %v980_v25, 7  ;;  %v580_v14 = vadd.f32 %v2016_v32, %v1796_v30  ;;  %v1138_v6 = vld [vmem:[%s1723_s29 + $0xa0] sm:$0xff] }
 0x11d   : > { %v1276_v7 = vsel %vm1716_vm8, 0, %v1275_v35  ;;  %v2104_v49 = vpop.f32.mrb[28].mxu0  ;;  %v853_v21 = vshrl.u32 %v1512_v47, 16  ;;  %v1528_v32 = vpack.c.bf16 %v578_v44, %v576_v39  ;;  %v502_v52 = vadd.f32 %v2018_v33, %v1798_v31 }
 0x11e   : > { %1277 = vst [vmem:[%s1723_s29 + $0x70] sm:$0xff] %v1276_v7  ;;  %v850_v42 = vsel %vm1822_vm0, %v842_v2, %v849_v36  ;;  %v1136_v48 = vsel %vm1832_vm1, %v851_v41, %v1135_v34  ;;  %v985_v51 = vor.u32 %v983_v28, %v982_v43  ;;  %v987_v20 = vrot.slane %v982_v43, 4  ;;  %v2113_v53 = vpop.f32.mrb[28].mxu1  ;;  %v2115_v54 = vpop.f32.mrb[29].mxu0  ;;  %v1194_v34 = vld [vmem:[%s1723_s29 + $0x1a0] sm:$0xff] }
 0x11f   : > { %v1307_v50 = vld [vmem:[%s1723_s29 + $0x170] sm:$0xff]  ;;  %1134 = vst.msk [vmem:[%s1723_s29 + $0x88] sm:$0xff] %vm1725_vm9, %v850_v42  ;;  %1137 = vst [vmem:[%s1723_s29 + $0x90] sm:$0x11] %v1136_v48  ;;  %v582_v60 = vadd.f32 %v2021_v38, %v1798_v31  ;;  %v2125_v61 = vpop.f32.mrb[29].mxu1  ;;  %v2127_v33 = vpop.f32.mrb[30].mxu0  ;;  %v1513_v57 = vpack.c.bf16 %v502_v52, %v500_v12  ;;  %v506_v10 = vadd.f32 %v2042_v59, %v1796_v30 }
 0x120   : > { %v1308_v55 = vsel %vm1716_vm8, 0, %v1307_v50  ;;  %v986_v56 = vsel %vm1822_vm0, %v978_v15, %v985_v51  ;;  %v1192_v58 = vsel %vm1832_vm1, %v987_v20, %v1191_v46  ;;  %v855_v62 = vrot.slane %v853_v21, 7  ;;  %v2134_v3 = vpop.f32.mrb[30].mxu1  ;;  %v2136_v4 = vpop.f32.mrb[31].mxu0  ;;  %v1198_v42 = vld [vmem:[%s1723_s29 + $0x1b0] sm:$0x11] }
 0x121   : > { %1309 = vst [vmem:[%s1723_s29 + $0x170] sm:$0xff] %v1308_v55  ;;  %1190 = vst.msk [vmem:[%s1723_s29 + $0x188] sm:$0xff] %vm1725_vm9, %v986_v56  ;;  %v856_v63 = vshll.u32 %v1512_v47, 16  ;;  %v989_v45 = vshrl.u32 %v1528_v32, 16  ;;  %v992_v2 = vshll.u32 %v1528_v32, 16  ;;  %v1529_v8 = vpack.c.bf16 %v582_v60, %v580_v14  ;;  %v2144_v15 = vpop.f32.mrb[31].mxu1 }
 0x122   : > { %1193 = vst [vmem:[%s1723_s29 + $0x190] sm:$0x11] %v1192_v58  ;;  %v1227_v38 = vld [vmem:[%s1723_s29 + $0x80] sm:$0x11]  ;;  %v508_v11 = vadd.f32 %v2053_v0, %v1798_v31  ;;  %v586_v28 = vadd.f32 %v2051_v1, %v1796_v30  ;;  %v859_v27 = vrot.slane %v855_v62, 4  ;;  %v861_v0 = vshrl.u32 %v1513_v57, 16 }
 0x123   : > { %v1228_v16 = vsel %vm1832_vm1, 0, %v1227_v38  ;;  %v1251_v22 = vld [vmem:[%s1723_s29 + $0x180] sm:$0x11]  ;;  %v858_v18 = vor.u32 %v856_v63, %v855_v62  ;;  %v991_v25 = vrot.slane %v989_v45, 7  ;;  %v997_v37 = vshrl.u32 %v1529_v8, 16 }
 0x124   : > { %1229 = vst [vmem:[%s1723_s29 + $0x80] sm:$0x11] %v1228_v16  ;;  %v1252_v59 = vsel %vm1832_vm1, 0, %v1251_v22  ;;  %v864_v35 = vshll.u32 %v1513_v57, 16  ;;  %v1000_v1 = vshll.u32 %v1529_v8, 16  ;;  %v863_v41 = vrot.slane %v861_v0, 7 }
 0x125   : > { %1253 = vst [vmem:[%s1723_s29 + $0x180] sm:$0x11] %v1252_v59  ;;  %v1139_v39 = vsel %vm1716_vm8, %v858_v18, %v1138_v6  ;;  %v994_v40 = vor.u32 %v992_v2, %v991_v25  ;;  %v999_v43 = vrot.slane %v997_v37, 7  ;;  %v1514_v44 = vpack.c.bf16 %v508_v11, %v506_v10  ;;  %v1142_v14 = vld [vmem:[%s1723_s29 + $0xb0] sm:$0x11]  ;;  %v1145_v38 = vld [vmem:[%s1723_s29 + $0xc0] sm:$0xff] }
 0x126   : > { %v1279_v36 = vld [vmem:[%s1723_s29 + $0x90] sm:$0xff]  ;;  %1140 = vst [vmem:[%s1723_s29 + $0xa0] sm:$0xff] %v1139_v39  ;;  %v588_v7 = vadd.f32 %v2062_v9, %v1798_v31  ;;  %v995_v47 = vrot.slane %v991_v25, 4  ;;  %v510_v48 = vadd.f32 %v2067_v17, %v1796_v30  ;;  %v866_v9 = vor.u32 %v864_v35, %v863_v41 }
 0x127   : > { %v1280_v46 = vsel %vm1716_vm8, 0, %v1279_v36  ;;  %v1195_v12 = vsel %vm1716_vm8, %v994_v40, %v1194_v34  ;;  %v868_v20 = vrot.slane %v863_v41, 4  ;;  %v1002_v50 = vor.u32 %v1000_v1, %v999_v43 }
 0x128   : > { %1281 = vst [vmem:[%s1723_s29 + $0x90] sm:$0xff] %v1280_v46  ;;  %1196 = vst [vmem:[%s1723_s29 + $0x1a0] sm:$0xff] %v1195_v12  ;;  %v1004_v21 = vrot.slane %v999_v43, 4  ;;  %v870_v52 = vshrl.u32 %v1514_v44, 16  ;;  %v1530_v55 = vpack.c.bf16 %v588_v7, %v586_v28  ;;  %v590_v17 = vadd.f32 %v2069_v19, %v1796_v30  ;;  %v1201_v28 = vld [vmem:[%s1723_s29 + $0x1c0] sm:$0xff] }
 0x129   : > { %v1311_v51 = vld [vmem:[%s1723_s29 + $0x190] sm:$0xff]  ;;  %v867_v56 = vsel %vm1822_vm0, %v859_v27, %v866_v9  ;;  %v1143_v58 = vsel %vm1832_vm1, %v868_v20, %v1142_v14  ;;  %v1003_v60 = vsel %vm1822_vm0, %v995_v47, %v1002_v50  ;;  %v873_v63 = vshll.u32 %v1514_v44, 16 }
 0x12a   : > { %v1312_v32 = vsel %vm1716_vm8, 0, %v1311_v51  ;;  %v1199_v62 = vsel %vm1832_vm1, %v1004_v21, %v1198_v42  ;;  %1141 = vst.msk [vmem:[%s1723_s29 + $0xa8] sm:$0xff] %vm1725_vm9, %v867_v56  ;;  %1144 = vst [vmem:[%s1723_s29 + $0xb0] sm:$0x11] %v1143_v58  ;;  %v872_v19 = vrot.slane %v870_v52, 7  ;;  %v1006_v45 = vshrl.u32 %v1530_v55, 16 }
 0x12b   : > { %1313 = vst [vmem:[%s1723_s29 + $0x190] sm:$0xff] %v1312_v32  ;;  %1197 = vst.msk [vmem:[%s1723_s29 + $0x1a8] sm:$0xff] %vm1725_vm9, %v1003_v60  ;;  %v512_v57 = vadd.f32 %v2074_v29, %v1798_v31  ;;  %v1009_v6 = vshll.u32 %v1530_v55, 16  ;;  %v592_v2 = vadd.f32 %v2076_v26, %v1798_v31  ;;  %v516_v8 = vadd.f32 %v2104_v49, %v1796_v30  ;;  %v1149_v7 = vld [vmem:[%s1723_s29 + $0xd0] sm:$0x11] }
 0x12c   : > { %1200 = vst [vmem:[%s1723_s29 + $0x1b0] sm:$0x11] %v1199_v62  ;;  %v518_v10 = vadd.f32 %v2115_v54, %v1798_v31  ;;  %v875_v16 = vor.u32 %v873_v63, %v872_v19  ;;  %v1008_v22 = vrot.slane %v1006_v45, 7  ;;  %v596_v29 = vadd.f32 %v2113_v53, %v1796_v30  ;;  %v1205_v20 = vld [vmem:[%s1723_s29 + $0x1d0] sm:$0x11] }
 0x12d   : > { %v1230_v11 = vld [vmem:[%s1723_s29 + $0xa0] sm:$0x11]  ;;  %v1515_v18 = vpack.c.bf16 %v512_v57, %v510_v48  ;;  %v1531_v26 = vpack.c.bf16 %v592_v2, %v590_v17  ;;  %v598_v49 = vadd.f32 %v2125_v61, %v1798_v31  ;;  %v876_v27 = vrot.slane %v872_v19, 4 }
 0x12e   : > { %v1231_v25 = vsel %vm1832_vm1, 0, %v1230_v11  ;;  %v1516_v59 = vpack.c.bf16 %v518_v10, %v516_v8  ;;  %v1146_v34 = vsel %vm1716_vm8, %v875_v16, %v1145_v38  ;;  %v1011_v53 = vor.u32 %v1009_v6, %v1008_v22  ;;  %v1152_v17 = vld [vmem:[%s1723_s29 + $0xe0] sm:$0xff] }
 0x12f   : > { %1232 = vst [vmem:[%s1723_s29 + $0xa0] sm:$0x11] %v1231_v25  ;;  %v1254_v54 = vld [vmem:[%s1723_s29 + $0x1a0] sm:$0x11]  ;;  %v878_v0 = vshrl.u32 %v1515_v18, 16  ;;  %1147 = vst [vmem:[%s1723_s29 + $0xc0] sm:$0xff] %v1146_v34  ;;  %v1532_v12 = vpack.c.bf16 %v598_v49, %v596_v29  ;;  %v520_v14 = vadd.f32 %v2127_v33, %v1796_v30  ;;  %v522_v56 = vadd.f32 %v2136_v4, %v1798_v31 }
 0x130   : > { %v1255_v37 = vsel %vm1832_vm1, 0, %v1254_v54  ;;  %v1012_v39 = vrot.slane %v1008_v22, 4  ;;  %v881_v40 = vshll.u32 %v1515_v18, 16  ;;  %v1014_v35 = vshrl.u32 %v1531_v26, 16  ;;  %v1156_v18 = vld [vmem:[%s1723_s29 + $0xf0] sm:$0x11] }
 0x131   : > { %1256 = vst [vmem:[%s1723_s29 + $0x1a0] sm:$0x11] %v1255_v37  ;;  %v1202_v61 = vsel %vm1716_vm8, %v1011_v53, %v1201_v28  ;;  %v880_v1 = vrot.slane %v878_v0, 7  ;;  %v1017_v36 = vshll.u32 %v1531_v26, 16  ;;  %v887_v41 = vshrl.u32 %v1516_v59, 16  ;;  %v1283_v43 = vld [vmem:[%s1723_s29 + $0xb0] sm:$0xff] }
 0x132   : > { %1203 = vst [vmem:[%s1723_s29 + $0x1c0] sm:$0xff] %v1202_v61  ;;  %v1016_v46 = vrot.slane %v1014_v35, 7  ;;  %v890_v47 = vshll.u32 %v1516_v59, 16  ;;  %v1284_v42 = vsel %vm1716_vm8, 0, %v1283_v43  ;;  %v1023_v33 = vshrl.u32 %v1532_v12, 16 }
 0x133   : > { %v1315_v44 = vld [vmem:[%s1723_s29 + $0x1b0] sm:$0xff]  ;;  %v883_v51 = vor.u32 %v881_v40, %v880_v1  ;;  %v885_v9 = vrot.slane %v880_v1, 4  ;;  %1285 = vst [vmem:[%s1723_s29 + $0xb0] sm:$0xff] %v1284_v42  ;;  %v889_v32 = vrot.slane %v887_v41, 7  ;;  %v600_v19 = vadd.f32 %v2134_v3, %v1796_v30  ;;  %v1208_v3 = vld [vmem:[%s1723_s29 + $0x1e0] sm:$0xff] }
 0x134   : > { %v1316_v48 = vsel %vm1716_vm8, 0, %v1315_v44  ;;  %v1019_v50 = vor.u32 %v1017_v36, %v1016_v46  ;;  %v1021_v21 = vrot.slane %v1016_v46, 4  ;;  %v1025_v4 = vrot.slane %v1023_v33, 7 }
 0x135   : > { %1317 = vst [vmem:[%s1723_s29 + $0x1b0] sm:$0xff] %v1316_v48  ;;  %v884_v52 = vsel %vm1822_vm0, %v876_v27, %v883_v51  ;;  %v1150_v55 = vsel %vm1832_vm1, %v885_v9, %v1149_v7  ;;  %v892_v62 = vor.u32 %v890_v47, %v889_v32  ;;  %v1026_v45 = vshll.u32 %v1532_v12, 16 }
 0x136   : > { %1148 = vst.msk [vmem:[%s1723_s29 + $0xc8] sm:$0xff] %vm1725_vm9, %v884_v52  ;;  %1151 = vst [vmem:[%s1723_s29 + $0xd0] sm:$0x11] %v1150_v55  ;;  %v1020_v58 = vsel %vm1822_vm0, %v1012_v39, %v1019_v50  ;;  %v1206_v60 = vsel %vm1832_vm1, %v1021_v21, %v1205_v20  ;;  %v1233_v63 = vld [vmem:[%s1723_s29 + $0xc0] sm:$0x11]  ;;  %v1517_v57 = vpack.c.bf16 %v522_v56, %v520_v14  ;;  %v893_v28 = vrot.slane %v889_v32, 4 }
 0x137   : > { %1204 = vst.msk [vmem:[%s1723_s29 + $0x1c8] sm:$0xff] %vm1725_vm9, %v1020_v58  ;;  %1207 = vst [vmem:[%s1723_s29 + $0x1d0] sm:$0x11] %v1206_v60  ;;  %v602_v38 = vadd.f32 %v2144_v15, %v1798_v31  ;;  %v1234_v6 = vsel %vm1832_vm1, 0, %v1233_v63  ;;  %v1153_v30 = vsel %vm1716_vm8, %v892_v62, %v1152_v17  ;;  %v1028_v8 = vor.u32 %v1026_v45, %v1025_v4  ;;  %v1212_v39 = vld [vmem:[%s1723_s29 + $0x1f0] sm:$0x11] }
 0x138   : > { %1235 = vst [vmem:[%s1723_s29 + $0xc0] sm:$0x11] %v1234_v6  ;;  %1154 = vst [vmem:[%s1723_s29 + $0xe0] sm:$0xff] %v1153_v30  ;;  %v895_v10 = vshrl.u32 %v1517_v57, 16  ;;  %v898_v22 = vshll.u32 %v1517_v57, 16  ;;  %v1029_v35 = vrot.slane %v1025_v4, 4 }
 0x139   : > { %v1257_v2 = vld [vmem:[%s1723_s29 + $0x1c0] sm:$0x11]  ;;  %v1533_v16 = vpack.c.bf16 %v602_v38, %v600_v19  ;;  %v1209_v31 = vsel %vm1716_vm8, %v1028_v8, %v1208_v3 }
 0x13a   : > { %v1258_v11 = vsel %vm1832_vm1, 0, %v1257_v2  ;;  %v897_v15 = vrot.slane %v895_v10, 7  ;;  %1210 = vst [vmem:[%s1723_s29 + $0x1e0] sm:$0xff] %v1209_v31 }
 0x13b   : > { %1259 = vst [vmem:[%s1723_s29 + $0x1c0] sm:$0x11] %v1258_v11  ;;  %v1031_v29 = vshrl.u32 %v1533_v16, 16  ;;  %v1034_v34 = vshll.u32 %v1533_v16, 16 }
 0x13c   : > { %v900_v26 = vor.u32 %v898_v22, %v897_v15  ;;  %v902_v59 = vrot.slane %v897_v15, 4 }
 0x13d   : > { %v1287_v25 = vld [vmem:[%s1723_s29 + $0xd0] sm:$0xff]  ;;  %v1033_v27 = vrot.slane %v1031_v29, 7 }
 0x13e   : > { %v1288_v49 = vsel %vm1716_vm8, 0, %v1287_v25  ;;  %v1319_v54 = vld [vmem:[%s1723_s29 + $0x1d0] sm:$0xff]  ;;  %v901_v0 = vsel %vm1822_vm0, %v893_v28, %v900_v26  ;;  %v1157_v37 = vsel %vm1832_vm1, %v902_v59, %v1156_v18 }
 0x13f   : > { %1289 = vst [vmem:[%s1723_s29 + $0xd0] sm:$0xff] %v1288_v49  ;;  %v1320_v53 = vsel %vm1716_vm8, 0, %v1319_v54  ;;  %v1236_v40 = vld [vmem:[%s1723_s29 + $0xe0] sm:$0x11]  ;;  %1155 = vst.msk [vmem:[%s1723_s29 + $0xe8] sm:$0xff] %vm1725_vm9, %v901_v0  ;;  %v1036_v61 = vor.u32 %v1034_v34, %v1033_v27  ;;  %v1038_v1 = vrot.slane %v1033_v27, 4 }
 0x140   : > { %1321 = vst [vmem:[%s1723_s29 + $0x1d0] sm:$0xff] %v1320_v53  ;;  %1158 = vst [vmem:[%s1723_s29 + $0xf0] sm:$0x11] %v1157_v37  ;;  %v1237_v36 = vsel %vm1832_vm1, 0, %v1236_v40 }
 0x141   : > { %1238 = vst [vmem:[%s1723_s29 + $0xe0] sm:$0x11] %v1237_v36  ;;  %v1037_v41 = vsel %vm1822_vm0, %v1029_v35, %v1036_v61  ;;  %v1213_v43 = vsel %vm1832_vm1, %v1038_v1, %v1212_v39  ;;  %v1260_v44 = vld [vmem:[%s1723_s29 + $0x1e0] sm:$0x11] }
 0x142   : > { %1211 = vst.msk [vmem:[%s1723_s29 + $0x1e8] sm:$0xff] %vm1725_vm9, %v1037_v41  ;;  %1214 = vst [vmem:[%s1723_s29 + $0x1f0] sm:$0x11] %v1213_v43  ;;  %v1261_v7 = vsel %vm1832_vm1, 0, %v1260_v44 }
 0x143   : > { %1262 = vst [vmem:[%s1723_s29 + $0x1e0] sm:$0x11] %v1261_v7 }
 0x147   : > { %v1291_v46 = vld [vmem:[%s1723_s29 + $0xf0] sm:$0xff] }
 0x148   : > { %v1292_v47 = vsel %vm1716_vm8, 0, %v1291_v46 }
 0x149   : > { %1293 = vst [vmem:[%s1723_s29 + $0xf0] sm:$0xff] %v1292_v47  ;;  %v1323_v12 = vld [vmem:[%s1723_s29 + $0x1f0] sm:$0xff] }
 0x14a   : > { %v1324_v5 = vsel %vm1716_vm8, 0, %v1323_v12 }
 0x14b   : > { %1325 = vst [vmem:[%s1723_s29 + $0x1f0] sm:$0xff] %v1324_v5 }
 0x14c PF: > { %s13_s14 = sadd.s32 1, %s1606_s14   ;;  %s2339_s12 = smov %s1602_s13 }
 0x14d   : > { %p10_p5 = scmp.ge.s32.totalorder %s13_s14, 4   ;;  %s2340_s13 = smov %s2342_s15 }
 0x14f   :  { %12 = sbr.rel (!%p10_p5) target bundleno = 2 (0x2), region = 62 }

// kernel: elan_forward.3
= control target key start
LH: loop header
LB: loop body
LE: loop exit
PB: predicated region body
PF: predicated region fallthrough
CT: control target
= control target key end

     0   :  { %s3886_s18 = smov 0   ;;  %s3888_s19 = smov 0   ;;  %s5165_s0 = inlined_call_operand.vmem [shape: bf16[2,16,32,180], index: 0, kind: input, shape index: {}, may-alias: {0,1,2}]   ;;  %s5166_s1 = inlined_call_operand.vmem [shape: bf16[2,16,32,180], index: 1, kind: input, shape index: {}, may-alias: {0,1,2}]   ;;  %s5167_s2 = inlined_call_operand.vmem [shape: bf16[2,16,32,180], index: 2, kind: input, shape index: {}, may-alias: {0,1,2}]   ;;  %s5168_s3 = inlined_call_operand.vmem [shape: bf16[3,180,6], index: 3, kind: input, shape index: {}]   ;;  %s5169_s4 = inlined_call_operand.vmem [shape: f32[1,2], index: 4, kind: input, shape index: {}]   ;;  %s5170_s5 = inlined_call_operand.vmem [shape: f32[2,16,16,2], index: 5, kind: output, shape index: {}]  }
   0x1   :  { %s3890_s20 = smov 0  }
   0x2 LB: > { %s27_s21 = sadd.s32 1, %s3847_s19  ;;  %p3229_p0 = scmp.ge.s32.totalorder %s3851_s20, 1  ;;  %s3851_s20 = sphi %s3890_s20, %s15_s20   ;;  %s3847_s19 = sphi %s3888_s19, %s5172_s19   ;;  %s3843_s18 = sphi %s3886_s18, %s5171_s18  }
   0x3   : > { %p29_p1 = scmp.ge.s32.totalorder %s27_s21, 2  ;;  %p273_p2 = scmp.lt.s32.totalorder %s3851_s20, 3 }
   0x5   : > { %s5174_s21 = smov (%p29_p1, %s27_s21), 0  ;;  %p274_p3 = pnand %p3229_p0, %p273_p2 }
   0x6   : > { %v3724_v0 = vld [vmem:[%s5168_s3 + $0x5c] sm:$0xff] (!%p274_p3)   ;;  %v3853_v1 = vmov (!%p274_p3), 0   ;;  %v3726_v3 = vld [vmem:[%s5168_s3 + $0x64] sm:$0xff] (!%p274_p3)   ;;  %v3728_v5 = vld [vmem:[%s5168_s3 + $0x6c] sm:$0xff] (!%p274_p3)   ;;  %p338_p4 = scmp.lt.s32.totalorder (!%p274_p3), %s3843_s18, 1  ;;  %vm419_vm0 = vcmask (!%p274_p3), 424960  }
   0x7   : > { %277 = sbr.rel (%p274_p3) target bundleno = 772 (0x304), region = 40  ;;  %1257 = vmatprep.subr.bf16.mxu1 (!%p274_p3), %v3853_v1  ;;  %1698 = vmatprep.subr.bf16.mxu0 (!%p274_p3), %v3853_v1  ;;  %v3914_v2 = vld [vmem:[%s5168_s3] sm:$0xff] (!%p274_p3)   ;;  %905 = vst [vmem:[#allocation2] sm:$0xff] (!%p274_p3), %v3853_v1  ;;  %v3925_v4 = vld [vmem:[%s5168_s3 + $0x8] sm:$0xff] (!%p274_p3)   ;;  %v3936_v6 = vld [vmem:[%s5168_s3 + $0x10] sm:$0xff] (!%p274_p3)   ;;  %vm1253_vm1 = vcmask (!%p274_p3), 1041408  }
   0x8   : > { %1258 = vmatpush1.bf16.msra.mxu1 (!%p274_p3), %v3724_v0  ;;  %1699 = vmatpush1.bf16.msra.mxu0 (!%p274_p3), %v3914_v2  ;;  %v3730_v7 = vld [vmem:[%s5168_s3 + $0x74] sm:$0xff] (!%p274_p3)   ;;  %v3732_v9 = vld [vmem:[%s5168_s3 + $0x7c] sm:$0xff] (!%p274_p3)   ;;  %v3734_v11 = vld [vmem:[%s5168_s3 + $0x84] sm:$0xff] (!%p274_p3)   ;;  %vm2597_vm2 = vcmask (!%p274_p3), 1046528   ;;  %vm2806_vm3 = vcmask (!%p274_p3), 1045504   ;;  %s3855_s25 = smov (!%p274_p3), 124  }
   0x9   : > { %1259 = vmatprep.subr.bf16.mxu1 (!%p274_p3), %v3853_v1  ;;  %1700 = vmatprep.subr.bf16.mxu0 (!%p274_p3), %v3853_v1  ;;  %v3948_v8 = vld [vmem:[%s5168_s3 + $0x18] sm:$0xff] (!%p274_p3)   ;;  %v3962_v10 = vld [vmem:[%s5168_s3 + $0x20] sm:$0xff] (!%p274_p3)   ;;  %v3976_v12 = vld [vmem:[%s5168_s3 + $0x28] sm:$0xff] (!%p274_p3)   ;;  %vm3054_vm4 = vcmask (!%p274_p3), 15360  }
   0xa   : > { %v3736_v13 = vld [vmem:[%s5168_s3 + $0x8c] sm:$0xff] (!%p274_p3)   ;;  %v3738_v17 = vld [vmem:[%s5168_s3 + $0x94] sm:$0xff] (!%p274_p3)   ;;  %v3740_v26 = vld [vmem:[%s5168_s3 + $0x9c] sm:$0xff] (!%p274_p3)  }
   0xb   : > { %v3998_v15 = vld [vmem:[%s5168_s3 + $0x30] sm:$0xff] (!%p274_p3)   ;;  %v4011_v20 = vld [vmem:[%s5168_s3 + $0x38] sm:$0xff] (!%p274_p3)   ;;  %v4031_v28 = vld [vmem:[%s5168_s3 + $0x40] sm:$0xff] (!%p274_p3)  }
   0xc   : > { %1260 = vmatpush1.bf16.msra.mxu1 (!%p274_p3), %v3726_v3  ;;  %1701 = vmatpush1.bf16.msra.mxu0 (!%p274_p3), %v3925_v4  ;;  %v3742_v37 = vld [vmem:[%s5168_s3 + $0xa4] sm:$0xff] (!%p274_p3)   ;;  %v3744_v48 = vld [vmem:[%s5168_s3 + $0xac] sm:$0xff] (!%p274_p3)   ;;  %v3746_v53 = vld [vmem:[%s5168_s3 + $0xb4] ss:$0 sps:$4 sm:$0x33] (!%p274_p3)  }
   0xd   : > { %1261 = vmatprep.subr.bf16.mxu1 (!%p274_p3), %v3853_v1  ;;  %1702 = vmatprep.subr.bf16.mxu0 (!%p274_p3), %v3853_v1  ;;  %v4065_v43 = vld [vmem:[%s5168_s3 + $0x48] sm:$0xff] (!%p274_p3)   ;;  %v4085_v50 = vld [vmem:[%s5168_s3 + $0x50] sm:$0xff] (!%p274_p3)   ;;  %v3747_v57 = vld [vmem:[%s5168_s3 + $0x58] ss:$0 sps:$4 sm:$0x33] (!%p274_p3)   ;;  %v1255_v3 = vsel (!%p274_p3), %vm1253_vm1, %v3746_v53, 0 }
   0xe   : > { %s5176_s18 = smov (!%p338_p4, %s3843_s18), 1 }
   0xf   : > { %s3969_s23 = sshll.u32 %s5176_s18, 9  ;;  %s3495_s26 = sshll.u32 %s5176_s18, 8 }
  0x10   : > { %1262 = vmatpush1.bf16.msra.mxu1 %v3728_v5  ;;  %1703 = vmatpush1.bf16.msra.mxu0 %v3936_v6  ;;  %s3983_s28 = scalar_lea.vmem %s5165_s0, %s3969_s23  ;;  %s360_s8 = scalar_lea.vmem %s5166_s1, %s3969_s23 }
  0x11   : > { %1263 = vmatprep.subr.bf16.mxu1 %v3853_v1  ;;  %1704 = vmatprep.subr.bf16.mxu0 %v3853_v1  ;;  %v423_v14 = vld [vmem:[%s3983_s28] sm:$0xff]  ;;  %v424_v16 = vld [vmem:[%s3983_s28 + $0x8] sm:$0xff]  ;;  %v425_v22 = vld [vmem:[%s3983_s28 + $0x10] sm:$0xff]  ;;  %s4897_s7 = scalar_lea.vmem %s5170_s5, %s3495_s26 }
  0x12   : > { %v3748_v18 = vld [vmem:[%s3983_s28 + $0x4] ss:$8 sps:$4 sm:$0xff]   ;;  %v4006_v19 = vcombine.low %v423_v14, %v424_v16  ;;  %v426_v23 = vld [vmem:[%s3983_s28 + $0x18] sm:$0xff]  ;;  %v429_v33 = vld [vmem:[%s3983_s28 + $0x30] sm:$0xff] }
  0x13   : > { %v3750_v21 = vld [vmem:[%s360_s8 + $0x4] ss:$8 sps:$4 sm:$0xff]   ;;  %809 = vst.msk [vmem:[#allocation2 + $0x28] sm:$0xff] %vm419_vm0, %v3748_v18  ;;  %v3752_v24 = vld [vmem:[%s3983_s28 + $0x14] ss:$8 sps:$4 sm:$0xff]   ;;  %v4020_v25 = vcombine.low %v425_v22, %v426_v23 }
  0x14   : > { %1264 = vmatpush1.bf16.msra.mxu1 %v3730_v7  ;;  %1705 = vmatpush1.bf16.msra.mxu0 %v3948_v8  ;;  %420 = vst.msk [vmem:[#allocation2 + $0x8] sm:$0xff] %vm419_vm0, %v3750_v21  ;;  %v3754_v27 = vld [vmem:[%s360_s8 + $0x14] ss:$8 sps:$4 sm:$0xff]   ;;  %811 = vst.msk [vmem:[#allocation2 + $0x38] sm:$0xff] %vm419_vm0, %v3752_v24  ;;  %v427_v29 = vld [vmem:[%s3983_s28 + $0x20] sm:$0xff]  ;;  %v4120_v7 = vsel %vm1253_vm1, %v3747_v57, 0 }
  0x15   : > { %1265 = vmatprep.subr.bf16.mxu1 %v3853_v1  ;;  %1706 = vmatprep.subr.bf16.mxu0 %v3853_v1  ;;  %906 = vst.msk [vmem:[#allocation2 + $0x8] sm:$0xff] %vm419_vm0, %v3853_v1  ;;  %v428_v30 = vld [vmem:[%s3983_s28 + $0x28] sm:$0xff]  ;;  %422 = vst.msk [vmem:[#allocation2 + $0x18] sm:$0xff] %vm419_vm0, %v3754_v27  ;;  %v430_v34 = vld [vmem:[%s3983_s28 + $0x38] sm:$0xff] }
  0x16   : > { %v3756_v31 = vld [vmem:[%s3983_s28 + $0x24] ss:$8 sps:$4 sm:$0xff]   ;;  %v4038_v32 = vcombine.low %v427_v29, %v428_v30  ;;  %908 = vst.msk [vmem:[#allocation2 + $0x18] sm:$0xff] %vm419_vm0, %v3853_v1  ;;  %v3758_v35 = vld [vmem:[%s3983_s28 + $0x34] ss:$8 sps:$4 sm:$0xff]   ;;  %v4047_v36 = vcombine.low %v429_v33, %v430_v34 }
  0x17   : > { %813 = vst.msk [vmem:[#allocation2 + $0x48] sm:$0xff] %vm419_vm0, %v3756_v31  ;;  %v431_v38 = vld [vmem:[%s3983_s28 + $0x40] sm:$0xff]  ;;  %v432_v39 = vld [vmem:[%s3983_s28 + $0x48] sm:$0xff]  ;;  %815 = vst.msk [vmem:[#allocation2 + $0x58] sm:$0xff] %vm419_vm0, %v3758_v35 }
  0x18   : > { %1266 = vmatpush1.bf16.msra.mxu1 %v3732_v9  ;;  %1707 = vmatpush1.bf16.msra.mxu0 %v3962_v10  ;;  %v3761_v41 = vld [vmem:[%s3983_s28 + $0x44] ss:$8 sps:$4 sm:$0xff]   ;;  %v4060_v42 = vcombine.low %v431_v38, %v432_v39  ;;  %v433_v44 = vld [vmem:[%s3983_s28 + $0x50] sm:$0xff]  ;;  %v434_v46 = vld [vmem:[%s3983_s28 + $0x58] sm:$0xff] }
  0x19   : > { %1267 = vmatprep.subr.bf16.mxu1 %v3853_v1  ;;  %1708 = vmatprep.subr.bf16.mxu0 %v3853_v1  ;;  %817 = vst.msk [vmem:[#allocation2 + $0x68] sm:$0xff] %vm419_vm0, %v3761_v41  ;;  %v3764_v47 = vld [vmem:[%s3983_s28 + $0x54] ss:$8 sps:$4 sm:$0xff]   ;;  %v4080_v49 = vcombine.low %v433_v44, %v434_v46  ;;  %v435_v51 = vld [vmem:[%s3983_s28 + $0x60] sm:$0xff]  ;;  %v436_v52 = vld [vmem:[%s3983_s28 + $0x68] sm:$0xff] }
  0x1a   : > { %v4056_v40 = vld [vmem:[#allocation2 + $0x28] sm:$0xff]  ;;  %819 = vst.msk [vmem:[#allocation2 + $0x78] sm:$0xff] %vm419_vm0, %v3764_v47  ;;  %v4094_v55 = vcombine.low %v435_v51, %v436_v52  ;;  %v437_v56 = vld [vmem:[%s3983_s28 + $0x70] sm:$0xff]  ;;  %v438_v58 = vld [vmem:[%s3983_s28 + $0x78] sm:$0xff] }
  0x1b   : > { %3345 = vmatprep.mubr.msk.bf16.mxu1 %vm419_vm0, %v4056_v40  ;;  %v3767_v54 = vld [vmem:[%s3983_s28 + $0x64] ss:$8 sps:$4 sm:$0xff]   ;;  %v3769_v59 = vld [vmem:[%s3983_s28 + $0x74] ss:$8 sps:$4 sm:$0xff]   ;;  %v4106_v60 = vcombine.low %v437_v56, %v438_v58 }
  0x1c   : > { %1268 = vmatpush1.bf16.msra.mxu1 %v3734_v11  ;;  %1709 = vmatpush1.bf16.msra.mxu0 %v3976_v12  ;;  %v914_v45 = vld [vmem:[#allocation2 + $0x8] sm:$0xff]  ;;  %821 = vst.msk [vmem:[#allocation2 + $0x88] sm:$0xff] %vm419_vm0, %v3767_v54  ;;  %823 = vst.msk [vmem:[#allocation2 + $0x98] sm:$0xff] %vm419_vm0, %v3769_v59  ;;  %v439_v61 = vld [vmem:[%s3983_s28 + $0x80] sm:$0xff] }
  0x1d   : > { %1269 = vmatprep.subr.bf16.mxu1 %v3853_v1  ;;  %1710 = vmatprep.subr.bf16.mxu0 %v3853_v1  ;;  %v440_v62 = vld [vmem:[%s3983_s28 + $0x88] sm:$0xff]  ;;  %v441_v5 = vld [vmem:[%s3983_s28 + $0x90] sm:$0xff]  ;;  %v442_v9 = vld [vmem:[%s3983_s28 + $0x98] sm:$0xff] }
  0x1e   : > { %3389 = vmatprep.mubr.msk.bf16.mxu0 %vm419_vm0, %v914_v45  ;;  %v3772_v63 = vld [vmem:[%s3983_s28 + $0x84] ss:$8 sps:$4 sm:$0xff]   ;;  %v4112_v0 = vcombine.low %v439_v61, %v440_v62  ;;  %v3775_v11 = vld [vmem:[%s3983_s28 + $0x94] ss:$8 sps:$4 sm:$0xff]  }
  0x1f   : > { %825 = vst.msk [vmem:[#allocation2 + $0xa8] sm:$0xff] %vm419_vm0, %v3772_v63  ;;  %827 = vst.msk [vmem:[#allocation2 + $0xb8] sm:$0xff] %vm419_vm0, %v3775_v11  ;;  %v443_v14 = vld [vmem:[%s3983_s28 + $0xa0] sm:$0xff]  ;;  %v444_v16 = vld [vmem:[%s3983_s28 + $0xa8] sm:$0xff] }
  0x20   : > { %1270 = vmatpush1.bf16.msra.mxu1 %v3736_v13  ;;  %1711 = vmatpush1.bf16.msra.mxu0 %v3998_v15  ;;  %v4125_v13 = vcombine.low %v441_v5, %v442_v9  ;;  %v3751_v18 = vld [vmem:[%s5168_s3 + $0xb8] sm:$0xff]   ;;  %v4136_v21 = vcombine.low %v443_v14, %v444_v16  ;;  %v445_v22 = vld [vmem:[%s3983_s28 + $0xb0] sm:$0xff]  ;;  %v447_v30 = vld [vmem:[%s3983_s28 + $0xc0] sm:$0xff] }
  0x21   : > { %1271 = vmatprep.subr.bf16.mxu1 %v3853_v1  ;;  %1712 = vmatprep.subr.bf16.mxu0 %v3853_v1  ;;  %v446_v23 = vld [vmem:[%s3983_s28 + $0xb8] sm:$0xff]  ;;  %v448_v31 = vld [vmem:[%s3983_s28 + $0xc8] sm:$0xff]  ;;  %v3755_v34 = vld [vmem:[%s5168_s3 + $0xc0] sm:$0xff]  }
  0x22   : > { %v4141_v24 = vld [vmem:[#allocation2 + $0x38] sm:$0xff]  ;;  %v4145_v27 = vcombine.low %v445_v22, %v446_v23  ;;  %v3783_v33 = vld [vmem:[%s3983_s28 + $0xc4] ss:$8 sps:$4 sm:$0xff]   ;;  %v4159_v35 = vcombine.low %v447_v30, %v448_v31  ;;  %v457_v58 = vld [vmem:[%s3983_s28 + $0x110] sm:$0xff] }
  0x23   : > { %v916_v29 = vld [vmem:[#allocation2 + $0x18] sm:$0xff]  ;;  %833 = vst.msk [vmem:[#allocation2 + $0xe8] sm:$0xff] %vm419_vm0, %v3783_v33  ;;  %v3760_v41 = vld [vmem:[%s5168_s3 + $0xc8] sm:$0xff]   ;;  %v451_v44 = vld [vmem:[%s3983_s28 + $0xe0] sm:$0xff] }
  0x24   : > { %1272 = vmatpush1.bf16.msra.mxu1 %v3738_v17  ;;  %1713 = vmatpush1.bf16.msra.mxu0 %v4011_v20  ;;  %v3778_v17 = vld [vmem:[%s3983_s28 + $0xa4] ss:$8 sps:$4 sm:$0xff]   ;;  %v3786_v38 = vld [vmem:[%s3983_s28 + $0xd4] ss:$8 sps:$4 sm:$0xff]  }
  0x25   : > { %1273 = vmatprep.subr.bf16.mxu1 %v3853_v1  ;;  %1714 = vmatprep.subr.bf16.mxu0 %v3853_v1  ;;  %829 = vst.msk [vmem:[#allocation2 + $0xc8] sm:$0xff] %vm419_vm0, %v3778_v17  ;;  %835 = vst.msk [vmem:[#allocation2 + $0xf8] sm:$0xff] %vm419_vm0, %v3786_v38  ;;  %v452_v45 = vld [vmem:[%s3983_s28 + $0xe8] sm:$0xff]  ;;  %v454_v51 = vld [vmem:[%s3983_s28 + $0xf8] sm:$0xff] }
  0x26   : > { %v4177_v46 = vld [vmem:[#allocation2 + $0x48] sm:$0xff]  ;;  %v3791_v52 = vld [vmem:[%s3983_s28 + $0xf4] ss:$8 sps:$4 sm:$0xff]   ;;  %v455_v54 = vld [vmem:[%s3983_s28 + $0x100] sm:$0xff] }
  0x27   : > { %v3789_v47 = vld [vmem:[%s3983_s28 + $0xe4] ss:$8 sps:$4 sm:$0xff]   ;;  %839 = vst.msk [vmem:[#allocation2 + $0x118] sm:$0xff] %vm419_vm0, %v3791_v52  ;;  %v3763_v59 = vld [vmem:[%s5168_s3 + $0xd0] sm:$0xff]   ;;  %v458_v62 = vld [vmem:[%s3983_s28 + $0x118] sm:$0xff] }
  0x28   : > { %1274 = vmatpush1.bf16.msra.mxu1 %v3740_v26  ;;  %1715 = vmatpush1.bf16.msra.mxu0 %v4031_v28  ;;  %v3780_v26 = vld [vmem:[%s3983_s28 + $0xb4] ss:$8 sps:$4 sm:$0xff]   ;;  %837 = vst.msk [vmem:[#allocation2 + $0x108] sm:$0xff] %vm419_vm0, %v3789_v47  ;;  %v456_v56 = vld [vmem:[%s3983_s28 + $0x108] sm:$0xff]  ;;  %v459_v5 = vld [vmem:[%s3983_s28 + $0x120] sm:$0xff] }
  0x29   : > { %1275 = vmatprep.subr.bf16.mxu1 %v3853_v1  ;;  %1716 = vmatprep.subr.bf16.mxu0 %v3853_v1  ;;  %831 = vst.msk [vmem:[#allocation2 + $0xd8] sm:$0xff] %vm419_vm0, %v3780_v26  ;;  %v3794_v57 = vld [vmem:[%s3983_s28 + $0x104] ss:$8 sps:$4 sm:$0xff]   ;;  %v4204_v61 = vcombine.low %v455_v54, %v456_v56  ;;  %v3796_v63 = vld [vmem:[%s3983_s28 + $0x114] ss:$8 sps:$4 sm:$0xff]  }
  0x2a   : > { %841 = vst.msk [vmem:[#allocation2 + $0x128] sm:$0xff] %vm419_vm0, %v3794_v57  ;;  %v3798_v9 = vld [vmem:[%s3983_s28 + $0x124] ss:$8 sps:$4 sm:$0xff]   ;;  %843 = vst.msk [vmem:[#allocation2 + $0x138] sm:$0xff] %vm419_vm0, %v3796_v63  ;;  %v4221_v14 = vld [vmem:[#allocation2 + $0x58] sm:$0xff] }
  0x2b   : > { %845 = vst.msk [vmem:[#allocation2 + $0x148] sm:$0xff] %vm419_vm0, %v3798_v9  ;;  %v3800_v16 = vld [vmem:[%s3983_s28 + $0x134] ss:$8 sps:$4 sm:$0xff]   ;;  %v3774_v23 = vld [vmem:[%s5168_s3 + $0xe8] sm:$0xff]   ;;  %v471_v54 = vld [vmem:[%s3983_s28 + $0x180] sm:$0xff] }
  0x2c   : > { %1276 = vmatpush1.bf16.msra.mxu1 %v3742_v37  ;;  %1717 = vmatpush1.bf16.msra.mxu0 %v4065_v43  ;;  %v450_v37 = vld [vmem:[%s3983_s28 + $0xd8] sm:$0xff]  ;;  %847 = vst.msk [vmem:[#allocation2 + $0x158] sm:$0xff] %vm419_vm0, %v3800_v16  ;;  %v461_v17 = vld [vmem:[%s3983_s28 + $0x130] sm:$0xff]  ;;  %v464_v26 = vld [vmem:[%s3983_s28 + $0x148] sm:$0xff] }
  0x2d   : > { %1277 = vmatprep.subr.bf16.mxu1 %v3853_v1  ;;  %1718 = vmatprep.subr.bf16.mxu0 %v3853_v1  ;;  %v3782_v30 = vld [vmem:[%s5168_s3 + $0xf8] sm:$0xff]   ;;  %v3806_v38 = vld [vmem:[%s3983_s28 + $0x164] ss:$8 sps:$4 sm:$0xff]  }
  0x2e   : > { %v3804_v31 = vld [vmem:[%s3983_s28 + $0x154] ss:$8 sps:$4 sm:$0xff]   ;;  %853 = vst.msk [vmem:[#allocation2 + $0x188] sm:$0xff] %vm419_vm0, %v3806_v38  ;;  %v4341_v52 = vld [vmem:[#allocation2 + $0xa8] sm:$0xff] }
  0x2f   : > { %851 = vst.msk [vmem:[#allocation2 + $0x178] sm:$0xff] %vm419_vm0, %v3804_v31  ;;  %v466_v33 = vld [vmem:[%s3983_s28 + $0x158] sm:$0xff]  ;;  %v472_v56 = vld [vmem:[%s3983_s28 + $0x188] sm:$0xff]  ;;  %v479_v31 = vld [vmem:[%s3983_s28 + $0x1c0] sm:$0xff] }
  0x30   : > { %1278 = vmatpush1.bf16.msra.mxu1 %v3744_v48  ;;  %1719 = vmatpush1.bf16.msra.mxu0 %v4085_v50  ;;  %v4181_v48 = vcombine.low %v451_v44, %v452_v45  ;;  %v468_v44 = vld [vmem:[%s3983_s28 + $0x168] sm:$0xff]  ;;  %v4326_v47 = vld [vmem:[#allocation2 + $0x98] sm:$0xff]  ;;  %v4353_v57 = vcombine.low %v471_v54, %v472_v56  ;;  %v481_v38 = vld [vmem:[%s3983_s28 + $0x1d0] sm:$0xff] }
  0x31   : > { %1279 = vmatprep.subr.bf16.mxu1 %v3853_v1  ;;  %1720 = vmatprep.subr.bf16.mxu0 %v3853_v1  ;;  %v474_v63 = vld [vmem:[%s3983_s28 + $0x198] sm:$0xff]  ;;  %v3814_v9 = vld [vmem:[%s3983_s28 + $0x1a4] ss:$8 sps:$4 sm:$0xff]   ;;  %v485_v56 = vld [vmem:[%s3983_s28 + $0x1f0] sm:$0xff] }
  0x32   : > { %861 = vst.msk [vmem:[#allocation2 + $0x1c8] sm:$0xff] %vm419_vm0, %v3814_v9  ;;  %v476_v16 = vld [vmem:[%s3983_s28 + $0x1a8] sm:$0xff] }
  0x33   : > { %v4449_v54 = vld [vmem:[#allocation2 + $0x128] sm:$0xff] }
  0x34   : > { %1280 = vmatpush1.bf16.msra.mxu1 %v1255_v3  ;;  %1721 = vmatpush1.bf16.msra.mxu0 %v4120_v7  ;;  %v4211_v3 = vcombine.low %v457_v58, %v458_v62  ;;  %v4355_v58 = vld [vmem:[#allocation2 + $0xb8] sm:$0xff]  ;;  %v473_v62 = vld [vmem:[%s3983_s28 + $0x190] sm:$0xff]  ;;  %v4469_v9 = vld [vmem:[#allocation2 + $0x148] sm:$0xff] }
  0x35   : > { %3497 = vmatprep.subr.bf16.mxu1 %v3853_v1  ;;  %2228 = vmatprep.subr.bf16.mxu0 %v3853_v1 }
  0x37   : > { %1290 = vmatmul.mubr.bf16.vlgmr.msra.gmra.mrb[0].mxu1 %v4006_v19  ;;  %1731 = vmatmul.mubr.bf16.vlgmr.msra.gmra.mrb[0].mxu0 %v3853_v1 }
  0x38   : > { %3509 = vmatpush1.bf16.msra.mxu1 %v3914_v2  ;;  %2229 = vmatpush1.bf16.msra.mxu0 %v3751_v18  ;;  %v449_v2 = vld [vmem:[%s3983_s28 + $0xd0] sm:$0xff]  ;;  %v462_v18 = vld [vmem:[%s3983_s28 + $0x138] sm:$0xff] }
  0x39   : > { %3346 = vmatprep.mubr.msk.bf16.mxu1 %vm419_vm0, %v4141_v24  ;;  %3390 = vmatprep.mubr.msk.bf16.mxu0 %vm419_vm0, %v916_v29  ;;  %v4168_v39 = vcombine.low %v449_v2, %v450_v37  ;;  %v4242_v22 = vcombine.low %v461_v17, %v462_v18  ;;  %v4299_v2 = vld [vmem:[#allocation2 + $0x88] sm:$0xff]  ;;  %v4383_v18 = vld [vmem:[#allocation2 + $0xd8] sm:$0xff] }
  0x3a   : > { %2230 = vmatprep.subr.bf16.mxu0 %v3853_v1  ;;  %3498 = vmatprep.subr.bf16.mxu1 %v3853_v1  ;;  %v3788_v37 = vld [vmem:[%s5168_s3 + $0x108] sm:$0xff]  }
  0x3c   : > { %3510 = vmatpush1.bf16.msra.mxu1 %v3925_v4  ;;  %2231 = vmatpush1.bf16.msra.mxu0 %v3755_v34  ;;  %v453_v4 = vld [vmem:[%s3983_s28 + $0xf0] sm:$0xff] }
  0x3d   : > { %3499 = vmatprep.subr.bf16.mxu1 %v3853_v1  ;;  %2232 = vmatprep.subr.bf16.mxu0 %v3853_v1  ;;  %v4189_v53 = vcombine.low %v453_v4, %v454_v51  ;;  %v3808_v4 = vld [vmem:[%s3983_s28 + $0x174] ss:$8 sps:$4 sm:$0xff]  }
  0x3e   : > { %855 = vst.msk [vmem:[#allocation2 + $0x198] sm:$0xff] %vm419_vm0, %v3808_v4  ;;  %v483_v4 = vld [vmem:[%s3983_s28 + $0x1e0] sm:$0xff] }
  0x3f   : > { %1298 = vmatmul.mubr.bf16.gmra.mrb[4].mxu1 %v4020_v25  ;;  %1739 = vmatmul.mubr.bf16.gmra.mrb[4].mxu0 %v3853_v1 }
  0x40   : > { %3347 = vmatprep.mubr.msk.bf16.mxu1 %vm419_vm0, %v4177_v46  ;;  %3391 = vmatprep.mubr.msk.bf16.mxu0 %vm419_vm0, %v4056_v40  ;;  %v460_v40 = vld [vmem:[%s3983_s28 + $0x128] sm:$0xff] }
  0x41   : > { %2233 = vmatpush1.bf16.msra.mxu0 %v3760_v41  ;;  %3511 = vmatpush1.bf16.msra.mxu1 %v3936_v6  ;;  %v4218_v11 = vcombine.low %v459_v5, %v460_v40  ;;  %v3766_v6 = vld [vmem:[%s5168_s3 + $0xd8] sm:$0xff]   ;;  %v3793_v41 = vld [vmem:[%s5168_s3 + $0x110] ss:$0 sps:$4 sm:$0x33]   ;;  %v4367_v5 = vcombine.low %v473_v62, %v474_v63  ;;  %v4369_v40 = vld [vmem:[#allocation2 + $0xc8] sm:$0xff] }
  0x42   : > { %2234 = vmatprep.subr.bf16.mxu0 %v3853_v1  ;;  %3500 = vmatprep.subr.bf16.mxu1 %v3853_v1  ;;  %v2226_v45 = vsel %vm1253_vm1, %v3793_v41, 0  ;;  %v482_v41 = vld [vmem:[%s3983_s28 + $0x1d8] sm:$0xff] }
  0x43   : > { %v4461_v63 = vld [vmem:[#allocation2 + $0x138] sm:$0xff] }
  0x45   : > { %2235 = vmatpush1.bf16.msra.mxu0 %v3763_v59  ;;  %3512 = vmatpush1.bf16.msra.mxu1 %v3948_v8  ;;  %v3771_v8 = vld [vmem:[%s5168_s3 + $0xe0] sm:$0xff]   ;;  %v3812_v59 = vld [vmem:[%s3983_s28 + $0x194] ss:$8 sps:$4 sm:$0xff]  }
  0x46   : > { %2236 = vmatprep.subr.bf16.mxu0 %v3853_v1  ;;  %3501 = vmatprep.subr.bf16.mxu1 %v3853_v1  ;;  %859 = vst.msk [vmem:[#allocation2 + $0x1b8] sm:$0xff] %vm419_vm0, %v3812_v59  ;;  %v486_v59 = vld [vmem:[%s3983_s28 + $0x1f8] sm:$0xff] }
  0x47   : > { %1305 = vmatmul.mubr.bf16.gmra.mrb[8].mxu1 %v4038_v32  ;;  %1746 = vmatmul.mubr.bf16.gmra.mrb[8].mxu0 %v4006_v19  ;;  %v4247_v19 = vld [vmem:[#allocation2 + $0x68] sm:$0xff]  ;;  %v4453_v62 = vcombine.low %v485_v56, %v486_v59 }
  0x48   : > { %3348 = vmatprep.mubr.msk.bf16.mxu1 %vm419_vm0, %v4221_v14  ;;  %3392 = vmatprep.mubr.msk.bf16.mxu0 %vm419_vm0, %v4141_v24  ;;  %v3802_v24 = vld [vmem:[%s3983_s28 + $0x144] ss:$8 sps:$4 sm:$0xff]  }
  0x49   : > { %2237 = vmatpush1.bf16.msra.mxu0 %v3766_v6  ;;  %3513 = vmatpush1.bf16.msra.mxu1 %v3962_v10  ;;  %849 = vst.msk [vmem:[#allocation2 + $0x168] sm:$0xff] %vm419_vm0, %v3802_v24  ;;  %v463_v10 = vld [vmem:[%s3983_s28 + $0x140] sm:$0xff]  ;;  %v477_v24 = vld [vmem:[%s3983_s28 + $0x1b0] sm:$0xff] }
  0x4a   : > { %2238 = vmatprep.subr.bf16.mxu0 %v3853_v1  ;;  %3502 = vmatprep.subr.bf16.mxu1 %v3853_v1  ;;  %v4268_v29 = vcombine.low %v463_v10, %v464_v26  ;;  %v475_v6 = vld [vmem:[%s3983_s28 + $0x1a0] sm:$0xff]  ;;  %v478_v10 = vld [vmem:[%s3983_s28 + $0x1b8] sm:$0xff] }
  0x4b   : > { %v4381_v17 = vcombine.low %v475_v6, %v476_v16  ;;  %v3818_v26 = vld [vmem:[%s3983_s28 + $0x1c4] ss:$8 sps:$4 sm:$0xff]  }
  0x4c   : > { %865 = vst.msk [vmem:[#allocation2 + $0x1e8] sm:$0xff] %vm419_vm0, %v3818_v26 }
  0x4d   : > { %2239 = vmatpush1.bf16.msra.mxu0 %v3771_v8  ;;  %3514 = vmatpush1.bf16.msra.mxu1 %v3976_v12  ;;  %v3777_v12 = vld [vmem:[%s5168_s3 + $0xf0] sm:$0xff]  }
  0x4e   : > { %2240 = vmatprep.subr.bf16.mxu0 %v3853_v1  ;;  %3503 = vmatprep.subr.bf16.mxu1 %v3853_v1  ;;  %v3816_v8 = vld [vmem:[%s3983_s28 + $0x1b4] ss:$8 sps:$4 sm:$0xff]  }
  0x4f   : > { %1313 = vmatmul.mubr.bf16.gmra.mrb[12].mxu1 %v4047_v36  ;;  %1754 = vmatmul.mubr.bf16.gmra.mrb[12].mxu0 %v4020_v25  ;;  %v4273_v25 = vld [vmem:[#allocation2 + $0x78] sm:$0xff]  ;;  %863 = vst.msk [vmem:[#allocation2 + $0x1d8] sm:$0xff] %vm419_vm0, %v3816_v8 }
  0x50   : > { %3349 = vmatprep.mubr.msk.bf16.mxu1 %vm419_vm0, %v4247_v19  ;;  %3393 = vmatprep.mubr.msk.bf16.mxu0 %vm419_vm0, %v4177_v46 }
  0x51   : > { %2241 = vmatpush1.bf16.msra.mxu0 %v3774_v23  ;;  %3515 = vmatpush1.bf16.msra.mxu1 %v3998_v15  ;;  %v465_v15 = vld [vmem:[%s3983_s28 + $0x150] sm:$0xff]  ;;  %v4393_v23 = vld [vmem:[#allocation2 + $0xe8] sm:$0xff] }
  0x52   : > { %2242 = vmatprep.subr.bf16.mxu0 %v3853_v1  ;;  %3504 = vmatprep.subr.bf16.mxu1 %v3853_v1  ;;  %v4294_v34 = vcombine.low %v465_v15, %v466_v33  ;;  %v480_v15 = vld [vmem:[%s3983_s28 + $0x1c8] sm:$0xff]  ;;  %v3820_v33 = vld [vmem:[%s3983_s28 + $0x1d4] ss:$8 sps:$4 sm:$0xff]  }
  0x53   : > { %867 = vst.msk [vmem:[#allocation2 + $0x1f8] sm:$0xff] %vm419_vm0, %v3820_v33 }
  0x55   : > { %2243 = vmatpush1.bf16.msra.mxu0 %v3777_v12  ;;  %3516 = vmatpush1.bf16.msra.mxu1 %v4011_v20  ;;  %v3785_v20 = vld [vmem:[%s5168_s3 + $0x100] sm:$0xff]   ;;  %v4398_v12 = vcombine.low %v477_v24, %v478_v10 }
  0x56   : > { %2244 = vmatprep.subr.bf16.mxu0 %v3853_v1  ;;  %3505 = vmatprep.subr.bf16.mxu1 %v3853_v1 }
  0x57   : > { %1320 = vmatmul.mubr.bf16.gmra.mrb[16].mxu1 %v4060_v42  ;;  %1761 = vmatmul.mubr.bf16.gmra.mrb[16].mxu0 %v4038_v32 }
  0x58   : > { %3350 = vmatprep.mubr.msk.bf16.mxu1 %vm419_vm0, %v4273_v25  ;;  %3394 = vmatprep.mubr.msk.bf16.mxu0 %vm419_vm0, %v4221_v14 }
  0x59   : > { %2245 = vmatpush1.bf16.msra.mxu0 %v3782_v30  ;;  %3517 = vmatpush1.bf16.msra.mxu1 %v4031_v28  ;;  %v467_v28 = vld [vmem:[%s3983_s28 + $0x160] sm:$0xff]  ;;  %v4407_v30 = vld [vmem:[#allocation2 + $0xf8] sm:$0xff] }
  0x5a   : > { %2246 = vmatprep.subr.bf16.mxu0 %v3853_v1  ;;  %3506 = vmatprep.subr.bf16.mxu1 %v3853_v1 }
  0x5d   : > { %2247 = vmatpush1.bf16.msra.mxu0 %v3785_v20  ;;  %3518 = vmatpush1.bf16.msra.mxu1 %v4065_v43  ;;  %v4320_v43 = vcombine.low %v467_v28, %v468_v44  ;;  %v4412_v20 = vcombine.low %v479_v31, %v480_v15  ;;  %v3822_v28 = vld [vmem:[%s3983_s28 + $0x1e4] ss:$8 sps:$4 sm:$0xff]   ;;  %v4426_v44 = vcombine.low %v481_v38, %v482_v41 }
  0x5e   : > { %2248 = vmatprep.subr.bf16.mxu0 %v3853_v1  ;;  %3507 = vmatprep.subr.bf16.mxu1 %v3853_v1  ;;  %869 = vst.msk [vmem:[#allocation2 + $0x208] sm:$0xff] %vm419_vm0, %v3822_v28 }
  0x5f   : > { %1328 = vmatmul.mubr.bf16.gmra.mrb[20].mxu1 %v4080_v49  ;;  %1769 = vmatmul.mubr.bf16.gmra.mrb[20].mxu0 %v4047_v36 }
  0x60   : > { %3351 = vmatprep.mubr.msk.bf16.mxu1 %vm419_vm0, %v4299_v2  ;;  %3395 = vmatprep.mubr.msk.bf16.mxu0 %vm419_vm0, %v4247_v19 }
  0x61   : > { %2249 = vmatpush1.bf16.msra.mxu0 %v3788_v37  ;;  %3519 = vmatpush1.bf16.msra.mxu1 %v4085_v50  ;;  %v469_v50 = vld [vmem:[%s3983_s28 + $0x170] sm:$0xff]  ;;  %v4421_v37 = vld [vmem:[#allocation2 + $0x108] sm:$0xff] }
  0x62   : > { %2250 = vmatprep.subr.bf16.mxu0 %v3853_v1  ;;  %3508 = vmatprep.subr.bf16.mxu1 %v3853_v1  ;;  %v470_v1 = vld [vmem:[%s3983_s28 + $0x178] sm:$0xff] }
  0x63   : > { %v4339_v51 = vcombine.low %v469_v50, %v470_v1  ;;  %v484_v50 = vld [vmem:[%s3983_s28 + $0x1e8] sm:$0xff]  ;;  %v3824_v1 = vld [vmem:[%s3983_s28 + $0x1f4] ss:$8 sps:$4 sm:$0xff]  }
  0x64   : > { %871 = vst.msk [vmem:[#allocation2 + $0x218] sm:$0xff] %vm419_vm0, %v3824_v1 }
  0x65   : > { %2251 = vmatpush1.bf16.msra.mxu0 %v2226_v45  ;;  %3520 = vmatpush1.bf16.msra.mxu1 %v4120_v7  ;;  %v3810_v7 = vld [vmem:[%s3983_s28 + $0x184] ss:$8 sps:$4 sm:$0xff]   ;;  %v4435_v45 = vld [vmem:[#allocation2 + $0x118] sm:$0xff]  ;;  %s3494_s28 = sadd.s32 480, %s3969_s23  ;;  %s3854_s23 = smov 126  }
  0x66   : > { %857 = vst.msk [vmem:[#allocation2 + $0x1a8] sm:$0xff] %vm419_vm0, %v3810_v7  ;;  %v4440_v7 = vcombine.low %v483_v4, %v484_v50  ;;  %s377_s24 = scalar_lea.vmem %s5167_s2, %s3494_s28  ;;  %v4579_v8 = vld [vmem:[#allocation2 + $0x208] sm:$0xff] }
  0x67   : > { %1335 = vmatmul.mubr.bf16.gmra.mrb[24].mxu1 %v4094_v55  ;;  %1776 = vmatmul.mubr.bf16.gmra.mrb[24].mxu0 %v4060_v42  ;;  %v3826_v16 = vld [vmem:[%s377_s24 + $0x4] ss:$8 sps:$4 sm:$0xff]  }
  0x68   : > { %3352 = vmatprep.mubr.msk.bf16.mxu1 %vm419_vm0, %v4326_v47  ;;  %3396 = vmatprep.mubr.msk.bf16.mxu0 %vm419_vm0, %v4273_v25  ;;  %898 = vst.msk [vmem:[#allocation2 + $0x228] sm:$0xff] %vm419_vm0, %v3826_v16 }
  0x6b   : > { %v4594_v15 = vld [vmem:[#allocation2 + $0x218] sm:$0xff] }
  0x6f   : > { %1343 = vmatmul.mubr.bf16.gmra.mrb[28].mxu1 %v4106_v60  ;;  %1784 = vmatmul.mubr.bf16.gmra.mrb[28].mxu0 %v4080_v49 }
  0x70   : > { %3353 = vmatprep.mubr.msk.bf16.mxu1 %vm419_vm0, %v4341_v52  ;;  %3397 = vmatprep.mubr.msk.bf16.mxu0 %vm419_vm0, %v4299_v2 }
  0x77   : > { %1350 = vmatmul.mubr.bf16.gmra.mrb[32].mxu1 %v4112_v0  ;;  %1791 = vmatmul.mubr.bf16.gmra.mrb[32].mxu0 %v4094_v55 }
  0x78   : > { %3354 = vmatprep.mubr.msk.bf16.mxu1 %vm419_vm0, %v4355_v58  ;;  %3398 = vmatprep.mubr.msk.bf16.mxu0 %vm419_vm0, %v4326_v47 }
  0x7f   : > { %1358 = vmatmul.mubr.bf16.gmra.mrb[36].mxu1 %v4125_v13  ;;  %1799 = vmatmul.mubr.bf16.gmra.mrb[36].mxu0 %v4106_v60 }
  0x80   : > { %3355 = vmatprep.mubr.msk.bf16.mxu1 %vm419_vm0, %v4369_v40  ;;  %3399 = vmatprep.mubr.msk.bf16.mxu0 %vm419_vm0, %v4341_v52 }
  0x87   : > { %1365 = vmatmul.mubr.bf16.gmra.mrb[40].mxu1 %v4136_v21  ;;  %1806 = vmatmul.mubr.bf16.gmra.mrb[40].mxu0 %v4112_v0 }
  0x88   : > { %3356 = vmatprep.mubr.msk.bf16.mxu1 %vm419_vm0, %v4383_v18  ;;  %3400 = vmatprep.mubr.msk.bf16.mxu0 %vm419_vm0, %v4355_v58 }
  0x8f   : > { %1373 = vmatmul.mubr.bf16.gmra.mrb[44].mxu1 %v4145_v27  ;;  %1814 = vmatmul.mubr.bf16.gmra.mrb[44].mxu0 %v4125_v13 }
  0x90   : > { %3357 = vmatprep.mubr.msk.bf16.mxu1 %vm419_vm0, %v4393_v23  ;;  %3401 = vmatprep.mubr.msk.bf16.mxu0 %vm419_vm0, %v4369_v40 }
  0x97   : > { %1380 = vmatmul.mubr.bf16.gmra.mrb[48].mxu1 %v4159_v35  ;;  %1821 = vmatmul.mubr.bf16.gmra.mrb[48].mxu0 %v4136_v21 }
  0x98   : > { %3358 = vmatprep.mubr.msk.bf16.mxu1 %vm419_vm0, %v4407_v30  ;;  %3402 = vmatprep.mubr.msk.bf16.mxu0 %vm419_vm0, %v4383_v18 }
  0x9f   : > { %1388 = vmatmul.mubr.bf16.gmra.mrb[52].mxu1 %v4168_v39  ;;  %1829 = vmatmul.mubr.bf16.gmra.mrb[52].mxu0 %v4145_v27 }
  0xa0   : > { %3359 = vmatprep.mubr.msk.bf16.mxu1 %vm419_vm0, %v4421_v37  ;;  %3403 = vmatprep.mubr.msk.bf16.mxu0 %vm419_vm0, %v4393_v23 }
  0xa7   : > { %1395 = vmatmul.mubr.bf16.gmra.mrb[56].mxu1 %v4181_v48  ;;  %1836 = vmatmul.mubr.bf16.gmra.mrb[56].mxu0 %v4159_v35 }
  0xa8   : > { %3360 = vmatprep.mubr.msk.bf16.mxu1 %vm419_vm0, %v4435_v45  ;;  %3404 = vmatprep.mubr.msk.bf16.mxu0 %vm419_vm0, %v4407_v30 }
  0xaf   : > { %1403 = vmatmul.mubr.bf16.gmra.mrb[60].mxu1 %v4189_v53  ;;  %1844 = vmatmul.mubr.bf16.gmra.mrb[60].mxu0 %v4168_v39 }
  0xb0   : > { %3361 = vmatprep.mubr.msk.bf16.mxu1 %vm419_vm0, %v4449_v54  ;;  %3456 = vmatprep.mubr.msk.bf16.mxu0 %vm419_vm0, %v4177_v46  ;;  %v4477_v46 = vld [vmem:[#allocation2 + $0x158] sm:$0xff] }
  0xb7   : > { %1410 = vmatmul.mubr.bf16.gmra.mrb[64].mxu1 %v4204_v61  ;;  %2261 = vmatmul.mubr.bf16.vlgmr.msra.gmra.mrb[0].mxu0 %v4038_v32  ;;  %v4485_v32 = vld [vmem:[#allocation2 + $0x168] sm:$0xff] }
  0xb8   : > { %3362 = vmatprep.mubr.msk.bf16.mxu1 %vm419_vm0, %v4461_v63  ;;  %3457 = vmatprep.mubr.msk.bf16.mxu0 %vm419_vm0, %v4221_v14 }
  0xbf   : > { %1418 = vmatmul.mubr.bf16.gmra.mrb[68].mxu1 %v4211_v3  ;;  %2269 = vmatmul.mubr.bf16.gmra.mrb[4].mxu0 %v4047_v36  ;;  %v4493_v36 = vld [vmem:[#allocation2 + $0x178] sm:$0xff] }
  0xc0   : > { %3363 = vmatprep.mubr.msk.bf16.mxu1 %vm419_vm0, %v4469_v9  ;;  %3458 = vmatprep.mubr.msk.bf16.mxu0 %vm419_vm0, %v4247_v19 }
  0xc7   : > { %1425 = vmatmul.mubr.bf16.gmra.mrb[72].mxu1 %v4218_v11  ;;  %2276 = vmatmul.mubr.bf16.gmra.mrb[8].mxu0 %v4060_v42  ;;  %v4501_v42 = vld [vmem:[#allocation2 + $0x188] sm:$0xff] }
  0xc8   : > { %3364 = vmatprep.mubr.msk.bf16.mxu1 %vm419_vm0, %v4477_v46  ;;  %3459 = vmatprep.mubr.msk.bf16.mxu0 %vm419_vm0, %v4273_v25  ;;  %v4553_v25 = vld [vmem:[#allocation2 + $0x1e8] sm:$0xff] }
  0xcf   : > { %1433 = vmatmul.mubr.bf16.gmra.mrb[76].mxu1 %v4242_v22  ;;  %2284 = vmatmul.mubr.bf16.gmra.mrb[12].mxu0 %v4080_v49  ;;  %v4509_v49 = vld [vmem:[#allocation2 + $0x198] sm:$0xff] }
  0xd0   : > { %3365 = vmatprep.mubr.msk.bf16.mxu1 %vm419_vm0, %v4485_v32  ;;  %3460 = vmatprep.mubr.msk.bf16.mxu0 %vm419_vm0, %v4299_v2 }
  0xd7   : > { %1440 = vmatmul.mubr.bf16.gmra.mrb[80].mxu1 %v4268_v29  ;;  %2291 = vmatmul.mubr.bf16.gmra.mrb[16].mxu0 %v4094_v55  ;;  %v4517_v55 = vld [vmem:[#allocation2 + $0x1a8] sm:$0xff] }
  0xd8   : > { %3366 = vmatprep.mubr.msk.bf16.mxu1 %vm419_vm0, %v4493_v36  ;;  %3461 = vmatprep.mubr.msk.bf16.mxu0 %vm419_vm0, %v4326_v47 }
  0xdf   : > { %1448 = vmatmul.mubr.bf16.gmra.mrb[84].mxu1 %v4294_v34  ;;  %2299 = vmatmul.mubr.bf16.gmra.mrb[20].mxu0 %v4106_v60  ;;  %v4525_v60 = vld [vmem:[#allocation2 + $0x1b8] sm:$0xff] }
  0xe0   : > { %3367 = vmatprep.mubr.msk.bf16.mxu1 %vm419_vm0, %v4501_v42  ;;  %3462 = vmatprep.mubr.msk.bf16.mxu0 %vm419_vm0, %v4341_v52 }
  0xe7   : > { %1455 = vmatmul.mubr.bf16.gmra.mrb[88].mxu1 %v4320_v43  ;;  %2306 = vmatmul.mubr.bf16.gmra.mrb[24].mxu0 %v4112_v0  ;;  %v4533_v0 = vld [vmem:[#allocation2 + $0x1c8] sm:$0xff] }
  0xe8   : > { %3368 = vmatprep.mubr.msk.bf16.mxu1 %vm419_vm0, %v4509_v49  ;;  %3463 = vmatprep.mubr.msk.bf16.mxu0 %vm419_vm0, %v4355_v58  ;;  %v4563_v58 = vld [vmem:[#allocation2 + $0x1f8] sm:$0xff] }
  0xef   : > { %1463 = vmatmul.mubr.bf16.gmra.mrb[92].mxu1 %v4339_v51  ;;  %2314 = vmatmul.mubr.bf16.gmra.mrb[28].mxu0 %v4125_v13  ;;  %v4541_v13 = vld [vmem:[#allocation2 + $0x1d8] sm:$0xff] }
  0xf0   : > { %3369 = vmatprep.mubr.msk.bf16.mxu1 %vm419_vm0, %v4517_v55  ;;  %3464 = vmatprep.mubr.msk.bf16.mxu0 %vm419_vm0, %v4369_v40 }
  0xf7   : > { %1470 = vmatmul.mubr.bf16.gmra.mrb[96].mxu1 %v4353_v57  ;;  %2321 = vmatmul.mubr.bf16.gmra.mrb[32].mxu0 %v4136_v21 }
  0xf8   : > { %3370 = vmatprep.mubr.msk.bf16.mxu1 %vm419_vm0, %v4525_v60  ;;  %3465 = vmatprep.mubr.msk.bf16.mxu0 %vm419_vm0, %v4383_v18 }
  0xff   : > { %1478 = vmatmul.mubr.bf16.gmra.mrb[100].mxu1 %v4367_v5  ;;  %2329 = vmatmul.mubr.bf16.gmra.mrb[36].mxu0 %v4145_v27 }
 0x100   : > { %3371 = vmatprep.mubr.msk.bf16.mxu1 %vm419_vm0, %v4533_v0  ;;  %3466 = vmatprep.mubr.msk.bf16.mxu0 %vm419_vm0, %v4393_v23  ;;  %v4583_v23 = vld [vmem:[#allocation2] sm:$0xff] }
 0x101   : > { %910 = vst.msk [vmem:[#allocation2 + $0x228] sm:$0xff] %vm419_vm0, %v4583_v23 }
 0x107   : > { %1485 = vmatmul.mubr.bf16.gmra.mrb[104].mxu1 %v4381_v17  ;;  %2336 = vmatmul.mubr.bf16.gmra.mrb[40].mxu0 %v4159_v35 }
 0x108   : > { %3372 = vmatprep.mubr.msk.bf16.mxu1 %vm419_vm0, %v4541_v13  ;;  %3467 = vmatprep.mubr.msk.bf16.mxu0 %vm419_vm0, %v4407_v30  ;;  %v3827_v30 = vld [vmem:[%s377_s24 + $0x14] ss:$8 sps:$4 sm:$0xff]  }
 0x109   : > { %900 = vst.msk [vmem:[#allocation2 + $0x238] sm:$0xff] %vm419_vm0, %v3827_v30 }
 0x10a   : > { %v4549_v21 = vpop.f32.mrb[0].mxu1  ;;  %912 = vst.msk [vmem:[#allocation2 + $0x238] sm:$0xff] %vm419_vm0, %v4583_v23 }
 0x10b   : > { %v1293_v27 = vpop.f32.mrb[1].mxu1 }
 0x10c   : > { %v4551_v14 = vpop.f32.mrb[2].mxu1 }
 0x10d   : > { %v1296_v19 = vpop.f32.mrb[3].mxu1 }
 0x10f   : > { %1493 = vmatmul.mubr.bf16.gmra.mrb[108].mxu1 %v4398_v12  ;;  %2344 = vmatmul.mubr.bf16.gmra.mrb[44].mxu0 %v4168_v39 }
 0x110   : > { %3373 = vmatprep.mubr.msk.bf16.mxu1 %vm419_vm0, %v4553_v25  ;;  %3468 = vmatprep.mubr.msk.bf16.mxu0 %vm419_vm0, %v4421_v37 }
 0x112   : > { %v4561_v35 = vpop.f32.mrb[4].mxu1 }
 0x113   : > { %v1301_v2 = vpop.f32.mrb[5].mxu1 }
 0x114   : > { %v1302_v47 = vpop.f32.mrb[6].mxu1 }
 0x115   : > { %v1303_v52 = vpop.f32.mrb[7].mxu1 }
 0x117   : > { %1500 = vmatmul.mubr.bf16.gmra.mrb[112].mxu1 %v4412_v20  ;;  %2351 = vmatmul.mubr.bf16.gmra.mrb[48].mxu0 %v4181_v48 }
 0x118   : > { %3374 = vmatprep.mubr.msk.bf16.mxu1 %vm419_vm0, %v4563_v58  ;;  %3469 = vmatprep.mubr.msk.bf16.mxu0 %vm419_vm0, %v4435_v45 }
 0x11a   : > { %v4571_v39 = vpop.f32.mrb[8].mxu1 }
 0x11b   : > { %v1308_v40 = vpop.f32.mrb[9].mxu1 }
 0x11c   : > { %v4577_v6 = vpop.f32.mrb[10].mxu1 }
 0x11d   : > { %v1311_v18 = vpop.f32.mrb[11].mxu1 }
 0x11f   : > { %1508 = vmatmul.mubr.bf16.gmra.mrb[116].mxu1 %v4426_v44  ;;  %2359 = vmatmul.mubr.bf16.gmra.mrb[52].mxu0 %v4189_v53 }
 0x120   : > { %3375 = vmatprep.mubr.msk.bf16.mxu1 %vm419_vm0, %v4579_v8  ;;  %3470 = vmatprep.mubr.msk.bf16.mxu0 %vm419_vm0, %v4449_v54 }
 0x122   : > { %v4592_v24 = vpop.f32.mrb[12].mxu1 }
 0x123   : > { %v1316_v10 = vpop.f32.mrb[13].mxu1 }
 0x124   : > { %v1317_v26 = vpop.f32.mrb[14].mxu1 }
 0x125   : > { %v1318_v31 = vpop.f32.mrb[15].mxu1 }
 0x127   : > { %1515 = vmatmul.mubr.bf16.gmra.mrb[120].mxu1 %v4440_v7  ;;  %2366 = vmatmul.mubr.bf16.gmra.mrb[56].mxu0 %v4204_v61 }
 0x128   : > { %3376 = vmatprep.mubr.msk.bf16.mxu1 %vm419_vm0, %v4594_v15  ;;  %3471 = vmatprep.mubr.msk.bf16.mxu0 %vm419_vm0, %v4461_v63 }
 0x12a   : > { %v4605_v33 = vpop.f32.mrb[16].mxu1 }
 0x12b   : > { %v1323_v38 = vpop.f32.mrb[17].mxu1 }
 0x12c   : > { %v4607_v41 = vpop.f32.mrb[18].mxu1 }
 0x12d   : > { %v1326_v28 = vpop.f32.mrb[19].mxu1 }
 0x12f   : > { %1523 = vmatmul.mubr.bf16.gmra.mrb[124].mxu1 %v4453_v62  ;;  %2374 = vmatmul.mubr.bf16.gmra.mrb[60].mxu0 %v4211_v3 }
 0x130   : > { %3405 = vmatprep.mubr.msk.bf16.mxu1 %vm419_vm0, %v4421_v37  ;;  %3472 = vmatprep.mubr.msk.bf16.mxu0 %vm419_vm0, %v4469_v9 }
 0x132   : > { %v4615_v4 = vpop.f32.mrb[20].mxu1 }
 0x133   : > { %v1331_v50 = vpop.f32.mrb[21].mxu1 }
 0x134   : > { %v1332_v1 = vpop.f32.mrb[22].mxu1 }
 0x135   : > { %v1333_v56 = vpop.f32.mrb[23].mxu1 }
 0x137   : > { %1851 = vmatmul.mubr.bf16.vlgmr.msra.gmra.mrb[64].mxu1 %v4181_v48  ;;  %2381 = vmatmul.mubr.bf16.gmra.mrb[64].mxu0 %v4218_v11 }
 0x138   : > { %3406 = vmatprep.mubr.msk.bf16.mxu1 %vm419_vm0, %v4435_v45  ;;  %3473 = vmatprep.mubr.msk.bf16.mxu0 %vm419_vm0, %v4477_v46 }
 0x13a   : > { %v4623_v59 = vpop.f32.mrb[24].mxu1 }
 0x13b   : > { %v1338_v37 = vpop.f32.mrb[25].mxu1 }
 0x13c   : > { %v4625_v27 = vpop.f32.mrb[26].mxu1 }
 0x13d   : > { %v1341_v19 = vpop.f32.mrb[27].mxu1 }
 0x13f   : > { %1859 = vmatmul.mubr.bf16.gmra.mrb[68].mxu1 %v4189_v53  ;;  %2389 = vmatmul.mubr.bf16.gmra.mrb[68].mxu0 %v4242_v22 }
 0x140   : > { %3407 = vmatprep.mubr.msk.bf16.mxu1 %vm419_vm0, %v4449_v54  ;;  %3474 = vmatprep.mubr.msk.bf16.mxu0 %vm419_vm0, %v4485_v32 }
 0x142   : > { %v4633_v48 = vpop.f32.mrb[28].mxu1 }
 0x143   : > { %v1346_v45 = vpop.f32.mrb[29].mxu1 }
 0x144   : > { %v1347_v2 = vpop.f32.mrb[30].mxu1 }
 0x145   : > { %v1348_v47 = vpop.f32.mrb[31].mxu1 }
 0x147   : > { %1866 = vmatmul.mubr.bf16.gmra.mrb[72].mxu1 %v4204_v61  ;;  %2396 = vmatmul.mubr.bf16.gmra.mrb[72].mxu0 %v4268_v29 }
 0x148   : > { %3408 = vmatprep.mubr.msk.bf16.mxu1 %vm419_vm0, %v4461_v63  ;;  %3475 = vmatprep.mubr.msk.bf16.mxu0 %vm419_vm0, %v4493_v36 }
 0x14a   : > { %v4641_v53 = vpop.f32.mrb[32].mxu1 }
 0x14b   : > { %v1353_v54 = vpop.f32.mrb[33].mxu1 }
 0x14c   : > { %v4643_v52 = vpop.f32.mrb[34].mxu1 }
 0x14d   : > { %v1356_v40 = vpop.f32.mrb[35].mxu1 }
 0x14f   : > { %1874 = vmatmul.mubr.bf16.gmra.mrb[76].mxu1 %v4211_v3  ;;  %2404 = vmatmul.mubr.bf16.gmra.mrb[76].mxu0 %v4294_v34 }
 0x150   : > { %3409 = vmatprep.mubr.msk.bf16.mxu1 %vm419_vm0, %v4469_v9  ;;  %3476 = vmatprep.mubr.msk.bf16.mxu0 %vm419_vm0, %v4501_v42 }
 0x152   : > { %v4651_v61 = vpop.f32.mrb[36].mxu1 }
 0x153   : > { %v1361_v63 = vpop.f32.mrb[37].mxu1 }
 0x154   : > { %v1362_v16 = vpop.f32.mrb[38].mxu1 }
 0x155   : > { %v1363_v18 = vpop.f32.mrb[39].mxu1 }
 0x157   : > { %1881 = vmatmul.mubr.bf16.gmra.mrb[80].mxu1 %v4218_v11  ;;  %2411 = vmatmul.mubr.bf16.gmra.mrb[80].mxu0 %v4320_v43 }
 0x158   : > { %3410 = vmatprep.mubr.msk.bf16.mxu1 %vm419_vm0, %v4477_v46  ;;  %3477 = vmatprep.mubr.msk.bf16.mxu0 %vm419_vm0, %v4509_v49 }
 0x15a   : > { %v4659_v3 = vpop.f32.mrb[40].mxu1 }
 0x15b   : > { %v1368_v9 = vpop.f32.mrb[41].mxu1 }
 0x15c   : > { %v4661_v10 = vpop.f32.mrb[42].mxu1 }
 0x15d   : > { %v1371_v26 = vpop.f32.mrb[43].mxu1 }
 0x15f   : > { %1889 = vmatmul.mubr.bf16.gmra.mrb[84].mxu1 %v4242_v22  ;;  %2419 = vmatmul.mubr.bf16.gmra.mrb[84].mxu0 %v4339_v51 }
 0x160   : > { %3411 = vmatprep.mubr.msk.bf16.mxu1 %vm419_vm0, %v4485_v32  ;;  %3478 = vmatprep.mubr.msk.bf16.mxu0 %vm419_vm0, %v4517_v55 }
 0x162   : > { %v4669_v11 = vpop.f32.mrb[44].mxu1 }
 0x163   : > { %v1376_v46 = vpop.f32.mrb[45].mxu1 }
 0x164   : > { %v1377_v30 = vpop.f32.mrb[46].mxu1 }
 0x165   : > { %v1378_v31 = vpop.f32.mrb[47].mxu1 }
 0x167   : > { %1896 = vmatmul.mubr.bf16.gmra.mrb[88].mxu1 %v4268_v29  ;;  %2426 = vmatmul.mubr.bf16.gmra.mrb[88].mxu0 %v4353_v57 }
 0x168   : > { %3412 = vmatprep.mubr.msk.bf16.mxu1 %vm419_vm0, %v4493_v36  ;;  %3479 = vmatprep.mubr.msk.bf16.mxu0 %vm419_vm0, %v4525_v60 }
 0x16a   : > { %v4677_v22 = vpop.f32.mrb[48].mxu1 }
 0x16b   : > { %v1383_v32 = vpop.f32.mrb[49].mxu1 }
 0x16c   : > { %v4679_v38 = vpop.f32.mrb[50].mxu1 }
 0x16d   : > { %v1386_v28 = vpop.f32.mrb[51].mxu1 }
 0x16f   : > { %1904 = vmatmul.mubr.bf16.gmra.mrb[92].mxu1 %v4294_v34  ;;  %2434 = vmatmul.mubr.bf16.gmra.mrb[92].mxu0 %v4367_v5 }
 0x170   : > { %3413 = vmatprep.mubr.msk.bf16.mxu1 %vm419_vm0, %v4501_v42  ;;  %3480 = vmatprep.mubr.msk.bf16.mxu0 %vm419_vm0, %v4533_v0 }
 0x172   : > { %v4687_v29 = vpop.f32.mrb[52].mxu1 }
 0x173   : > { %v1391_v36 = vpop.f32.mrb[53].mxu1 }
 0x174   : > { %v1392_v50 = vpop.f32.mrb[54].mxu1 }
 0x175   : > { %v1393_v1 = vpop.f32.mrb[55].mxu1 }
 0x177   : > { %1911 = vmatmul.mubr.bf16.gmra.mrb[96].mxu1 %v4320_v43  ;;  %2441 = vmatmul.mubr.bf16.gmra.mrb[96].mxu0 %v4381_v17 }
 0x178   : > { %3414 = vmatprep.mubr.msk.bf16.mxu1 %vm419_vm0, %v4509_v49  ;;  %3481 = vmatprep.mubr.msk.bf16.mxu0 %vm419_vm0, %v4541_v13 }
 0x17a   : > { %v4695_v34 = vpop.f32.mrb[56].mxu1 }
 0x17b   : > { %v1398_v42 = vpop.f32.mrb[57].mxu1 }
 0x17c   : > { %v4697_v56 = vpop.f32.mrb[58].mxu1 }
 0x17d   : > { %v1401_v37 = vpop.f32.mrb[59].mxu1 }
 0x17f   : > { %1919 = vmatmul.mubr.bf16.gmra.mrb[100].mxu1 %v4339_v51  ;;  %2449 = vmatmul.mubr.bf16.gmra.mrb[100].mxu0 %v4398_v12 }
 0x180   : > { %3415 = vmatprep.mubr.msk.bf16.mxu1 %vm419_vm0, %v4517_v55  ;;  %3482 = vmatprep.mubr.msk.bf16.mxu0 %vm419_vm0, %v4553_v25 }
 0x182   : > { %v4705_v43 = vpop.f32.mrb[60].mxu1 }
 0x183   : > { %v1406_v49 = vpop.f32.mrb[61].mxu1 }
 0x184   : > { %v1407_v19 = vpop.f32.mrb[62].mxu1 }
 0x185   : > { %v1408_v45 = vpop.f32.mrb[63].mxu1 }
 0x187   : > { %1926 = vmatmul.mubr.bf16.gmra.mrb[104].mxu1 %v4353_v57  ;;  %2456 = vmatmul.mubr.bf16.gmra.mrb[104].mxu0 %v4412_v20 }
 0x188   : > { %3416 = vmatprep.mubr.msk.bf16.mxu1 %vm419_vm0, %v4525_v60  ;;  %3483 = vmatprep.mubr.msk.bf16.mxu0 %vm419_vm0, %v4563_v58 }
 0x18a   : > { %v2262_v51 = vpop.f32.mrb[0].mxu0 }
 0x18b   : > { %v4714_v55 = vadd.f32 %v2262_v51, %v4549_v21  ;;  %v2264_v2 = vpop.f32.mrb[1].mxu0  ;;  %v2035_v51 = vld [vmem:[#allocation2 + $0x238] sm:$0xff] }
 0x18c   : > { %v2265_v47 = vpop.f32.mrb[2].mxu0 }
 0x18d   : > { %v4717_v54 = vadd.f32 %v2265_v47, %v4551_v14  ;;  %v2267_v40 = vpop.f32.mrb[3].mxu0  ;;  %v2598_v57 = vrot.slane %v4714_v55, 1  ;;  %v2807_v63 = vrot.slane %v4714_v55, 2 }
 0x18f   : > { %1934 = vmatmul.mubr.bf16.gmra.mrb[108].mxu1 %v4367_v5  ;;  %2464 = vmatmul.mubr.bf16.gmra.mrb[108].mxu0 %v4426_v44  ;;  %v2599_v60 = vrot.slane %v4717_v54, 1  ;;  %v2808_v21 = vrot.slane %v4717_v54, 2 }
 0x190   : > { %3417 = vmatprep.mubr.msk.bf16.mxu1 %vm419_vm0, %v4533_v0  ;;  %3484 = vmatprep.mubr.msk.bf16.mxu0 %vm419_vm0, %v4579_v8 }
 0x191   : > { %v2600_v14 = vsel %vm2597_vm2, %v2598_v57, %v2599_v60  ;;  %v2809_v8 = vsel %vm2806_vm3, %v2807_v63, %v2808_v21 }
 0x192   : > { %2678 = vrot.lane.b32.xlu0 %v2600_v14, %s3854_s23  ;;  %v2270_v5 = vpop.f32.mrb[4].mxu0 }
 0x193   : > { %v3523_v16 = vadd.f32 %v2270_v5, %v4561_v35  ;;  %v2272_v18 = vpop.f32.mrb[5].mxu0 }
 0x194   : > { %v2273_v9 = vpop.f32.mrb[6].mxu0 }
 0x195   : > { %v2601_v26 = vrot.slane %v3523_v16, 1  ;;  %v2810_v0 = vrot.slane %v3523_v16, 2  ;;  %v2274_v46 = vpop.f32.mrb[7].mxu0 }
 0x196   : > { %2887 = vrot.lane.b32.xlu0 %v2809_v8, %s3855_s25 }
 0x197   : > { %1941 = vmatmul.mubr.bf16.gmra.mrb[112].mxu1 %v4381_v17  ;;  %2471 = vmatmul.mubr.bf16.gmra.mrb[112].mxu0 %v4440_v7  ;;  %v2811_v30 = vsel %vm2806_vm3, %v2808_v21, %v2810_v0  ;;  %v2602_v35 = vsel %vm2597_vm2, %v2599_v60, %v2601_v26 }
 0x198   : > { %3418 = vmatprep.mubr.msk.bf16.mxu1 %vm419_vm0, %v4541_v13  ;;  %2889 = vrot.lane.b32.xlu1 %v2811_v30, %s3855_s25  ;;  %v2033_v13 = vld [vmem:[#allocation2 + $0x228] sm:$0xff] }
 0x199   : > { %3485 = vmatprep.mubr.msk.bf16.mxu0 %vm419_vm0, %v4594_v15 }
 0x19a   : > { %2680 = vrot.lane.b32.xlu0 %v2602_v35, %s3854_s23  ;;  %v2277_v31 = vpop.f32.mrb[8].mxu0 }
 0x19b   : > { %v4745_v32 = vadd.f32 %v2277_v31, %v4571_v39  ;;  %v2279_v17 = vpop.f32.mrb[9].mxu0 }
 0x19c   : > { %v2280_v7 = vpop.f32.mrb[10].mxu0 }
 0x19d   : > { %v4748_v28 = vadd.f32 %v2280_v7, %v4577_v6  ;;  %v2282_v36 = vpop.f32.mrb[11].mxu0  ;;  %v2603_v50 = vrot.slane %v4745_v32, 1  ;;  %v2812_v15 = vrot.slane %v4745_v32, 2 }
 0x19f   : > { %1949 = vmatmul.mubr.bf16.gmra.mrb[116].mxu1 %v4398_v12  ;;  %v2604_v1 = vrot.slane %v4748_v28, 1  ;;  %v2813_v42 = vrot.slane %v4748_v28, 2  ;;  %2479 = vmatmul.mubr.bf16.gmra.mrb[116].mxu0 %v4453_v62 }
 0x1a0   : > { %3419 = vmatprep.mubr.msk.bf16.mxu1 %vm419_vm0, %v4553_v25  ;;  %3486 = vmatprep.mubr.msk.bf16.mxu0 %vm419_vm0, %v2033_v13 }
 0x1a1   : > { %v2814_v39 = vsel %vm2806_vm3, %v2812_v15, %v2813_v42  ;;  %v2605_v6 = vsel %vm2597_vm2, %v2603_v50, %v2604_v1 }
 0x1a2   : > { %2891 = vrot.lane.b32.xlu0 %v2814_v39, %s3855_s25  ;;  %2682 = vrot.lane.b32.xlu1 %v2605_v6, %s3854_s23  ;;  %v2285_v12 = vpop.f32.mrb[12].mxu0 }
 0x1a3   : > { %v3526_v37 = vadd.f32 %v2285_v12, %v4592_v24  ;;  %v2287_v49 = vpop.f32.mrb[13].mxu0 }
 0x1a4   : > { %v2288_v19 = vpop.f32.mrb[14].mxu0 }
 0x1a5   : > { %v2606_v45 = vrot.slane %v3526_v37, 1  ;;  %v2289_v62 = vpop.f32.mrb[15].mxu0  ;;  %v2815_v25 = vrot.slane %v3526_v37, 2 }
 0x1a7   : > { %1956 = vmatmul.mubr.bf16.gmra.mrb[120].mxu1 %v4412_v20  ;;  %2486 = vmatmul.mubr.bf16.gmra.mrb[120].mxu0 %v4583_v23  ;;  %v2607_v2 = vsel %vm2597_vm2, %v2604_v1, %v2606_v45  ;;  %v2816_v57 = vsel %vm2806_vm3, %v2813_v42, %v2815_v25 }
 0x1a8   : > { %3420 = vmatprep.mubr.msk.bf16.mxu1 %vm419_vm0, %v4563_v58  ;;  %2684 = vrot.lane.b32.xlu1 %v2607_v2, %s3854_s23 }
 0x1a9   : > { %3487 = vmatprep.mubr.msk.bf16.mxu0 %vm419_vm0, %v2035_v51 }
 0x1aa   : > { %v2292_v24 = vpop.f32.mrb[16].mxu0 }
 0x1ab   : > { %v4772_v47 = vadd.f32 %v2292_v24, %v4605_v33  ;;  %v2294_v40 = vpop.f32.mrb[17].mxu0 }
 0x1ac   : > { %2893 = vrot.lane.b32.xlu1 %v2816_v57, %s3855_s25  ;;  %v2295_v20 = vpop.f32.mrb[18].mxu0 }
 0x1ad   : > { %v4777_v60 = vadd.f32 %v2295_v20, %v4607_v41  ;;  %v2297_v21 = vpop.f32.mrb[19].mxu0  ;;  %v2608_v58 = vrot.slane %v4772_v47, 1  ;;  %v2817_v16 = vrot.slane %v4772_v47, 2 }
 0x1af   : > { %1964 = vmatmul.mubr.bf16.gmra.mrb[124].mxu1 %v4426_v44  ;;  %v2609_v14 = vrot.slane %v4777_v60, 1  ;;  %2494 = vmatmul.mubr.bf16.gmra.mrb[124].mxu0 %v4583_v23  ;;  %v2818_v33 = vrot.slane %v4777_v60, 2 }
 0x1b1   : > { %v2610_v5 = vsel %vm2597_vm2, %v2608_v58, %v2609_v14  ;;  %v2819_v0 = vsel %vm2806_vm3, %v2817_v16, %v2818_v33 }
 0x1b2   : > { %2686 = vrot.lane.b32.xlu0 %v2610_v5, %s3854_s23  ;;  %v2300_v63 = vpop.f32.mrb[20].mxu0 }
 0x1b3   : > { %v3529_v41 = vadd.f32 %v2300_v63, %v4615_v4  ;;  %v2302_v18 = vpop.f32.mrb[21].mxu0 }
 0x1b4   : > { %v2303_v9 = vpop.f32.mrb[22].mxu0 }
 0x1b5   : > { %v2611_v44 = vrot.slane %v3529_v41, 1  ;;  %v2304_v26 = vpop.f32.mrb[23].mxu0  ;;  %v2820_v23 = vrot.slane %v3529_v41, 2 }
 0x1b6   : > { %2895 = vrot.lane.b32.xlu0 %v2819_v0, %s3855_s25 }
 0x1b7   : > { %v2612_v46 = vsel %vm2597_vm2, %v2609_v14, %v2611_v44  ;;  %v2821_v4 = vsel %vm2806_vm3, %v2818_v33, %v2820_v23 }
 0x1b8   : > { %2688 = vrot.lane.b32.xlu1 %v2612_v46, %s3854_s23 }
 0x1ba   : > { %v2307_v8 = vpop.f32.mrb[24].mxu0 }
 0x1bb   : > { %v4793_v30 = vadd.f32 %v2307_v8, %v4623_v59  ;;  %v2309_v35 = vpop.f32.mrb[25].mxu0 }
 0x1bc   : > { %2897 = vrot.lane.b32.xlu1 %v2821_v4, %s3855_s25  ;;  %v2310_v31 = vpop.f32.mrb[26].mxu0 }
 0x1bd   : > { %v4798_v17 = vadd.f32 %v2310_v31, %v4625_v27  ;;  %v2312_v7 = vpop.f32.mrb[27].mxu0  ;;  %v2613_v36 = vrot.slane %v4793_v30, 1  ;;  %v2822_v1 = vrot.slane %v4793_v30, 2 }
 0x1bf   : > { %v2614_v13 = vrot.slane %v4798_v17, 1  ;;  %v2823_v50 = vrot.slane %v4798_v17, 2 }
 0x1c1   : > { %v2615_v15 = vsel %vm2597_vm2, %v2613_v36, %v2614_v13  ;;  %v2824_v37 = vsel %vm2806_vm3, %v2822_v1, %v2823_v50 }
 0x1c2   : > { %2690 = vrot.lane.b32.xlu0 %v2615_v15, %s3854_s23  ;;  %v2315_v59 = vpop.f32.mrb[28].mxu0 }
 0x1c3   : > { %v3532_v42 = vadd.f32 %v2315_v59, %v4633_v48  ;;  %v2317_v39 = vpop.f32.mrb[29].mxu0 }
 0x1c4   : > { %v2318_v6 = vpop.f32.mrb[30].mxu0 }
 0x1c5   : > { %v2616_v27 = vrot.slane %v3532_v42, 1  ;;  %v2319_v12 = vpop.f32.mrb[31].mxu0  ;;  %v2825_v49 = vrot.slane %v3532_v42, 2 }
 0x1c6   : > { %2899 = vrot.lane.b32.xlu0 %v2824_v37, %s3855_s25 }
 0x1c7   : > { %v2617_v19 = vsel %vm2597_vm2, %v2614_v13, %v2616_v27  ;;  %v2826_v48 = vsel %vm2806_vm3, %v2823_v50, %v2825_v49 }
 0x1c8   : > { %2692 = vrot.lane.b32.xlu1 %v2617_v19, %s3854_s23 }
 0x1ca   : > { %v2322_v45 = vpop.f32.mrb[32].mxu0 }
 0x1cb   : > { %v4812_v62 = vadd.f32 %v2322_v45, %v4641_v53  ;;  %v2324_v51 = vpop.f32.mrb[33].mxu0 }
 0x1cc   : > { %2901 = vrot.lane.b32.xlu1 %v2826_v48, %s3855_s25  ;;  %v2325_v25 = vpop.f32.mrb[34].mxu0 }
 0x1cd   : > { %v4817_v2 = vadd.f32 %v2325_v25, %v4643_v52  ;;  %v2327_v24 = vpop.f32.mrb[35].mxu0  ;;  %v2618_v40 = vrot.slane %v4812_v62, 1  ;;  %v2827_v58 = vrot.slane %v4812_v62, 2 }
 0x1cf   : > { %v2619_v57 = vrot.slane %v4817_v2, 1  ;;  %v2828_v20 = vrot.slane %v4817_v2, 2 }
 0x1d1   : > { %v2620_v21 = vsel %vm2597_vm2, %v2618_v40, %v2619_v57  ;;  %v2829_v16 = vsel %vm2806_vm3, %v2827_v58, %v2828_v20 }
 0x1d2   : > { %2694 = vrot.lane.b32.xlu0 %v2620_v21, %s3854_s23  ;;  %v2330_v53 = vpop.f32.mrb[36].mxu0 }
 0x1d3   : > { %v3535_v14 = vadd.f32 %v2330_v53, %v4651_v61  ;;  %v2332_v33 = vpop.f32.mrb[37].mxu0 }
 0x1d4   : > { %v2333_v5 = vpop.f32.mrb[38].mxu0 }
 0x1d5   : > { %v2621_v52 = vrot.slane %v3535_v14, 1  ;;  %v2334_v63 = vpop.f32.mrb[39].mxu0  ;;  %v2830_v41 = vrot.slane %v3535_v14, 2 }
 0x1d6   : > { %2903 = vrot.lane.b32.xlu0 %v2829_v16, %s3855_s25 }
 0x1d7   : > { %v2622_v18 = vsel %vm2597_vm2, %v2619_v57, %v2621_v52  ;;  %v2831_v61 = vsel %vm2806_vm3, %v2828_v20, %v2830_v41 }
 0x1d8   : > { %2696 = vrot.lane.b32.xlu1 %v2622_v18, %s3854_s23 }
 0x1da   : > { %v2337_v9 = vpop.f32.mrb[40].mxu0 }
 0x1db   : > { %v4831_v44 = vadd.f32 %v2337_v9, %v4659_v3  ;;  %v2339_v26 = vpop.f32.mrb[41].mxu0 }
 0x1dc   : > { %2905 = vrot.lane.b32.xlu1 %v2831_v61, %s3855_s25  ;;  %v2340_v0 = vpop.f32.mrb[42].mxu0 }
 0x1dd   : > { %v4836_v23 = vadd.f32 %v2340_v0, %v4661_v10  ;;  %v2342_v46 = vpop.f32.mrb[43].mxu0  ;;  %v2623_v8 = vrot.slane %v4831_v44, 1  ;;  %v2832_v7 = vrot.slane %v4831_v44, 2 }
 0x1df   : > { %v2624_v35 = vrot.slane %v4836_v23, 1  ;;  %v2833_v4 = vrot.slane %v4836_v23, 2 }
 0x1e1   : > { %v2625_v31 = vsel %vm2597_vm2, %v2623_v8, %v2624_v35  ;;  %v2834_v59 = vsel %vm2806_vm3, %v2832_v7, %v2833_v4 }
 0x1e2   : > { %2698 = vrot.lane.b32.xlu0 %v2625_v31, %s3854_s23  ;;  %v2345_v3 = vpop.f32.mrb[44].mxu0 }
 0x1e3   : > { %v3538_v36 = vadd.f32 %v2345_v3, %v4669_v11  ;;  %v2347_v13 = vpop.f32.mrb[45].mxu0 }
 0x1e4   : > { %v2348_v50 = vpop.f32.mrb[46].mxu0  ;;  %v4891_v13 = vld [vmem:[%s5169_s4] ss:$0 sm:$0xff] }
 0x1e5   : > { %v2626_v10 = vrot.slane %v3538_v36, 1  ;;  %v2349_v15 = vpop.f32.mrb[47].mxu0  ;;  %v2835_v1 = vrot.slane %v3538_v36, 2 }
 0x1e6   : > { %2907 = vrot.lane.b32.xlu0 %v2834_v59, %s3855_s25 }
 0x1e7   : > { %v2627_v42 = vsel %vm2597_vm2, %v2624_v35, %v2626_v10  ;;  %v2836_v11 = vsel %vm2806_vm3, %v2833_v4, %v2835_v1 }
 0x1e8   : > { %2700 = vrot.lane.b32.xlu1 %v2627_v42, %s3854_s23 }
 0x1ea   : > { %v2352_v39 = vpop.f32.mrb[48].mxu0 }
 0x1eb   : > { %v4850_v6 = vadd.f32 %v2352_v39, %v4677_v22  ;;  %v2354_v27 = vpop.f32.mrb[49].mxu0 }
 0x1ec   : > { %2909 = vrot.lane.b32.xlu1 %v2836_v11, %s3855_s25  ;;  %v2355_v12 = vpop.f32.mrb[50].mxu0 }
 0x1ed   : > { %v4855_v37 = vadd.f32 %v2355_v12, %v4679_v38  ;;  %v2357_v49 = vpop.f32.mrb[51].mxu0  ;;  %v2628_v19 = vrot.slane %v4850_v6, 1  ;;  %v2837_v25 = vrot.slane %v4850_v6, 2 }
 0x1ef   : > { %v2629_v45 = vrot.slane %v4855_v37, 1  ;;  %v2838_v51 = vrot.slane %v4855_v37, 2 }
 0x1f1   : > { %v2630_v48 = vsel %vm2597_vm2, %v2628_v19, %v2629_v45  ;;  %v2839_v21 = vsel %vm2806_vm3, %v2837_v25, %v2838_v51 }
 0x1f2   : > { %2702 = vrot.lane.b32.xlu0 %v2630_v48, %s3854_s23  ;;  %v2360_v22 = vpop.f32.mrb[52].mxu0 }
 0x1f3   : > { %v3541_v24 = vadd.f32 %v2360_v22, %v4687_v29  ;;  %v2362_v40 = vpop.f32.mrb[53].mxu0 }
 0x1f4   : > { %v2363_v57 = vpop.f32.mrb[54].mxu0 }
 0x1f5   : > { %v2631_v38 = vrot.slane %v3541_v24, 1  ;;  %v2364_v20 = vpop.f32.mrb[55].mxu0  ;;  %v2840_v53 = vrot.slane %v3541_v24, 2 }
 0x1f6   : > { %2911 = vrot.lane.b32.xlu0 %v2839_v21, %s3855_s25 }
 0x1f7   : > { %v2632_v58 = vsel %vm2597_vm2, %v2629_v45, %v2631_v38  ;;  %v2841_v29 = vsel %vm2806_vm3, %v2838_v51, %v2840_v53 }
 0x1f8   : > { %2704 = vrot.lane.b32.xlu1 %v2632_v58, %s3854_s23 }
 0x1fa   : > { %v2367_v14 = vpop.f32.mrb[56].mxu0 }
 0x1fb   : > { %v4869_v33 = vadd.f32 %v2367_v14, %v4695_v34  ;;  %v2369_v5 = vpop.f32.mrb[57].mxu0 }
 0x1fc   : > { %2913 = vrot.lane.b32.xlu1 %v2841_v29, %s3855_s25  ;;  %v2370_v52 = vpop.f32.mrb[58].mxu0 }
 0x1fd   : > { %v4874_v63 = vadd.f32 %v2370_v52, %v4697_v56  ;;  %v2372_v16 = vpop.f32.mrb[59].mxu0  ;;  %v2633_v41 = vrot.slane %v4869_v33, 1  ;;  %v2842_v61 = vrot.slane %v4869_v33, 2 }
 0x1ff   : > { %v2634_v18 = vrot.slane %v4874_v63, 1  ;;  %v2843_v9 = vrot.slane %v4874_v63, 2 }
 0x201   : > { %v2635_v34 = vsel %vm2597_vm2, %v2633_v41, %v2634_v18  ;;  %v2844_v31 = vsel %vm2806_vm3, %v2842_v61, %v2843_v9 }
 0x202   : > { %2706 = vrot.lane.b32.xlu0 %v2635_v34, %s3854_s23  ;;  %v2375_v26 = vpop.f32.mrb[60].mxu0 }
 0x203   : > { %v3544_v0 = vadd.f32 %v2375_v26, %v4705_v43  ;;  %v2377_v46 = vpop.f32.mrb[61].mxu0 }
 0x204   : > { %v2679_v56 = vpop.permute.xlu0 %2678  ;;  %v2378_v8 = vpop.f32.mrb[62].mxu0 }
 0x205   : > { %v2636_v35 = vrot.slane %v3544_v0, 1  ;;  %v2379_v4 = vpop.f32.mrb[63].mxu0  ;;  %v2845_v3 = vrot.slane %v3544_v0, 2  ;;  %v2774_v7 = vadd.f32 %v4714_v55, %v2679_v56 }
 0x206   : > { %2915 = vrot.lane.b32.xlu0 %v2844_v31, %s3855_s25 }
 0x207   : > { %v2637_v36 = vsel %vm2597_vm2, %v2634_v18, %v2636_v35  ;;  %v2846_v39 = vsel %vm2806_vm3, %v2843_v9, %v2845_v3 }
 0x208   : > { %v2888_v43 = vpop.permute.xlu0 %2887  ;;  %2708 = vrot.lane.b32.xlu1 %v2637_v36, %s3854_s23 }
 0x209   : > { %v2983_v50 = vadd.f32 %v2888_v43, %v2774_v7 }
 0x20a   : > { %v1852_v10 = vpop.f32.mrb[64].mxu1  ;;  %v2382_v55 = vpop.f32.mrb[64].mxu0 }
 0x20b   : > { %v3022_v15 = vadd.f32 %v4891_v13, %v2983_v50  ;;  %v4900_v59 = vadd.f32 %v2382_v55, %v1852_v10  ;;  %v1854_v1 = vpop.f32.mrb[65].mxu1  ;;  %v2384_v42 = vpop.f32.mrb[65].mxu0 }
 0x20c   : > { %v1855_v27 = vpop.f32.mrb[66].mxu1  ;;  %v2681_v11 = vpop.permute.xlu0 %2680  ;;  %2917 = vrot.lane.b32.xlu1 %v2846_v39, %s3855_s25 }
 0x20d   : > { %3055 = vst.msk [vmem:[%s4897_s7] sm:$0xff] %vm3054_vm4, %v3022_v15  ;;  %v2775_v12 = vadd.f32 %v4717_v54, %v2681_v11  ;;  %v2385_v49 = vpop.f32.mrb[66].mxu0  ;;  %v1857_v19 = vpop.f32.mrb[67].mxu1  ;;  %v2638_v25 = vrot.slane %v4900_v59, 1  ;;  %v2847_v5 = vrot.slane %v4900_v59, 2 }
 0x20e   : > { %v2890_v45 = vpop.permute.xlu1 %2889  ;;  %v4907_v51 = vadd.f32 %v2385_v49, %v1855_v27  ;;  %v2387_v48 = vpop.f32.mrb[67].mxu0 }
 0x20f   : > { %v2984_v22 = vadd.f32 %v2890_v45, %v2775_v12 }
 0x210   : > { %v2639_v24 = vrot.slane %v4907_v51, 1  ;;  %v2848_v38 = vrot.slane %v4907_v51, 2 }
 0x211   : > { %v3023_v40 = vadd.f32 %v4891_v13, %v2984_v22 }
 0x212   : > { %v1860_v57 = vpop.f32.mrb[68].mxu1  ;;  %v2640_v20 = vsel %vm2597_vm2, %v2638_v25, %v2639_v24  ;;  %v2390_v21 = vpop.f32.mrb[68].mxu0  ;;  %v2849_v26 = vsel %vm2806_vm3, %v2847_v5, %v2848_v38 }
 0x213   : > { %v1862_v54 = vpop.f32.mrb[69].mxu1  ;;  %3056 = vst.msk [vmem:[%s4897_s7 + $0x8] sm:$0xff] %vm3054_vm4, %v3023_v40  ;;  %2710 = vrot.lane.b32.xlu0 %v2640_v20, %s3854_s23  ;;  %v3547_v53 = vadd.f32 %v2390_v21, %v1860_v57  ;;  %v2392_v58 = vpop.f32.mrb[69].mxu0 }
 0x214   : > { %v1863_v14 = vpop.f32.mrb[70].mxu1  ;;  %v2683_v29 = vpop.permute.xlu1 %2682 }
 0x215   : > { %v2641_v52 = vrot.slane %v3547_v53, 1  ;;  %v2776_v16 = vadd.f32 %v4745_v32, %v2683_v29  ;;  %v2393_v41 = vpop.f32.mrb[70].mxu0  ;;  %v1864_v18 = vpop.f32.mrb[71].mxu1  ;;  %v2850_v61 = vrot.slane %v3547_v53, 2 }
 0x216   : > { %v2892_v9 = vpop.permute.xlu0 %2891  ;;  %v2394_v34 = vpop.f32.mrb[71].mxu0 }
 0x217   : > { %v2985_v0 = vadd.f32 %v2892_v9, %v2776_v16  ;;  %2919 = vrot.lane.b32.xlu0 %v2849_v26, %s3855_s25  ;;  %v2642_v46 = vsel %vm2597_vm2, %v2639_v24, %v2641_v52  ;;  %v2851_v7 = vsel %vm2806_vm3, %v2848_v38, %v2850_v61 }
 0x218   : > { %2712 = vrot.lane.b32.xlu1 %v2642_v46, %s3854_s23 }
 0x219   : > { %v3024_v56 = vadd.f32 %v4891_v13, %v2985_v0 }
 0x21a   : > { %v1867_v8 = vpop.f32.mrb[72].mxu1  ;;  %v2685_v35 = vpop.permute.xlu1 %2684 }
 0x21b   : > { %v2397_v4 = vpop.f32.mrb[72].mxu0  ;;  %3057 = vst.msk [vmem:[%s4897_s7 + $0x10] sm:$0xff] %vm3054_vm4, %v3024_v56  ;;  %v1869_v31 = vpop.f32.mrb[73].mxu1  ;;  %v2777_v50 = vadd.f32 %v4748_v28, %v2685_v35 }
 0x21c   : > { %v4926_v32 = vadd.f32 %v2397_v4, %v1867_v8  ;;  %v2399_v3 = vpop.f32.mrb[73].mxu0  ;;  %v1870_v36 = vpop.f32.mrb[74].mxu1  ;;  %2921 = vrot.lane.b32.xlu1 %v2851_v7, %s3855_s25 }
 0x21d   : > { %v2400_v43 = vpop.f32.mrb[74].mxu0  ;;  %v1872_v55 = vpop.f32.mrb[75].mxu1 }
 0x21e   : > { %v4931_v10 = vadd.f32 %v2400_v43, %v1870_v36  ;;  %v2402_v15 = vpop.f32.mrb[75].mxu0  ;;  %v2894_v1 = vpop.permute.xlu1 %2893  ;;  %v2643_v42 = vrot.slane %v4926_v32, 1  ;;  %v2852_v48 = vrot.slane %v4926_v32, 2 }
 0x21f   : > { %v2986_v27 = vadd.f32 %v2894_v1, %v2777_v50 }
 0x220   : > { %v2644_v39 = vrot.slane %v4931_v10, 1  ;;  %v2853_v11 = vrot.slane %v4931_v10, 2 }
 0x221   : > { %v3025_v12 = vadd.f32 %v4891_v13, %v2986_v27 }
 0x222   : > { %v1875_v49 = vpop.f32.mrb[76].mxu1  ;;  %v2645_v19 = vsel %vm2597_vm2, %v2643_v42, %v2644_v39  ;;  %v2405_v28 = vpop.f32.mrb[76].mxu0  ;;  %v2854_v54 = vsel %vm2806_vm3, %v2852_v48, %v2853_v11 }
 0x223   : > { %2714 = vrot.lane.b32.xlu0 %v2645_v19, %s3854_s23  ;;  %v1877_v45 = vpop.f32.mrb[77].mxu1  ;;  %3058 = vst.msk [vmem:[%s4897_s7 + $0x18] sm:$0xff] %vm3054_vm4, %v3025_v12  ;;  %v3550_v22 = vadd.f32 %v2405_v28, %v1875_v49  ;;  %v2407_v25 = vpop.f32.mrb[77].mxu0 }
 0x224   : > { %v1878_v24 = vpop.f32.mrb[78].mxu1  ;;  %v2687_v40 = vpop.permute.xlu0 %2686 }
 0x225   : > { %v2408_v57 = vpop.f32.mrb[78].mxu0  ;;  %v2646_v38 = vrot.slane %v3550_v22, 1  ;;  %v1879_v20 = vpop.f32.mrb[79].mxu1  ;;  %v2855_v53 = vrot.slane %v3550_v22, 2  ;;  %v2778_v58 = vadd.f32 %v4772_v47, %v2687_v40 }
 0x226   : > { %v2409_v21 = vpop.f32.mrb[79].mxu0 }
 0x227   : > { %2923 = vrot.lane.b32.xlu0 %v2854_v54, %s3855_s25  ;;  %v2647_v14 = vsel %vm2597_vm2, %v2644_v39, %v2646_v38  ;;  %v2856_v61 = vsel %vm2806_vm3, %v2853_v11, %v2855_v53 }
 0x228   : > { %v2896_v5 = vpop.permute.xlu0 %2895  ;;  %2716 = vrot.lane.b32.xlu1 %v2647_v14, %s3854_s23 }
 0x229   : > { %v2987_v29 = vadd.f32 %v2896_v5, %v2778_v58 }
 0x22a   : > { %v1882_v52 = vpop.f32.mrb[80].mxu1  ;;  %v2689_v16 = vpop.permute.xlu1 %2688 }
 0x22b   : > { %v2412_v41 = vpop.f32.mrb[80].mxu0  ;;  %v3026_v18 = vadd.f32 %v4891_v13, %v2987_v29  ;;  %v1884_v34 = vpop.f32.mrb[81].mxu1  ;;  %v2779_v46 = vadd.f32 %v4777_v60, %v2689_v16 }
 0x22c   : > { %v4948_v9 = vadd.f32 %v2412_v41, %v1882_v52  ;;  %v2414_v26 = vpop.f32.mrb[81].mxu0  ;;  %v1885_v0 = vpop.f32.mrb[82].mxu1  ;;  %2925 = vrot.lane.b32.xlu1 %v2856_v61, %s3855_s25 }
 0x22d   : > { %v2415_v47 = vpop.f32.mrb[82].mxu0  ;;  %3059 = vst.msk [vmem:[%s4897_s7 + $0x20] sm:$0xff] %vm3054_vm4, %v3026_v18  ;;  %v1887_v8 = vpop.f32.mrb[83].mxu1 }
 0x22e   : > { %v4955_v56 = vadd.f32 %v2415_v47, %v1885_v0  ;;  %v2417_v35 = vpop.f32.mrb[83].mxu0  ;;  %v2898_v4 = vpop.permute.xlu1 %2897  ;;  %v2648_v31 = vrot.slane %v4948_v9, 1  ;;  %v2857_v1 = vrot.slane %v4948_v9, 2 }
 0x22f   : > { %v2988_v7 = vadd.f32 %v2898_v4, %v2779_v46 }
 0x230   : > { %v2649_v3 = vrot.slane %v4955_v56, 1  ;;  %v2858_v36 = vrot.slane %v4955_v56, 2 }
 0x231   : > { %v3027_v43 = vadd.f32 %v4891_v13, %v2988_v7 }
 0x232   : > { %v1890_v50 = vpop.f32.mrb[84].mxu1  ;;  %v2650_v55 = vsel %vm2597_vm2, %v2648_v31, %v2649_v3  ;;  %v2420_v60 = vpop.f32.mrb[84].mxu0  ;;  %v2859_v45 = vsel %vm2806_vm3, %v2857_v1, %v2858_v36 }
 0x233   : > { %2718 = vrot.lane.b32.xlu0 %v2650_v55, %s3854_s23  ;;  %v1892_v15 = vpop.f32.mrb[85].mxu1  ;;  %3060 = vst.msk [vmem:[%s4897_s7 + $0x28] sm:$0xff] %vm3054_vm4, %v3027_v43  ;;  %v3553_v42 = vadd.f32 %v2420_v60, %v1890_v50  ;;  %v2422_v39 = vpop.f32.mrb[85].mxu0 }
 0x234   : > { %v1893_v27 = vpop.f32.mrb[86].mxu1  ;;  %v2691_v11 = vpop.permute.xlu0 %2690 }
 0x235   : > { %v2423_v12 = vpop.f32.mrb[86].mxu0  ;;  %v2651_v49 = vrot.slane %v3553_v42, 1  ;;  %v1894_v19 = vpop.f32.mrb[87].mxu1  ;;  %v2860_v48 = vrot.slane %v3553_v42, 2  ;;  %v2780_v22 = vadd.f32 %v4793_v30, %v2691_v11 }
 0x236   : > { %v2424_v28 = vpop.f32.mrb[87].mxu0 }
 0x237   : > { %2927 = vrot.lane.b32.xlu0 %v2859_v45, %s3855_s25  ;;  %v2652_v25 = vsel %vm2597_vm2, %v2649_v3, %v2651_v49  ;;  %v2861_v14 = vsel %vm2806_vm3, %v2858_v36, %v2860_v48 }
 0x238   : > { %v2900_v24 = vpop.permute.xlu0 %2899  ;;  %2720 = vrot.lane.b32.xlu1 %v2652_v25, %s3854_s23 }
 0x239   : > { %v2989_v40 = vadd.f32 %v2900_v24, %v2780_v22 }
 0x23a   : > { %v1897_v57 = vpop.f32.mrb[88].mxu1  ;;  %v2693_v38 = vpop.permute.xlu1 %2692 }
 0x23b   : > { %v2427_v20 = vpop.f32.mrb[88].mxu0  ;;  %v3028_v21 = vadd.f32 %v4891_v13, %v2989_v40  ;;  %v1899_v53 = vpop.f32.mrb[89].mxu1  ;;  %v2781_v29 = vadd.f32 %v4798_v17, %v2693_v38 }
 0x23c   : > { %v4972_v54 = vadd.f32 %v2427_v20, %v1897_v57  ;;  %v2429_v58 = vpop.f32.mrb[89].mxu0  ;;  %v1900_v5 = vpop.f32.mrb[90].mxu1  ;;  %2929 = vrot.lane.b32.xlu1 %v2861_v14, %s3855_s25 }
 0x23d   : > { %v2430_v30 = vpop.f32.mrb[90].mxu0  ;;  %3061 = vst.msk [vmem:[%s4897_s7 + $0x30] sm:$0xff] %vm3054_vm4, %v3028_v21  ;;  %v1902_v16 = vpop.f32.mrb[91].mxu1 }
 0x23e   : > { %v4979_v52 = vadd.f32 %v2430_v30, %v1900_v5  ;;  %v2432_v41 = vpop.f32.mrb[91].mxu0  ;;  %v2902_v18 = vpop.permute.xlu1 %2901  ;;  %v2653_v34 = vrot.slane %v4972_v54, 1  ;;  %v2862_v4 = vrot.slane %v4972_v54, 2 }
 0x23f   : > { %v2990_v61 = vadd.f32 %v2902_v18, %v2781_v29 }
 0x240   : > { %v2654_v26 = vrot.slane %v4979_v52, 1  ;;  %v2863_v0 = vrot.slane %v4979_v52, 2 }
 0x241   : > { %v3029_v47 = vadd.f32 %v4891_v13, %v2990_v61 }
 0x242   : > { %v1905_v46 = vpop.f32.mrb[92].mxu1  ;;  %v2655_v8 = vsel %vm2597_vm2, %v2653_v34, %v2654_v26  ;;  %v2435_v17 = vpop.f32.mrb[92].mxu0  ;;  %v2864_v15 = vsel %vm2806_vm3, %v2862_v4, %v2863_v0 }
 0x243   : > { %2722 = vrot.lane.b32.xlu0 %v2655_v8, %s3854_s23  ;;  %v1907_v35 = vpop.f32.mrb[93].mxu1  ;;  %3062 = vst.msk [vmem:[%s4897_s7 + $0x38] sm:$0xff] %vm3054_vm4, %v3029_v47  ;;  %v3556_v31 = vadd.f32 %v2435_v17, %v1905_v46  ;;  %v2437_v3 = vpop.f32.mrb[93].mxu0 }
 0x244   : > { %v1908_v7 = vpop.f32.mrb[94].mxu1  ;;  %v2695_v36 = vpop.permute.xlu0 %2694 }
 0x245   : > { %v2438_v43 = vpop.f32.mrb[94].mxu0  ;;  %v2656_v50 = vrot.slane %v3556_v31, 1  ;;  %v1909_v55 = vpop.f32.mrb[95].mxu1  ;;  %v2865_v1 = vrot.slane %v3556_v31, 2  ;;  %v2782_v42 = vadd.f32 %v4812_v62, %v2695_v36 }
 0x246   : > { %v2439_v60 = vpop.f32.mrb[95].mxu0 }
 0x247   : > { %2931 = vrot.lane.b32.xlu0 %v2864_v15, %s3855_s25  ;;  %v2657_v39 = vsel %vm2597_vm2, %v2654_v26, %v2656_v50  ;;  %v2866_v25 = vsel %vm2806_vm3, %v2863_v0, %v2865_v1 }
 0x248   : > { %v2904_v27 = vpop.permute.xlu0 %2903  ;;  %2724 = vrot.lane.b32.xlu1 %v2657_v39, %s3854_s23 }
 0x249   : > { %v2991_v11 = vadd.f32 %v2904_v27, %v2782_v42 }
 0x24a   : > { %v1912_v12 = vpop.f32.mrb[96].mxu1  ;;  %v2697_v49 = vpop.permute.xlu1 %2696 }
 0x24b   : > { %v2442_v19 = vpop.f32.mrb[96].mxu0  ;;  %v3030_v28 = vadd.f32 %v4891_v13, %v2991_v11  ;;  %v1914_v48 = vpop.f32.mrb[97].mxu1  ;;  %v2783_v40 = vadd.f32 %v4817_v2, %v2697_v49 }
 0x24c   : > { %v4996_v45 = vadd.f32 %v2442_v19, %v1912_v12  ;;  %v2444_v22 = vpop.f32.mrb[97].mxu0  ;;  %v1915_v24 = vpop.f32.mrb[98].mxu1  ;;  %2933 = vrot.lane.b32.xlu1 %v2866_v25, %s3855_s25 }
 0x24d   : > { %v2445_v62 = vpop.f32.mrb[98].mxu0  ;;  %3063 = vst.msk [vmem:[%s4897_s7 + $0x40] sm:$0xff] %vm3054_vm4, %v3030_v28  ;;  %v1917_v38 = vpop.f32.mrb[99].mxu1 }
 0x24e   : > { %v5003_v57 = vadd.f32 %v2445_v62, %v1915_v24  ;;  %v2447_v20 = vpop.f32.mrb[99].mxu0  ;;  %v2906_v21 = vpop.permute.xlu1 %2905  ;;  %v2658_v53 = vrot.slane %v4996_v45, 1  ;;  %v2867_v18 = vrot.slane %v4996_v45, 2 }
 0x24f   : > { %v2992_v14 = vadd.f32 %v2906_v21, %v2783_v40 }
 0x250   : > { %v2659_v58 = vrot.slane %v5003_v57, 1  ;;  %v2868_v5 = vrot.slane %v5003_v57, 2 }
 0x251   : > { %v3031_v30 = vadd.f32 %v4891_v13, %v2992_v14 }
 0x252   : > { %v1920_v29 = vpop.f32.mrb[100].mxu1  ;;  %v2660_v16 = vsel %vm2597_vm2, %v2658_v53, %v2659_v58  ;;  %v2450_v2 = vpop.f32.mrb[100].mxu0  ;;  %v2869_v35 = vsel %vm2806_vm3, %v2867_v18, %v2868_v5 }
 0x253   : > { %2726 = vrot.lane.b32.xlu0 %v2660_v16, %s3854_s23  ;;  %v1922_v41 = vpop.f32.mrb[101].mxu1  ;;  %3064 = vst.msk [vmem:[%s4897_s7 + $0x48] sm:$0xff] %vm3054_vm4, %v3031_v30  ;;  %v3559_v34 = vadd.f32 %v2450_v2, %v1920_v29  ;;  %v2452_v26 = vpop.f32.mrb[101].mxu0 }
 0x254   : > { %v1923_v61 = vpop.f32.mrb[102].mxu1  ;;  %v2699_v0 = vpop.permute.xlu0 %2698 }
 0x255   : > { %v2453_v47 = vpop.f32.mrb[102].mxu0  ;;  %v2661_v46 = vrot.slane %v3559_v34, 1  ;;  %v1924_v8 = vpop.f32.mrb[103].mxu1  ;;  %v2870_v4 = vrot.slane %v3559_v34, 2  ;;  %v2784_v31 = vadd.f32 %v4831_v44, %v2699_v0 }
 0x256   : > { %v2454_v17 = vpop.f32.mrb[103].mxu0 }
 0x257   : > { %2935 = vrot.lane.b32.xlu0 %v2869_v35, %s3855_s25  ;;  %v2662_v3 = vsel %vm2597_vm2, %v2659_v58, %v2661_v46  ;;  %v2871_v39 = vsel %vm2806_vm3, %v2868_v5, %v2870_v4 }
 0x258   : > { %v2908_v7 = vpop.permute.xlu0 %2907  ;;  %2728 = vrot.lane.b32.xlu1 %v2662_v3, %s3854_s23 }
 0x259   : > { %v2993_v36 = vadd.f32 %v2908_v7, %v2784_v31 }
 0x25a   : > { %v1927_v43 = vpop.f32.mrb[104].mxu1  ;;  %v2701_v50 = vpop.permute.xlu1 %2700 }
 0x25b   : > { %v2457_v55 = vpop.f32.mrb[104].mxu0  ;;  %v3032_v60 = vadd.f32 %v4891_v13, %v2993_v36  ;;  %v1929_v1 = vpop.f32.mrb[105].mxu1  ;;  %v2785_v11 = vadd.f32 %v4836_v23, %v2701_v50 }
 0x25c   : > { %v5020_v15 = vadd.f32 %v2457_v55, %v1927_v43  ;;  %v2459_v42 = vpop.f32.mrb[105].mxu0  ;;  %v1930_v27 = vpop.f32.mrb[106].mxu1  ;;  %2937 = vrot.lane.b32.xlu1 %v2871_v39, %s3855_s25 }
 0x25d   : > { %v2460_v44 = vpop.f32.mrb[106].mxu0  ;;  %3065 = vst.msk [vmem:[%s4897_s7 + $0x50] sm:$0xff] %vm3054_vm4, %v3032_v60  ;;  %v1932_v49 = vpop.f32.mrb[107].mxu1 }
 0x25e   : > { %v5027_v12 = vadd.f32 %v2460_v44, %v1930_v27  ;;  %v2462_v19 = vpop.f32.mrb[107].mxu0  ;;  %v2910_v28 = vpop.permute.xlu1 %2909  ;;  %v2663_v48 = vrot.slane %v5020_v15, 1  ;;  %v2872_v21 = vrot.slane %v5020_v15, 2 }
 0x25f   : > { %v2994_v25 = vadd.f32 %v2910_v28, %v2785_v11 }
 0x260   : > { %v2664_v22 = vrot.slane %v5027_v12, 1  ;;  %v2873_v24 = vrot.slane %v5027_v12, 2 }
 0x261   : > { %v3033_v62 = vadd.f32 %v4891_v13, %v2994_v25 }
 0x262   : > { %v1935_v40 = vpop.f32.mrb[108].mxu1  ;;  %v2665_v38 = vsel %vm2597_vm2, %v2663_v48, %v2664_v22  ;;  %v2465_v23 = vpop.f32.mrb[108].mxu0  ;;  %v2874_v41 = vsel %vm2806_vm3, %v2872_v21, %v2873_v24 }
 0x263   : > { %2730 = vrot.lane.b32.xlu0 %v2665_v38, %s3854_s23  ;;  %v1937_v20 = vpop.f32.mrb[109].mxu1  ;;  %3066 = vst.msk [vmem:[%s4897_s7 + $0x58] sm:$0xff] %vm3054_vm4, %v3033_v62  ;;  %v3562_v53 = vadd.f32 %v2465_v23, %v1935_v40  ;;  %v2467_v58 = vpop.f32.mrb[109].mxu0 }
 0x264   : > { %v1938_v14 = vpop.f32.mrb[110].mxu1  ;;  %v2703_v5 = vpop.permute.xlu0 %2702 }
 0x265   : > { %v2468_v30 = vpop.f32.mrb[110].mxu0  ;;  %v2666_v29 = vrot.slane %v3562_v53, 1  ;;  %v1939_v16 = vpop.f32.mrb[111].mxu1  ;;  %v2875_v18 = vrot.slane %v3562_v53, 2  ;;  %v2786_v34 = vadd.f32 %v4850_v6, %v2703_v5 }
 0x266   : > { %v2469_v2 = vpop.f32.mrb[111].mxu0 }
 0x267   : > { %2939 = vrot.lane.b32.xlu0 %v2874_v41, %s3855_s25  ;;  %v2667_v26 = vsel %vm2597_vm2, %v2664_v22, %v2666_v29  ;;  %v2876_v3 = vsel %vm2806_vm3, %v2873_v24, %v2875_v18 }
 0x268   : > { %v2912_v61 = vpop.permute.xlu0 %2911  ;;  %2732 = vrot.lane.b32.xlu1 %v2667_v26, %s3854_s23 }
 0x269   : > { %v2995_v0 = vadd.f32 %v2912_v61, %v2786_v34 }
 0x26a   : > { %v1942_v47 = vpop.f32.mrb[112].mxu1  ;;  %v2705_v46 = vpop.permute.xlu1 %2704 }
 0x26b   : > { %v2472_v8 = vpop.f32.mrb[112].mxu0  ;;  %v3034_v17 = vadd.f32 %v4891_v13, %v2995_v0  ;;  %v1944_v4 = vpop.f32.mrb[113].mxu1  ;;  %v2787_v36 = vadd.f32 %v4855_v37, %v2705_v46 }
 0x26c   : > { %v5044_v35 = vadd.f32 %v2472_v8, %v1942_v47  ;;  %v2474_v31 = vpop.f32.mrb[113].mxu0  ;;  %v1945_v7 = vpop.f32.mrb[114].mxu1  ;;  %2941 = vrot.lane.b32.xlu1 %v2876_v3, %s3855_s25 }
 0x26d   : > { %v2475_v6 = vpop.f32.mrb[114].mxu0  ;;  %3067 = vst.msk [vmem:[%s4897_s7 + $0x60] sm:$0xff] %vm3054_vm4, %v3034_v17  ;;  %v1947_v50 = vpop.f32.mrb[115].mxu1 }
 0x26e   : > { %v5051_v43 = vadd.f32 %v2475_v6, %v1945_v7  ;;  %v2477_v55 = vpop.f32.mrb[115].mxu0  ;;  %v2914_v60 = vpop.permute.xlu1 %2913  ;;  %v2668_v1 = vrot.slane %v5044_v35, 1  ;;  %v2877_v28 = vrot.slane %v5044_v35, 2 }
 0x26f   : > { %v2996_v39 = vadd.f32 %v2914_v60, %v2787_v36 }
 0x270   : > { %v2669_v42 = vrot.slane %v5051_v43, 1  ;;  %v2878_v27 = vrot.slane %v5051_v43, 2 }
 0x271   : > { %v3035_v44 = vadd.f32 %v4891_v13, %v2996_v39 }
 0x272   : > { %v1950_v11 = vpop.f32.mrb[116].mxu1  ;;  %v2670_v49 = vsel %vm2597_vm2, %v2668_v1, %v2669_v42  ;;  %v2480_v37 = vpop.f32.mrb[116].mxu0  ;;  %v2879_v20 = vsel %vm2806_vm3, %v2877_v28, %v2878_v27 }
 0x273   : > { %2734 = vrot.lane.b32.xlu0 %v2670_v49, %s3854_s23  ;;  %v1952_v19 = vpop.f32.mrb[117].mxu1  ;;  %3068 = vst.msk [vmem:[%s4897_s7 + $0x68] sm:$0xff] %vm3054_vm4, %v3035_v44  ;;  %v3565_v48 = vadd.f32 %v2480_v37, %v1950_v11  ;;  %v2482_v22 = vpop.f32.mrb[117].mxu0 }
 0x274   : > { %v1953_v25 = vpop.f32.mrb[118].mxu1  ;;  %v2707_v24 = vpop.permute.xlu0 %2706 }
 0x275   : > { %v2483_v62 = vpop.f32.mrb[118].mxu0  ;;  %v2671_v40 = vrot.slane %v3565_v48, 1  ;;  %v1954_v38 = vpop.f32.mrb[119].mxu1  ;;  %v2880_v21 = vrot.slane %v3565_v48, 2  ;;  %v2788_v53 = vadd.f32 %v4869_v33, %v2707_v24 }
 0x276   : > { %v2484_v23 = vpop.f32.mrb[119].mxu0 }
 0x277   : > { %2943 = vrot.lane.b32.xlu0 %v2879_v20, %s3855_s25  ;;  %v2672_v58 = vsel %vm2597_vm2, %v2669_v42, %v2671_v40  ;;  %v2881_v26 = vsel %vm2806_vm3, %v2878_v27, %v2880_v21 }
 0x278   : > { %v2916_v14 = vpop.permute.xlu0 %2915  ;;  %2736 = vrot.lane.b32.xlu1 %v2672_v58, %s3854_s23 }
 0x279   : > { %v2997_v5 = vadd.f32 %v2916_v14, %v2788_v53 }
 0x27a   : > { %v1957_v30 = vpop.f32.mrb[120].mxu1  ;;  %v2709_v29 = vpop.permute.xlu1 %2708 }
 0x27b   : > { %v2487_v16 = vpop.f32.mrb[120].mxu0  ;;  %v3036_v2 = vadd.f32 %v4891_v13, %v2997_v5  ;;  %v1959_v18 = vpop.f32.mrb[121].mxu1  ;;  %v2789_v0 = vadd.f32 %v4874_v63, %v2709_v29 }
 0x27c   : > { %v5068_v41 = vadd.f32 %v2487_v16, %v1957_v30  ;;  %v2489_v34 = vpop.f32.mrb[121].mxu0  ;;  %v1960_v61 = vpop.f32.mrb[122].mxu1  ;;  %2945 = vrot.lane.b32.xlu1 %v2881_v26, %s3855_s25 }
 0x27d   : > { %v2490_v33 = vpop.f32.mrb[122].mxu0  ;;  %3069 = vst.msk [vmem:[%s4897_s7 + $0x70] sm:$0xff] %vm3054_vm4, %v3036_v2  ;;  %v1962_v46 = vpop.f32.mrb[123].mxu1 }
 0x27e   : > { %v5075_v47 = vadd.f32 %v2490_v33, %v1960_v61  ;;  %v2492_v8 = vpop.f32.mrb[123].mxu0  ;;  %v2918_v17 = vpop.permute.xlu1 %2917  ;;  %v2673_v4 = vrot.slane %v5068_v41, 1  ;;  %v2882_v60 = vrot.slane %v5068_v41, 2 }
 0x27f   : > { %v2998_v3 = vadd.f32 %v2918_v17, %v2789_v0 }
 0x280   : > { %v2674_v31 = vrot.slane %v5075_v47, 1  ;;  %v2883_v7 = vrot.slane %v5075_v47, 2 }
 0x281   : > { %v3037_v6 = vadd.f32 %v4891_v13, %v2998_v3 }
 0x282   : > { %v1965_v36 = vpop.f32.mrb[124].mxu1  ;;  %v2675_v50 = vsel %vm2597_vm2, %v2673_v4, %v2674_v31  ;;  %v2495_v63 = vpop.f32.mrb[124].mxu0  ;;  %v2884_v19 = vsel %vm2806_vm3, %v2882_v60, %v2883_v7 }
 0x283   : > { %2738 = vrot.lane.b32.xlu0 %v2675_v50, %s3854_s23  ;;  %v1967_v55 = vpop.f32.mrb[125].mxu1  ;;  %3070 = vst.msk [vmem:[%s4897_s7 + $0x78] sm:$0xff] %vm3054_vm4, %v3037_v6  ;;  %v3568_v1 = vadd.f32 %v2495_v63, %v1965_v36  ;;  %v2497_v42 = vpop.f32.mrb[125].mxu0 }
 0x284   : > { %v1968_v39 = vpop.f32.mrb[126].mxu1  ;;  %v2498_v27 = vpop.f32.mrb[126].mxu0 }
 0x285   : > { %v1969_v44 = vpop.f32.mrb[127].mxu1  ;;  %v2676_v11 = vrot.slane %v3568_v1, 1  ;;  %v2711_v49 = vpop.permute.xlu0 %2710  ;;  %v2885_v28 = vrot.slane %v3568_v1, 2 }
 0x286   : > { %v2499_v37 = vpop.f32.mrb[127].mxu0  ;;  %v2790_v22 = vadd.f32 %v4900_v59, %v2711_v49 }
 0x287   : > { %2947 = vrot.lane.b32.xlu0 %v2884_v19, %s3855_s25  ;;  %v2677_v48 = vsel %vm2597_vm2, %v2674_v31, %v2676_v11  ;;  %v2886_v40 = vsel %vm2806_vm3, %v2883_v7, %v2885_v28 }
 0x288   : > { %2740 = vrot.lane.b32.xlu1 %v2677_v48, %s3854_s23 }
 0x289   : > { %v2920_v25 = vpop.permute.xlu0 %2919 }
 0x28a   : > { %v2999_v24 = vadd.f32 %v2920_v25, %v2790_v22  ;;  %v2713_v62 = vpop.permute.xlu1 %2712 }
 0x28b   : > { %v2791_v23 = vadd.f32 %v4907_v51, %v2713_v62 }
 0x28c   : > { %v3038_v38 = vadd.f32 %v4891_v13, %v2999_v24  ;;  %2949 = vrot.lane.b32.xlu1 %v2886_v40, %s3855_s25 }
 0x28e   : > { %3071 = vst.msk [vmem:[%s4897_s7 + $0x80] sm:$0xff] %vm3054_vm4, %v3038_v38  ;;  %v2922_v20 = vpop.permute.xlu1 %2921 }
 0x28f   : > { %v3000_v21 = vadd.f32 %v2922_v20, %v2791_v23 }
 0x291   : > { %v3039_v59 = vadd.f32 %v4891_v13, %v3000_v21 }
 0x293   : > { %3072 = vst.msk [vmem:[%s4897_s7 + $0x88] sm:$0xff] %vm3054_vm4, %v3039_v59 }
 0x295   : > { %v2715_v53 = vpop.permute.xlu0 %2714 }
 0x296   : > { %v2792_v58 = vadd.f32 %v4926_v32, %v2715_v53 }
 0x299   : > { %v2924_v14 = vpop.permute.xlu0 %2923 }
 0x29a   : > { %v3001_v5 = vadd.f32 %v2924_v14, %v2792_v58  ;;  %v2717_v30 = vpop.permute.xlu1 %2716 }
 0x29b   : > { %v2793_v51 = vadd.f32 %v4931_v10, %v2717_v30 }
 0x29c   : > { %v3040_v29 = vadd.f32 %v4891_v13, %v3001_v5 }
 0x29e   : > { %3073 = vst.msk [vmem:[%s4897_s7 + $0x90] sm:$0xff] %vm3054_vm4, %v3040_v29  ;;  %v2926_v16 = vpop.permute.xlu1 %2925 }
 0x29f   : > { %v3002_v2 = vadd.f32 %v2926_v16, %v2793_v51 }
 0x2a1   : > { %v3041_v18 = vadd.f32 %v4891_v13, %v3002_v2 }
 0x2a3   : > { %3074 = vst.msk [vmem:[%s4897_s7 + $0x98] sm:$0xff] %vm3054_vm4, %v3041_v18 }
 0x2a5   : > { %v2719_v34 = vpop.permute.xlu0 %2718 }
 0x2a6   : > { %v2794_v32 = vadd.f32 %v4948_v9, %v2719_v34 }
 0x2a9   : > { %v2928_v26 = vpop.permute.xlu0 %2927 }
 0x2aa   : > { %v3003_v61 = vadd.f32 %v2928_v26, %v2794_v32  ;;  %v2721_v33 = vpop.permute.xlu1 %2720 }
 0x2ab   : > { %v2795_v10 = vadd.f32 %v4955_v56, %v2721_v33 }
 0x2ac   : > { %v3042_v0 = vadd.f32 %v4891_v13, %v3003_v61 }
 0x2ae   : > { %3075 = vst.msk [vmem:[%s4897_s7 + $0xa0] sm:$0xff] %vm3054_vm4, %v3042_v0  ;;  %v2930_v46 = vpop.permute.xlu1 %2929 }
 0x2af   : > { %v3004_v8 = vadd.f32 %v2930_v46, %v2795_v10 }
 0x2b1   : > { %v3043_v17 = vadd.f32 %v4891_v13, %v3004_v8 }
 0x2b3   : > { %3076 = vst.msk [vmem:[%s4897_s7 + $0xa8] sm:$0xff] %vm3054_vm4, %v3043_v17 }
 0x2b5   : > { %v2723_v4 = vpop.permute.xlu0 %2722 }
 0x2b6   : > { %v2796_v9 = vadd.f32 %v4972_v54, %v2723_v4 }
 0x2b9   : > { %v2932_v31 = vpop.permute.xlu0 %2931 }
 0x2ba   : > { %v3005_v3 = vadd.f32 %v2932_v31, %v2796_v9  ;;  %v2725_v7 = vpop.permute.xlu1 %2724 }
 0x2bb   : > { %v2797_v56 = vadd.f32 %v4979_v52, %v2725_v7 }
 0x2bc   : > { %v3044_v6 = vadd.f32 %v4891_v13, %v3005_v3 }
 0x2be   : > { %3077 = vst.msk [vmem:[%s4897_s7 + $0xb0] sm:$0xff] %vm3054_vm4, %v3044_v6  ;;  %v2934_v36 = vpop.permute.xlu1 %2933 }
 0x2bf   : > { %v3006_v50 = vadd.f32 %v2934_v36, %v2797_v56 }
 0x2c1   : > { %v3045_v63 = vadd.f32 %v4891_v13, %v3006_v50 }
 0x2c3   : > { %3078 = vst.msk [vmem:[%s4897_s7 + $0xb8] sm:$0xff] %vm3054_vm4, %v3045_v63 }
 0x2c5   : > { %v2727_v55 = vpop.permute.xlu0 %2726 }
 0x2c6   : > { %v2798_v54 = vadd.f32 %v4996_v45, %v2727_v55 }
 0x2c9   : > { %v2936_v60 = vpop.permute.xlu0 %2935 }
 0x2ca   : > { %v3007_v1 = vadd.f32 %v2936_v60, %v2798_v54  ;;  %v2729_v42 = vpop.permute.xlu1 %2728 }
 0x2cb   : > { %v2799_v52 = vadd.f32 %v5003_v57, %v2729_v42 }
 0x2cc   : > { %v3046_v39 = vadd.f32 %v4891_v13, %v3007_v1 }
 0x2ce   : > { %3079 = vst.msk [vmem:[%s4897_s7 + $0xc0] sm:$0xff] %vm3054_vm4, %v3046_v39  ;;  %v2938_v27 = vpop.permute.xlu1 %2937 }
 0x2cf   : > { %v3008_v44 = vadd.f32 %v2938_v27, %v2799_v52 }
 0x2d1   : > { %v3047_v11 = vadd.f32 %v4891_v13, %v3008_v44 }
 0x2d3   : > { %3080 = vst.msk [vmem:[%s4897_s7 + $0xc8] sm:$0xff] %vm3054_vm4, %v3047_v11 }
 0x2d5   : > { %v2731_v49 = vpop.permute.xlu0 %2730 }
 0x2d6   : > { %v2800_v45 = vadd.f32 %v5020_v15, %v2731_v49 }
 0x2d9   : > { %v2940_v37 = vpop.permute.xlu0 %2939 }
 0x2da   : > { %v3009_v19 = vadd.f32 %v2940_v37, %v2800_v45  ;;  %v2733_v28 = vpop.permute.xlu1 %2732 }
 0x2db   : > { %v2801_v57 = vadd.f32 %v5027_v12, %v2733_v28 }
 0x2dc   : > { %v3048_v48 = vadd.f32 %v4891_v13, %v3009_v19 }
 0x2de   : > { %3081 = vst.msk [vmem:[%s4897_s7 + $0xd0] sm:$0xff] %vm3054_vm4, %v3048_v48  ;;  %v2942_v22 = vpop.permute.xlu1 %2941 }
 0x2df   : > { %v3010_v25 = vadd.f32 %v2942_v22, %v2801_v57 }
 0x2e1   : > { %v3049_v24 = vadd.f32 %v4891_v13, %v3010_v25 }
 0x2e3   : > { %3082 = vst.msk [vmem:[%s4897_s7 + $0xd8] sm:$0xff] %vm3054_vm4, %v3049_v24 }
 0x2e5   : > { %v2735_v62 = vpop.permute.xlu0 %2734 }
 0x2e6   : > { %v2802_v15 = vadd.f32 %v5044_v35, %v2735_v62 }
 0x2e9   : > { %v2944_v40 = vpop.permute.xlu0 %2943 }
 0x2ea   : > { %v3011_v38 = vadd.f32 %v2944_v40, %v2802_v15  ;;  %v2737_v23 = vpop.permute.xlu1 %2736 }
 0x2eb   : > { %v2803_v12 = vadd.f32 %v5051_v43, %v2737_v23 }
 0x2ec   : > { %v3050_v20 = vadd.f32 %v4891_v13, %v3011_v38 }
 0x2ee   : > { %3083 = vst.msk [vmem:[%s4897_s7 + $0xe0] sm:$0xff] %vm3054_vm4, %v3050_v20  ;;  %v2946_v21 = vpop.permute.xlu1 %2945 }
 0x2ef   : > { %v3012_v59 = vadd.f32 %v2946_v21, %v2803_v12 }
 0x2f1   : > { %v3051_v53 = vadd.f32 %v4891_v13, %v3012_v59 }
 0x2f3   : > { %3084 = vst.msk [vmem:[%s4897_s7 + $0xe8] sm:$0xff] %vm3054_vm4, %v3051_v53 }
 0x2f5   : > { %v2739_v58 = vpop.permute.xlu0 %2738 }
 0x2f6   : > { %v2804_v35 = vadd.f32 %v5068_v41, %v2739_v58 }
 0x2f9   : > { %v2948_v14 = vpop.permute.xlu0 %2947 }
 0x2fa   : > { %v3013_v5 = vadd.f32 %v2948_v14, %v2804_v35  ;;  %v2741_v30 = vpop.permute.xlu1 %2740 }
 0x2fb   : > { %v2805_v51 = vadd.f32 %v5075_v47, %v2741_v30 }
 0x2fc   : > { %v3052_v29 = vadd.f32 %v4891_v13, %v3013_v5 }
 0x2fe   : > { %3085 = vst.msk [vmem:[%s4897_s7 + $0xf0] sm:$0xff] %vm3054_vm4, %v3052_v29  ;;  %v2950_v43 = vpop.permute.xlu1 %2949 }
 0x2ff   : > { %v3014_v16 = vadd.f32 %v2950_v43, %v2805_v51 }
 0x301   : > { %v3053_v2 = vadd.f32 %v4891_v13, %v3014_v16 }
 0x303   : > { %3086 = vst.msk [vmem:[%s4897_s7 + $0xf8] sm:$0xff] %vm3054_vm4, %v3053_v2 }
 0x304 PF: > { %s15_s20 = sadd.s32 1, %s3851_s20   ;;  %s5171_s18 = smov %s3847_s19 }
 0x305   : > { %p12_p5 = scmp.ge.s32.totalorder %s15_s20, 4   ;;  %s5172_s19 = smov %s5174_s21 }
 0x307   :  { %14 = sbr.rel (!%p12_p5) target bundleno = 2 (0x2), region = 85 }

</bundles_post_ra>
